<compile_context>
chip_gen: v7x
topology: tpu7x:2x2x1
jax: 0.10.0
libtpu: 0.0.40
codegen_flags: <defaults>
</compile_context>

<pallas_src>
import functools
import math

import jax
import jax.numpy as jnp
from jax import lax
from jax.experimental import pallas as pl
from jax.experimental.pallas import tpu as pltpu


_INV_SQRT2 = 0.7071067811865476
_NEG_BIG = -1e30


# ----------------------------------------------------------------------------
# In-kernel math helpers (elementwise math in f32, matmul operands bf16)
# ----------------------------------------------------------------------------

def _bf16(x):
    return x.astype(jnp.bfloat16)


def _gelu_exact(x):
    # torch.nn.GELU() default = exact erf-based GELU
    return 0.5 * x * (1.0 + lax.erf(x * _INV_SQRT2))


def _layernorm_f32(x, g, b, eps=1e-5):
    x = x.astype(jnp.float32)
    mean = jnp.mean(x, axis=-1, keepdims=True)
    var = jnp.mean((x - mean) ** 2, axis=-1, keepdims=True)
    return (x - mean) * lax.rsqrt(var + eps) * g + b


# ----------------------------------------------------------------------------
# Kernels
# ----------------------------------------------------------------------------

def _embed_kernel(p_ref, w_ref, add_ref, o_ref):
    """Patch embedding on a (tb, S_pad, K) block.

    add_ref already holds [cls ; pos + emb_bias ; 0-pad rows] (S_pad, D), so
    the kernel is a single flattened matmul + broadcast add (no concat)."""
    tb, s_pad, k = p_ref.shape
    d = w_ref.shape[1]
    p = p_ref[...].reshape(tb * s_pad, k)                 # bf16 rows (M, K)
    tok = jnp.dot(_bf16(p), w_ref[...], preferred_element_type=jnp.float32)
    tok = tok.reshape(tb, s_pad, d) + add_ref[...]        # broadcast over tb
    o_ref[...] = tok.astype(o_ref.dtype)


def _layer_kernel(x_ref, ln_g_ref, ln_b_ref, wqkv_ref, bqkv_ref,
                  wo_ref, bo_ref, w1_ref, b1_ref, w2_ref, b2_ref,
                  kbias_ref, o_ref, ctx_ref, *, num_heads):
    """Fused transformer layer on a (tb, S_pad, D) block.

    Token-parallel matmuls run on the flattened (tb*S_pad, D) rows; only the
    per-head SxS attention keeps per-batch structure. Per-head context tiles
    are written into the VMEM scratch `ctx_ref` so the out-projection is a
    single full-K matmul (no concatenate)."""
    tb, s_pad, d = x_ref.shape
    m = tb * s_pad
    dh = d // num_heads
    scale = 1.0 / math.sqrt(dh)

    x = x_ref[...].astype(jnp.float32).reshape(m, d)      # residual stream f32
    y = _layernorm_f32(x, ln_g_ref[...], ln_b_ref[...])

    # Packed QKV projection: (M, D) @ (D, 3D), bf16 operands, f32 accumulate.
    qkv = jnp.dot(_bf16(y), wqkv_ref[...],
                  preferred_element_type=jnp.float32) + bqkv_ref[...]
    q = qkv[:, 0 * d:1 * d] * scale        # fold 1/sqrt(dh) into q (S*dh work)
    k = qkv[:, 1 * d:2 * d]
    v = qkv[:, 2 * d:3 * d]

    kbias = kbias_ref[...]                 # (1, S_pad): 0 valid / -1e30 pad key

    # Per (batch, head) attention; unrolled at trace time (tb, num_heads small).
    for b in range(tb):
        r0 = b * s_pad
        for h in range(num_heads):
            c0 = h * dh
            qh = q[r0:r0 + s_pad, c0:c0 + dh]
            kh = k[r0:r0 + s_pad, c0:c0 + dh]
            vh = v[r0:r0 + s_pad, c0:c0 + dh]
            s = lax.dot_general(_bf16(qh), _bf16(kh), (((1,), (1,)), ((), ())),
                                preferred_element_type=jnp.float32)
            s = s + kbias                              # mask padded keys
            mx = jnp.max(s, axis=-1, keepdims=True)
            e = jnp.exp(s - mx)
            denom = jnp.sum(e, axis=-1, keepdims=True)
            p = e * pl.reciprocal(denom, approx=True)  # EUP slot
            ctx_ref[r0:r0 + s_pad, c0:c0 + dh] = jnp.dot(
                _bf16(p), _bf16(vh), preferred_element_type=jnp.float32)

    # Out-projection from scratch: full K = D contraction, no concatenate.
    attn = jnp.dot(_bf16(ctx_ref[...]), wo_ref[...],
                   preferred_element_type=jnp.float32) + bo_ref[...]
    r1 = x + attn                                        # residual add (f32)

    # Feed-forward on the un-normalized residual (reference discards norm_ff).
    h1 = _gelu_exact(jnp.dot(_bf16(r1), w1_ref[...],
                             preferred_element_type=jnp.float32) + b1_ref[...])
    ffo = jnp.dot(_bf16(h1), w2_ref[...],
                  preferred_element_type=jnp.float32) + b2_ref[...]
    out = r1 + ffo

    o_ref[...] = out.reshape(tb, s_pad, d).astype(o_ref.dtype)


def _classifier_kernel(x_ref, ln_g_ref, ln_b_ref, w1_ref, b1_ref,
                       w2_ref, b2_ref, score_ref, logits_ref):
    """Fused classifier tail: LayerNorm -> Linear+GELU -> Linear -> softmax."""
    x = x_ref[...].astype(jnp.float32)                    # (B, D)
    y = _layernorm_f32(x, ln_g_ref[...], ln_b_ref[...])
    h = _gelu_exact(jnp.dot(_bf16(y), w1_ref[...],
                            preferred_element_type=jnp.float32) + b1_ref[...])
    logits = jnp.dot(_bf16(h), w2_ref[...],
                     preferred_element_type=jnp.float32) + b2_ref[...]
    mx = jnp.max(logits, axis=-1, keepdims=True)
    e = jnp.exp(logits - mx)
    score = e / jnp.sum(e, axis=-1, keepdims=True)        # exact div (tiny)
    score_ref[...] = score.astype(score_ref.dtype)
    logits_ref[...] = logits.astype(logits_ref.dtype)


# ----------------------------------------------------------------------------
# Pallas wrappers
# ----------------------------------------------------------------------------

def _round_up(x, m):
    return (x + m - 1) // m * m


def _pick_batch_tile(batch, s_pad, target_rows=256):
    """Largest batch tile with tile_b*S_pad <= ~target_rows that divides B."""
    tb = max(1, min(batch, target_rows // s_pad))
    while batch % tb:
        tb -= 1
    return tb


def embed_tokens(patches_padded, emb_w, additive, out_dtype):
    """patches_padded: (B, S_pad, K) bf16 (row 0 and pad rows are zero)."""
    B, S_pad, K = patches_padded.shape
    D = emb_w.shape[1]
    tb = _pick_batch_tile(B, S_pad)
    cost = pl.CostEstimate(
        flops=2 * B * S_pad * K * D,
        transcendentals=0,
        bytes_accessed=(patches_padded.size * 2 + emb_w.size * 2
                        + additive.size * 4 + B * S_pad * D * 2))
    return pl.pallas_call(
        _embed_kernel,
        out_shape=jax.ShapeDtypeStruct((B, S_pad, D), out_dtype),
        grid=(B // tb,),
        in_specs=[
            pl.BlockSpec((tb, S_pad, K), lambda i: (i, 0, 0)),
            pl.BlockSpec((K, D), lambda i: (0, 0)),
            pl.BlockSpec((S_pad, D), lambda i: (0, 0)),
        ],
        out_specs=pl.BlockSpec((tb, S_pad, D), lambda i: (i, 0, 0)),
        compiler_params=pltpu.CompilerParams(dimension_semantics=("parallel",)),
        cost_estimate=cost,
    )(patches_padded, emb_w, additive)


def transformer_layer(x_tok, layer, key_bias, num_heads):
    """x_tok: (B, S_pad, D) -> one fused attention+FF layer."""
    B, S_pad, D = x_tok.shape
    D_ff = layer["ff1_w"].shape[1]
    tb = _pick_batch_tile(B, S_pad)
    m = B * S_pad
    flops = (2 * m * D * 3 * D                       # QKV
             + 4 * B * num_heads * S_pad * S_pad * (D // num_heads)  # scores+ctx
             + 2 * m * D * D                         # out-proj
             + 4 * m * D * D_ff)                     # FF1 + FF2
    trans = B * num_heads * S_pad * S_pad + m * D_ff
    bytes_acc = (2 * m * D * 2
                 + (3 * D * D + D * D + 2 * D * D_ff) * 2
                 + (3 * D + D + D_ff + D + 2 * D) * 4)
    cost = pl.CostEstimate(flops=flops, transcendentals=trans,
                           bytes_accessed=bytes_acc)
    return pl.pallas_call(
        functools.partial(_layer_kernel, num_heads=num_heads),
        out_shape=jax.ShapeDtypeStruct((B, S_pad, D), x_tok.dtype),
        grid=(B // tb,),
        in_specs=[
            pl.BlockSpec((tb, S_pad, D), lambda i: (i, 0, 0)),
            pl.BlockSpec((1, D), lambda i: (0, 0)),
            pl.BlockSpec((1, D), lambda i: (0, 0)),
            pl.BlockSpec((D, 3 * D), lambda i: (0, 0)),
            pl.BlockSpec((1, 3 * D), lambda i: (0, 0)),
            pl.BlockSpec((D, D), lambda i: (0, 0)),
            pl.BlockSpec((1, D), lambda i: (0, 0)),
            pl.BlockSpec((D, D_ff), lambda i: (0, 0)),
            pl.BlockSpec((1, D_ff), lambda i: (0, 0)),
            pl.BlockSpec((D_ff, D), lambda i: (0, 0)),
            pl.BlockSpec((1, D), lambda i: (0, 0)),
            pl.BlockSpec((1, S_pad), lambda i: (0, 0)),
        ],
        out_specs=pl.BlockSpec((tb, S_pad, D), lambda i: (i, 0, 0)),
        scratch_shapes=[pltpu.VMEM((tb * S_pad, D), jnp.float32)],
        compiler_params=pltpu.CompilerParams(dimension_semantics=("parallel",)),
        cost_estimate=cost,
    )(x_tok,
      layer["ln1_g"], layer["ln1_b"],
      layer["in_proj_w"], layer["in_proj_b"],
      layer["out_w"], layer["out_b"],
      layer["ff1_w"], layer["ff1_b"],
      layer["ff2_w"], layer["ff2_b"],
      key_bias)


def classifier_head(cls_tok, params):
    """cls_tok: (B, D) -> (score, logits), both (B, num_classes) in f32."""
    B, D = cls_tok.shape
    nc = params["cls_w2"].shape[1]
    return pl.pallas_call(
        _classifier_kernel,
        out_shape=(jax.ShapeDtypeStruct((B, nc), jnp.float32),
                   jax.ShapeDtypeStruct((B, nc), jnp.float32)),
        grid=(1,),
        in_specs=[
            pl.BlockSpec((B, D), lambda i: (0, 0)),
            pl.BlockSpec((1, D), lambda i: (0, 0)),
            pl.BlockSpec((1, D), lambda i: (0, 0)),
            pl.BlockSpec((D, 2 * D), lambda i: (0, 0)),
            pl.BlockSpec((1, 2 * D), lambda i: (0, 0)),
            pl.BlockSpec((2 * D, nc), lambda i: (0, 0)),
            pl.BlockSpec((1, nc), lambda i: (0, 0)),
        ],
        out_specs=(pl.BlockSpec((B, nc), lambda i: (0, 0)),
                   pl.BlockSpec((B, nc), lambda i: (0, 0))),
    )(cls_tok,
      params["cls_ln_g"], params["cls_ln_b"],
      params["cls_w1"], params["cls_b1"],
      params["cls_w2"], params["cls_b2"])


# ----------------------------------------------------------------------------
# Parameter initialization (deterministic, synthetic)
# ----------------------------------------------------------------------------

def init_params(key, *, H, W, P, D, D_ff, num_heads, num_layers, num_classes,
                C=1, w_dtype=jnp.bfloat16):
    assert C == 1, "reference Linear(P*P, D) is only shape-consistent for C==1"
    assert D % num_heads == 0
    N = (H * W) // (P * P)
    f32 = jnp.float32
    keys = iter(jax.random.split(key, 8 + 8 * num_layers))

    def w(shape, scale=0.02):
        return (scale * jax.random.normal(next(keys), shape)).astype(w_dtype)

    params = {
        "emb_w": w((P * P * C, D)),
        "emb_b": jnp.zeros((D,), f32),
        "pos": jax.random.normal(next(keys), (N, D)).astype(f32),
        "cls": jax.random.normal(next(keys), (1, D)).astype(f32),
        "layers": [],
        "cls_ln_g": jnp.ones((1, D), f32),
        "cls_ln_b": jnp.zeros((1, D), f32),
        "cls_w1": w((D, 2 * D)),
        "cls_b1": jnp.zeros((1, 2 * D), f32),
        "cls_w2": w((2 * D, num_classes)),
        "cls_b2": jnp.zeros((1, num_classes), f32),
    }
    for _ in range(num_layers):
        params["layers"].append({
            "ln1_g": jnp.ones((1, D), f32),
            "ln1_b": jnp.zeros((1, D), f32),
            "in_proj_w": w((D, 3 * D)),       # packed q|k|v, stored as (D, 3D)
            "in_proj_b": jnp.zeros((1, 3 * D), f32),
            "out_w": w((D, D)),
            "out_b": jnp.zeros((1, D), f32),
            # norm_ff exists in the reference module but its output is
            # discarded in forward(), so its params are never read here.
            "ff1_w": w((D, D_ff)),
            "ff1_b": jnp.zeros((1, D_ff), f32),
            "ff2_w": w((D_ff, D)),
            "ff2_b": jnp.zeros((1, D), f32),
        })
    return params


# ----------------------------------------------------------------------------
# Forward pass
# ----------------------------------------------------------------------------

def vit_forward(params, x, *, P, num_heads):
    B, C, H, W = x.shape
    h, w = H // P, W // P
    N = h * w
    D = params["emb_w"].shape[1]
    S = N + 1
    S_pad = _round_up(S, 8)                    # sublane-dense sequence

    # einops: 'B C (h ph) (w pw) -> B (h w) (ph pw C)'
    xp = x.reshape(B, C, h, P, w, P)
    xp = jnp.transpose(xp, (0, 2, 4, 3, 5, 1))
    xp = xp.reshape(B, N, P * P * C)
    # zero row 0 (class-token slot) + zero pad rows at the end
    xp = jnp.pad(xp, ((0, 0), (1, S_pad - S), (0, 0))).astype(jnp.bfloat16)

    # additive = [class_token ; pos + emb_bias ; 0 pad rows], precomputed once
    additive = jnp.concatenate(
        [params["cls"],
         params["pos"] + params["emb_b"][None, :],
         jnp.zeros((S_pad - S, D), jnp.float32)], axis=0)

    # key bias masks the pad rows out of every attention softmax
    key_bias = jnp.where(jnp.arange(S_pad) < S, 0.0, _NEG_BIG)
    key_bias = key_bias.astype(jnp.float32).reshape(1, S_pad)

    x_tok = embed_tokens(xp, params["emb_w"], additive, jnp.bfloat16)

    for layer in params["layers"]:
        x_tok = transformer_layer(x_tok, layer, key_bias, num_heads)

    cls_tok = x_tok[:, 0, :]                                  # (B, D)
    score, logits = classifier_head(cls_tok, params)
    return score, logits


# ----------------------------------------------------------------------------
# Demo
# ----------------------------------------------------------------------------

if __name__ == "__main__":
    B, C, H, W = 2, 1, 16, 16
    P, D, D_ff = 4, 128, 256          # D multiple of 128 -> lane-dense blocks
    num_heads, num_layers, num_classes = 4, 2, 8

    key = jax.random.PRNGKey(0)
    k_params, k_x = jax.random.split(key)

    params = init_params(k_params, H=H, W=W, P=P, D=D, D_ff=D_ff,
                         num_heads=num_heads, num_layers=num_layers,
                         num_classes=num_classes, C=C)
    x = jax.random.normal(k_x, (B, C, H, W), dtype=jnp.float32)

    fwd = jax.jit(functools.partial(vit_forward, P=P, num_heads=num_heads))
    score, logits = fwd(params, x)
    jax.block_until_ready((score, logits))

    assert score.shape == (B, num_classes) and logits.shape == (B, num_classes)
    assert bool(jnp.all(jnp.isfinite(score))) and bool(jnp.all(jnp.isfinite(logits)))
    assert bool(jnp.allclose(jnp.sum(score, axis=1), 1.0, atol=1e-5))
    print("KERNEL_OK")
</pallas_src>

<mosaic_0001>
module attributes {stable_mosaic.version = 11 : i64} {
  func.func @_embed_kernel(%arg0: i32, %arg1: memref<2x24x16xbf16, #tpu.memory_space<vmem>>, %arg2: memref<16x128xbf16, #tpu.memory_space<vmem>>, %arg3: memref<24x128xf32, #tpu.memory_space<vmem>>, %arg4: memref<2x24x128xbf16, #tpu.memory_space<vmem>>) attributes {dimension_semantics = [#tpu.dimension_semantics<parallel>], iteration_bounds = array<i64: 1>, scalar_prefetch = 0 : i64, scratch_operands = 0 : i64, tpu.core_type = #tpu.core_type<tc>, window_params = [{transform_indices = @transform_0, window_bounds = array<i64: 2, 24, 16>}, {pipeline_mode = #tpu.pipeline_mode<synchronous>, transform_indices = @transform_1, window_bounds = array<i64: 16, 128>}, {pipeline_mode = #tpu.pipeline_mode<synchronous>, transform_indices = @transform_2, window_bounds = array<i64: 24, 128>}, {transform_indices = @transform_3, window_bounds = array<i64: 2, 24, 128>}]} {
    %c0 = arith.constant 0 : index
    %c0_0 = arith.constant 0 : index
    %c0_1 = arith.constant 0 : index
    %0 = vector.load %arg1[%c0, %c0_0, %c0_1] : memref<2x24x16xbf16, #tpu.memory_space<vmem>>, vector<2x24x16xbf16>
    %1 = vector.shape_cast %0 : vector<2x24x16xbf16> to vector<48x16xbf16>
    %c0_2 = arith.constant 0 : index
    %c0_3 = arith.constant 0 : index
    %2 = vector.load %arg2[%c0_2, %c0_3] : memref<16x128xbf16, #tpu.memory_space<vmem>>, vector<16x128xbf16>
    %cst = arith.constant dense<0.000000e+00> : vector<48x128xf32>
    %3 = tpu.matmul %1, %2, %cst {dimension_numbers = #tpu.dot_dimension_numbers<[1], [0], [0], [1], [0, 0, 1, 1], [], []>} : vector<48x16xbf16>, vector<16x128xbf16>, vector<48x128xf32> -> vector<48x128xf32>
    %4 = vector.shape_cast %3 : vector<48x128xf32> to vector<2x24x128xf32>
    %c0_4 = arith.constant 0 : index
    %c0_5 = arith.constant 0 : index
    %5 = vector.load %arg3[%c0_4, %c0_5] : memref<24x128xf32, #tpu.memory_space<vmem>>, vector<24x128xf32>
    %6 = vector.shape_cast %5 : vector<24x128xf32> to vector<1x24x128xf32>
    %7 = vector.broadcast %6 : vector<1x24x128xf32> to vector<2x24x128xf32>
    %8 = arith.addf %4, %7 : vector<2x24x128xf32>
    %9 = arith.truncf %8 : vector<2x24x128xf32> to vector<2x24x128xbf16>
    %c0_6 = arith.constant 0 : index
    %c0_7 = arith.constant 0 : index
    %c0_8 = arith.constant 0 : index
    %10 = vector.load %arg4[%c0_6, %c0_7, %c0_8] : memref<2x24x128xbf16, #tpu.memory_space<vmem>>, vector<2x24x128xbf16>
    tpu.vector_store %arg4[%c0_6, %c0_7, %c0_8], %9 {strides = array<i32>} : memref<2x24x128xbf16, #tpu.memory_space<vmem>>, vector<2x24x128xbf16>,
    return
  }
  func.func @transform_0(%arg0: i32) -> (i32, i32, i32) {
    %c0_i32 = arith.constant 0 : i32
    %c0_i32_0 = arith.constant 0 : i32
    %c0_i32_1 = arith.constant 0 : i32
    return %arg0, %c0_i32, %c0_i32_0 : i32, i32, i32
  }
  func.func @transform_1(%arg0: i32) -> (i32, i32) {
    %c0_i32 = arith.constant 0 : i32
    %c0_i32_0 = arith.constant 0 : i32
    %c0_i32_1 = arith.constant 0 : i32
    return %c0_i32, %c0_i32_0 : i32, i32
  }
  func.func @transform_2(%arg0: i32) -> (i32, i32) {
    %c0_i32 = arith.constant 0 : i32
    %c0_i32_0 = arith.constant 0 : i32
    %c0_i32_1 = arith.constant 0 : i32
    return %c0_i32, %c0_i32_0 : i32, i32
  }
  func.func @transform_3(%arg0: i32) -> (i32, i32, i32) {
    %c0_i32 = arith.constant 0 : i32
    %c0_i32_0 = arith.constant 0 : i32
    %c0_i32_1 = arith.constant 0 : i32
    return %arg0, %c0_i32, %c0_i32_0 : i32, i32, i32
  }
}

module attributes {stable_mosaic.version = 11 : i64} {
  func.func @_classifier_kernel(%arg0: i32, %arg1: memref<2x128xbf16, #tpu.memory_space<vmem>>, %arg2: memref<1x128xf32, #tpu.memory_space<vmem>>, %arg3: memref<1x128xf32, #tpu.memory_space<vmem>>, %arg4: memref<128x256xbf16, #tpu.memory_space<vmem>>, %arg5: memref<1x256xf32, #tpu.memory_space<vmem>>, %arg6: memref<256x8xbf16, #tpu.memory_space<vmem>>, %arg7: memref<1x8xf32, #tpu.memory_space<vmem>>, %arg8: memref<2x8xf32, #tpu.memory_space<vmem>>, %arg9: memref<2x8xf32, #tpu.memory_space<vmem>>) attributes {dimension_semantics = [#tpu.dimension_semantics<arbitrary>], iteration_bounds = array<i64: 1>, scalar_prefetch = 0 : i64, scratch_operands = 0 : i64, tpu.core_type = #tpu.core_type<tc>, window_params = [{pipeline_mode = #tpu.pipeline_mode<synchronous>, transform_indices = @transform_0, window_bounds = array<i64: 2, 128>}, {pipeline_mode = #tpu.pipeline_mode<synchronous>, transform_indices = @transform_1, window_bounds = array<i64: 1, 128>}, {pipeline_mode = #tpu.pipeline_mode<synchronous>, transform_indices = @transform_2, window_bounds = array<i64: 1, 128>}, {pipeline_mode = #tpu.pipeline_mode<synchronous>, transform_indices = @transform_3, window_bounds = array<i64: 128, 256>}, {pipeline_mode = #tpu.pipeline_mode<synchronous>, transform_indices = @transform_4, window_bounds = array<i64: 1, 256>}, {pipeline_mode = #tpu.pipeline_mode<synchronous>, transform_indices = @transform_5, window_bounds = array<i64: 256, 8>}, {pipeline_mode = #tpu.pipeline_mode<synchronous>, transform_indices = @transform_6, window_bounds = array<i64: 1, 8>}, {pipeline_mode = #tpu.pipeline_mode<synchronous>, transform_indices = @transform_7, window_bounds = array<i64: 2, 8>}, {pipeline_mode = #tpu.pipeline_mode<synchronous>, transform_indices = @transform_8, window_bounds = array<i64: 2, 8>}]} {
    %c0 = arith.constant 0 : index
    %c0_0 = arith.constant 0 : index
    %0 = vector.load %arg1[%c0, %c0_0] : memref<2x128xbf16, #tpu.memory_space<vmem>>, vector<2x128xbf16>
    %1 = arith.extf %0 : vector<2x128xbf16> to vector<2x128xf32>
    %c0_1 = arith.constant 0 : index
    %c0_2 = arith.constant 0 : index
    %2 = vector.load %arg2[%c0_1, %c0_2] : memref<1x128xf32, #tpu.memory_space<vmem>>, vector<1x128xf32>
    %c0_3 = arith.constant 0 : index
    %c0_4 = arith.constant 0 : index
    %3 = vector.load %arg3[%c0_3, %c0_4] : memref<1x128xf32, #tpu.memory_space<vmem>>, vector<1x128xf32>
    %cst = arith.constant dense<0.000000e+00> : vector<2xf32>
    %4 = vector.multi_reduction <add>, %1, %cst [1] : vector<2x128xf32> to vector<2xf32>
    %5 = vector.shape_cast %4 : vector<2xf32> to vector<2x1xf32>
    %cst_5 = arith.constant 1.280000e+02 : f32
    %6 = vector.broadcast %cst_5 : f32 to vector<2x1xf32>
    %7 = arith.divf %5, %6 : vector<2x1xf32>
    %8 = vector.broadcast %7 : vector<2x1xf32> to vector<2x128xf32>
    %9 = arith.subf %1, %8 : vector<2x128xf32>
    %10 = arith.mulf %9, %9 : vector<2x128xf32>
    %cst_6 = arith.constant dense<0.000000e+00> : vector<2xf32>
    %11 = vector.multi_reduction <add>, %10, %cst_6 [1] : vector<2x128xf32> to vector<2xf32>
    %12 = vector.shape_cast %11 : vector<2xf32> to vector<2x1xf32>
    %cst_7 = arith.constant 1.280000e+02 : f32
    %13 = vector.broadcast %cst_7 : f32 to vector<2x1xf32>
    %14 = arith.divf %12, %13 : vector<2x1xf32>
    %15 = vector.broadcast %7 : vector<2x1xf32> to vector<2x128xf32>
    %16 = arith.subf %1, %15 : vector<2x128xf32>
    %cst_8 = arith.constant 9.99999974E-6 : f32
    %17 = vector.broadcast %cst_8 : f32 to vector<2x1xf32>
    %18 = arith.addf %14, %17 : vector<2x1xf32>
    %19 = math.rsqrt %18 : vector<2x1xf32>
    %20 = vector.broadcast %19 : vector<2x1xf32> to vector<2x128xf32>
    %21 = arith.mulf %16, %20 : vector<2x128xf32>
    %22 = vector.broadcast %2 : vector<1x128xf32> to vector<2x128xf32>
    %23 = arith.mulf %21, %22 : vector<2x128xf32>
    %24 = vector.broadcast %3 : vector<1x128xf32> to vector<2x128xf32>
    %25 = arith.addf %23, %24 : vector<2x128xf32>
    %26 = arith.truncf %25 : vector<2x128xf32> to vector<2x128xbf16>
    %c0_9 = arith.constant 0 : index
    %c0_10 = arith.constant 0 : index
    %27 = vector.load %arg4[%c0_9, %c0_10] : memref<128x256xbf16, #tpu.memory_space<vmem>>, vector<128x256xbf16>
    %cst_11 = arith.constant dense<0.000000e+00> : vector<2x256xf32>
    %28 = tpu.matmul %26, %27, %cst_11 {dimension_numbers = #tpu.dot_dimension_numbers<[1], [0], [0], [1], [0, 0, 1, 1], [], []>} : vector<2x128xbf16>, vector<128x256xbf16>, vector<2x256xf32> -> vector<2x256xf32>
    %c0_12 = arith.constant 0 : index
    %c0_13 = arith.constant 0 : index
    %29 = vector.load %arg5[%c0_12, %c0_13] : memref<1x256xf32, #tpu.memory_space<vmem>>, vector<1x256xf32>
    %30 = vector.broadcast %29 : vector<1x256xf32> to vector<2x256xf32>
    %31 = arith.addf %28, %30 : vector<2x256xf32>
    %cst_14 = arith.constant 5.000000e-01 : f32
    %32 = vector.broadcast %cst_14 : f32 to vector<2x256xf32>
    %33 = arith.mulf %32, %31 : vector<2x256xf32>
    %cst_15 = arith.constant 0.707106769 : f32
    %34 = vector.broadcast %cst_15 : f32 to vector<2x256xf32>
    %35 = arith.mulf %31, %34 : vector<2x256xf32>
    %36 = math.erf %35 : vector<2x256xf32>
    %cst_16 = arith.constant 1.000000e+00 : f32
    %37 = vector.broadcast %cst_16 : f32 to vector<2x256xf32>
    %38 = arith.addf %37, %36 : vector<2x256xf32>
    %39 = arith.mulf %33, %38 : vector<2x256xf32>
    %40 = arith.truncf %39 : vector<2x256xf32> to vector<2x256xbf16>
    %c0_17 = arith.constant 0 : index
    %c0_18 = arith.constant 0 : index
    %41 = vector.load %arg6[%c0_17, %c0_18] : memref<256x8xbf16, #tpu.memory_space<vmem>>, vector<256x8xbf16>
    %cst_19 = arith.constant dense<0.000000e+00> : vector<2x8xf32>
    %42 = tpu.matmul %40, %41, %cst_19 {dimension_numbers = #tpu.dot_dimension_numbers<[1], [0], [0], [1], [0, 0, 1, 1], [], []>} : vector<2x256xbf16>, vector<256x8xbf16>, vector<2x8xf32> -> vector<2x8xf32>
    %c0_20 = arith.constant 0 : index
    %c0_21 = arith.constant 0 : index
    %43 = vector.load %arg7[%c0_20, %c0_21] : memref<1x8xf32, #tpu.memory_space<vmem>>, vector<1x8xf32>
    %44 = vector.broadcast %43 : vector<1x8xf32> to vector<2x8xf32>
    %45 = arith.addf %42, %44 : vector<2x8xf32>
    %cst_22 = arith.constant dense<0xFF800000> : vector<2xf32>
    %46 = vector.multi_reduction <maximumf>, %45, %cst_22 [1] : vector<2x8xf32> to vector<2xf32>
    %47 = vector.shape_cast %46 : vector<2xf32> to vector<2x1xf32>
    %48 = vector.broadcast %47 : vector<2x1xf32> to vector<2x8xf32>
    %49 = arith.subf %45, %48 : vector<2x8xf32>
    %50 = math.exp %49 : vector<2x8xf32>
    %cst_23 = arith.constant dense<0.000000e+00> : vector<2xf32>
    %51 = vector.multi_reduction <add>, %50, %cst_23 [1] : vector<2x8xf32> to vector<2xf32>
    %52 = vector.shape_cast %51 : vector<2xf32> to vector<2x1xf32>
    %53 = vector.broadcast %52 : vector<2x1xf32> to vector<2x8xf32>
    %54 = arith.divf %50, %53 : vector<2x8xf32>
    %c0_24 = arith.constant 0 : index
    %c0_25 = arith.constant 0 : index
    %55 = vector.load %arg8[%c0_24, %c0_25] : memref<2x8xf32, #tpu.memory_space<vmem>>, vector<2x8xf32>
    tpu.vector_store %arg8[%c0_24, %c0_25], %54 {strides = array<i32>} : memref<2x8xf32, #tpu.memory_space<vmem>>, vector<2x8xf32>,
    %c0_26 = arith.constant 0 : index
    %c0_27 = arith.constant 0 : index
    %56 = vector.load %arg9[%c0_26, %c0_27] : memref<2x8xf32, #tpu.memory_space<vmem>>, vector<2x8xf32>
    tpu.vector_store %arg9[%c0_26, %c0_27], %45 {strides = array<i32>} : memref<2x8xf32, #tpu.memory_space<vmem>>, vector<2x8xf32>,
    return
  }
  func.func @transform_0(%arg0: i32) -> (i32, i32) {
    %c0_i32 = arith.constant 0 : i32
    %c0_i32_0 = arith.constant 0 : i32
    %c0_i32_1 = arith.constant 0 : i32
    return %c0_i32, %c0_i32_0 : i32, i32
  }
  func.func @transform_1(%arg0: i32) -> (i32, i32) {
    %c0_i32 = arith.constant 0 : i32
    %c0_i32_0 = arith.constant 0 : i32
    %c0_i32_1 = arith.constant 0 : i32
    return %c0_i32, %c0_i32_0 : i32, i32
  }
  func.func @transform_2(%arg0: i32) -> (i32, i32) {
    %c0_i32 = arith.constant 0 : i32
    %c0_i32_0 = arith.constant 0 : i32
    %c0_i32_1 = arith.constant 0 : i32
    return %c0_i32, %c0_i32_0 : i32, i32
  }
  func.func @transform_3(%arg0: i32) -> (i32, i32) {
    %c0_i32 = arith.constant 0 : i32
    %c0_i32_0 = arith.constant 0 : i32
    %c0_i32_1 = arith.constant 0 : i32
    return %c0_i32, %c0_i32_0 : i32, i32
  }
  func.func @transform_4(%arg0: i32) -> (i32, i32) {
    %c0_i32 = arith.constant 0 : i32
    %c0_i32_0 = arith.constant 0 : i32
    %c0_i32_1 = arith.constant 0 : i32
    return %c0_i32, %c0_i32_0 : i32, i32
  }
  func.func @transform_5(%arg0: i32) -> (i32, i32) {
    %c0_i32 = arith.constant 0 : i32
    %c0_i32_0 = arith.constant 0 : i32
    %c0_i32_1 = arith.constant 0 : i32
    return %c0_i32, %c0_i32_0 : i32, i32
  }
  func.func @transform_6(%arg0: i32) -> (i32, i32) {
    %c0_i32 = arith.constant 0 : i32
    %c0_i32_0 = arith.constant 0 : i32
    %c0_i32_1 = arith.constant 0 : i32
    return %c0_i32, %c0_i32_0 : i32, i32
  }
  func.func @transform_7(%arg0: i32) -> (i32, i32) {
    %c0_i32 = arith.constant 0 : i32
    %c0_i32_0 = arith.constant 0 : i32
    %c0_i32_1 = arith.constant 0 : i32
    return %c0_i32, %c0_i32_0 : i32, i32
  }
  func.func @transform_8(%arg0: i32) -> (i32, i32) {
    %c0_i32 = arith.constant 0 : i32
    %c0_i32_0 = arith.constant 0 : i32
    %c0_i32_1 = arith.constant 0 : i32
    return %c0_i32, %c0_i32_0 : i32, i32
  }
}

module attributes {stable_mosaic.version = 11 : i64} {
  func.func @_layer_kernel(%arg0: i32, %arg1: memref<2x24x128xbf16, #tpu.memory_space<vmem>>, %arg2: memref<1x128xf32, #tpu.memory_space<vmem>>, %arg3: memref<1x128xf32, #tpu.memory_space<vmem>>, %arg4: memref<128x384xbf16, #tpu.memory_space<vmem>>, %arg5: memref<1x384xf32, #tpu.memory_space<vmem>>, %arg6: memref<128x128xbf16, #tpu.memory_space<vmem>>, %arg7: memref<1x128xf32, #tpu.memory_space<vmem>>, %arg8: memref<128x256xbf16, #tpu.memory_space<vmem>>, %arg9: memref<1x256xf32, #tpu.memory_space<vmem>>, %arg10: memref<256x128xbf16, #tpu.memory_space<vmem>>, %arg11: memref<1x128xf32, #tpu.memory_space<vmem>>, %arg12: memref<1x24xf32, #tpu.memory_space<vmem>>, %arg13: memref<2x24x128xbf16, #tpu.memory_space<vmem>>, %arg14: memref<48x128xf32, #tpu.memory_space<vmem>>) attributes {dimension_semantics = [#tpu.dimension_semantics<parallel>], iteration_bounds = array<i64: 1>, scalar_prefetch = 0 : i64, scratch_operands = 1 : i64, tpu.core_type = #tpu.core_type<tc>, window_params = [{transform_indices = @transform_0, window_bounds = array<i64: 2, 24, 128>}, {pipeline_mode = #tpu.pipeline_mode<synchronous>, transform_indices = @transform_1, window_bounds = array<i64: 1, 128>}, {pipeline_mode = #tpu.pipeline_mode<synchronous>, transform_indices = @transform_2, window_bounds = array<i64: 1, 128>}, {pipeline_mode = #tpu.pipeline_mode<synchronous>, transform_indices = @transform_3, window_bounds = array<i64: 128, 384>}, {pipeline_mode = #tpu.pipeline_mode<synchronous>, transform_indices = @transform_4, window_bounds = array<i64: 1, 384>}, {pipeline_mode = #tpu.pipeline_mode<synchronous>, transform_indices = @transform_5, window_bounds = array<i64: 128, 128>}, {pipeline_mode = #tpu.pipeline_mode<synchronous>, transform_indices = @transform_6, window_bounds = array<i64: 1, 128>}, {pipeline_mode = #tpu.pipeline_mode<synchronous>, transform_indices = @transform_7, window_bounds = array<i64: 128, 256>}, {pipeline_mode = #tpu.pipeline_mode<synchronous>, transform_indices = @transform_8, window_bounds = array<i64: 1, 256>}, {pipeline_mode = #tpu.pipeline_mode<synchronous>, transform_indices = @transform_9, window_bounds = array<i64: 256, 128>}, {pipeline_mode = #tpu.pipeline_mode<synchronous>, transform_indices = @transform_10, window_bounds = array<i64: 1, 128>}, {pipeline_mode = #tpu.pipeline_mode<synchronous>, transform_indices = @transform_11, window_bounds = array<i64: 1, 24>}, {transform_indices = @transform_12, window_bounds = array<i64: 2, 24, 128>}]} {
    %c0 = arith.constant 0 : index
    %c0_0 = arith.constant 0 : index
    %c0_1 = arith.constant 0 : index
    %0 = vector.load %arg1[%c0, %c0_0, %c0_1] : memref<2x24x128xbf16, #tpu.memory_space<vmem>>, vector<2x24x128xbf16>
    %1 = arith.extf %0 : vector<2x24x128xbf16> to vector<2x24x128xf32>
    %2 = vector.shape_cast %1 : vector<2x24x128xf32> to vector<48x128xf32>
    %c0_2 = arith.constant 0 : index
    %c0_3 = arith.constant 0 : index
    %3 = vector.load %arg2[%c0_2, %c0_3] : memref<1x128xf32, #tpu.memory_space<vmem>>, vector<1x128xf32>
    %c0_4 = arith.constant 0 : index
    %c0_5 = arith.constant 0 : index
    %4 = vector.load %arg3[%c0_4, %c0_5] : memref<1x128xf32, #tpu.memory_space<vmem>>, vector<1x128xf32>
    %cst = arith.constant dense<0.000000e+00> : vector<48xf32>
    %5 = vector.multi_reduction <add>, %2, %cst [1] : vector<48x128xf32> to vector<48xf32>
    %6 = vector.shape_cast %5 : vector<48xf32> to vector<48x1xf32>
    %cst_6 = arith.constant 1.280000e+02 : f32
    %7 = vector.broadcast %cst_6 : f32 to vector<48x1xf32>
    %8 = arith.divf %6, %7 : vector<48x1xf32>
    %9 = vector.broadcast %8 : vector<48x1xf32> to vector<48x128xf32>
    %10 = arith.subf %2, %9 : vector<48x128xf32>
    %11 = arith.mulf %10, %10 : vector<48x128xf32>
    %cst_7 = arith.constant dense<0.000000e+00> : vector<48xf32>
    %12 = vector.multi_reduction <add>, %11, %cst_7 [1] : vector<48x128xf32> to vector<48xf32>
    %13 = vector.shape_cast %12 : vector<48xf32> to vector<48x1xf32>
    %cst_8 = arith.constant 1.280000e+02 : f32
    %14 = vector.broadcast %cst_8 : f32 to vector<48x1xf32>
    %15 = arith.divf %13, %14 : vector<48x1xf32>
    %16 = vector.broadcast %8 : vector<48x1xf32> to vector<48x128xf32>
    %17 = arith.subf %2, %16 : vector<48x128xf32>
    %cst_9 = arith.constant 9.99999974E-6 : f32
    %18 = vector.broadcast %cst_9 : f32 to vector<48x1xf32>
    %19 = arith.addf %15, %18 : vector<48x1xf32>
    %20 = math.rsqrt %19 : vector<48x1xf32>
    %21 = vector.broadcast %20 : vector<48x1xf32> to vector<48x128xf32>
    %22 = arith.mulf %17, %21 : vector<48x128xf32>
    %23 = vector.broadcast %3 : vector<1x128xf32> to vector<48x128xf32>
    %24 = arith.mulf %22, %23 : vector<48x128xf32>
    %25 = vector.broadcast %4 : vector<1x128xf32> to vector<48x128xf32>
    %26 = arith.addf %24, %25 : vector<48x128xf32>
    %27 = arith.truncf %26 : vector<48x128xf32> to vector<48x128xbf16>
    %c0_10 = arith.constant 0 : index
    %c0_11 = arith.constant 0 : index
    %28 = vector.load %arg4[%c0_10, %c0_11] : memref<128x384xbf16, #tpu.memory_space<vmem>>, vector<128x384xbf16>
    %cst_12 = arith.constant dense<0.000000e+00> : vector<48x384xf32>
    %29 = tpu.matmul %27, %28, %cst_12 {dimension_numbers = #tpu.dot_dimension_numbers<[1], [0], [0], [1], [0, 0, 1, 1], [], []>} : vector<48x128xbf16>, vector<128x384xbf16>, vector<48x384xf32> -> vector<48x384xf32>
    %c0_13 = arith.constant 0 : index
    %c0_14 = arith.constant 0 : index
    %30 = vector.load %arg5[%c0_13, %c0_14] : memref<1x384xf32, #tpu.memory_space<vmem>>, vector<1x384xf32>
    %31 = vector.broadcast %30 : vector<1x384xf32> to vector<48x384xf32>
    %32 = arith.addf %29, %31 : vector<48x384xf32>
    %33 = vector.extract_strided_slice %32 {offsets = [0, 0], sizes = [48, 128], strides = [1, 1]} : vector<48x384xf32> to vector<48x128xf32>
    %cst_15 = arith.constant 0.176776692 : f32
    %34 = vector.broadcast %cst_15 : f32 to vector<48x128xf32>
    %35 = arith.mulf %33, %34 : vector<48x128xf32>
    %36 = vector.extract_strided_slice %32 {offsets = [0, 128], sizes = [48, 128], strides = [1, 1]} : vector<48x384xf32> to vector<48x128xf32>
    %37 = vector.extract_strided_slice %32 {offsets = [0, 256], sizes = [48, 128], strides = [1, 1]} : vector<48x384xf32> to vector<48x128xf32>
    %c0_16 = arith.constant 0 : index
    %c0_17 = arith.constant 0 : index
    %38 = vector.load %arg12[%c0_16, %c0_17] : memref<1x24xf32, #tpu.memory_space<vmem>>, vector<1x24xf32>
    %39 = vector.extract_strided_slice %35 {offsets = [0, 0], sizes = [24, 32], strides = [1, 1]} : vector<48x128xf32> to vector<24x32xf32>
    %40 = vector.extract_strided_slice %36 {offsets = [0, 0], sizes = [24, 32], strides = [1, 1]} : vector<48x128xf32> to vector<24x32xf32>
    %41 = vector.extract_strided_slice %37 {offsets = [0, 0], sizes = [24, 32], strides = [1, 1]} : vector<48x128xf32> to vector<24x32xf32>
    %42 = arith.truncf %39 : vector<24x32xf32> to vector<24x32xbf16>
    %43 = arith.truncf %40 : vector<24x32xf32> to vector<24x32xbf16>
    %cst_18 = arith.constant dense<0.000000e+00> : vector<24x24xf32>
    %44 = tpu.matmul %42, %43, %cst_18 {dimension_numbers = #tpu.dot_dimension_numbers<[1], [1], [0], [0], [0, 0, 1, 0], [], []>} : vector<24x32xbf16>, vector<24x32xbf16>, vector<24x24xf32> -> vector<24x24xf32>
    %45 = vector.broadcast %38 : vector<1x24xf32> to vector<24x24xf32>
    %46 = arith.addf %44, %45 : vector<24x24xf32>
    %cst_19 = arith.constant dense<0xFF800000> : vector<24xf32>
    %47 = vector.multi_reduction <maximumf>, %46, %cst_19 [1] : vector<24x24xf32> to vector<24xf32>
    %48 = vector.shape_cast %47 : vector<24xf32> to vector<24x1xf32>
    %49 = vector.broadcast %48 : vector<24x1xf32> to vector<24x24xf32>
    %50 = arith.subf %46, %49 : vector<24x24xf32>
    %51 = math.exp %50 : vector<24x24xf32>
    %cst_20 = arith.constant dense<0.000000e+00> : vector<24xf32>
    %52 = vector.multi_reduction <add>, %51, %cst_20 [1] : vector<24x24xf32> to vector<24xf32>
    %53 = vector.shape_cast %52 : vector<24xf32> to vector<24x1xf32>
    %54 = tpu.reciprocal %53 {approx = true} : vector<24x1xf32> -> vector<24x1xf32>
    %55 = vector.broadcast %54 : vector<24x1xf32> to vector<24x24xf32>
    %56 = arith.mulf %51, %55 : vector<24x24xf32>
    %57 = arith.truncf %56 : vector<24x24xf32> to vector<24x24xbf16>
    %58 = arith.truncf %41 : vector<24x32xf32> to vector<24x32xbf16>
    %cst_21 = arith.constant dense<0.000000e+00> : vector<24x32xf32>
    %59 = tpu.matmul %57, %58, %cst_21 {dimension_numbers = #tpu.dot_dimension_numbers<[1], [0], [0], [1], [0, 0, 1, 1], [], []>} : vector<24x24xbf16>, vector<24x32xbf16>, vector<24x32xf32> -> vector<24x32xf32>
    %c0_22 = arith.constant 0 : index
    %c0_23 = arith.constant 0 : index
    %60 = vector.load %arg14[%c0_22, %c0_23] : memref<48x128xf32, #tpu.memory_space<vmem>>, vector<24x32xf32>
    tpu.vector_store %arg14[%c0_22, %c0_23], %59 {strides = array<i32>} : memref<48x128xf32, #tpu.memory_space<vmem>>, vector<24x32xf32>,
    %61 = vector.extract_strided_slice %35 {offsets = [0, 32], sizes = [24, 32], strides = [1, 1]} : vector<48x128xf32> to vector<24x32xf32>
    %62 = vector.extract_strided_slice %36 {offsets = [0, 32], sizes = [24, 32], strides = [1, 1]} : vector<48x128xf32> to vector<24x32xf32>
    %63 = vector.extract_strided_slice %37 {offsets = [0, 32], sizes = [24, 32], strides = [1, 1]} : vector<48x128xf32> to vector<24x32xf32>
    %64 = arith.truncf %61 : vector<24x32xf32> to vector<24x32xbf16>
    %65 = arith.truncf %62 : vector<24x32xf32> to vector<24x32xbf16>
    %cst_24 = arith.constant dense<0.000000e+00> : vector<24x24xf32>
    %66 = tpu.matmul %64, %65, %cst_24 {dimension_numbers = #tpu.dot_dimension_numbers<[1], [1], [0], [0], [0, 0, 1, 0], [], []>} : vector<24x32xbf16>, vector<24x32xbf16>, vector<24x24xf32> -> vector<24x24xf32>
    %67 = vector.broadcast %38 : vector<1x24xf32> to vector<24x24xf32>
    %68 = arith.addf %66, %67 : vector<24x24xf32>
    %cst_25 = arith.constant dense<0xFF800000> : vector<24xf32>
    %69 = vector.multi_reduction <maximumf>, %68, %cst_25 [1] : vector<24x24xf32> to vector<24xf32>
    %70 = vector.shape_cast %69 : vector<24xf32> to vector<24x1xf32>
    %71 = vector.broadcast %70 : vector<24x1xf32> to vector<24x24xf32>
    %72 = arith.subf %68, %71 : vector<24x24xf32>
    %73 = math.exp %72 : vector<24x24xf32>
    %cst_26 = arith.constant dense<0.000000e+00> : vector<24xf32>
    %74 = vector.multi_reduction <add>, %73, %cst_26 [1] : vector<24x24xf32> to vector<24xf32>
    %75 = vector.shape_cast %74 : vector<24xf32> to vector<24x1xf32>
    %76 = tpu.reciprocal %75 {approx = true} : vector<24x1xf32> -> vector<24x1xf32>
    %77 = vector.broadcast %76 : vector<24x1xf32> to vector<24x24xf32>
    %78 = arith.mulf %73, %77 : vector<24x24xf32>
    %79 = arith.truncf %78 : vector<24x24xf32> to vector<24x24xbf16>
    %80 = arith.truncf %63 : vector<24x32xf32> to vector<24x32xbf16>
    %cst_27 = arith.constant dense<0.000000e+00> : vector<24x32xf32>
    %81 = tpu.matmul %79, %80, %cst_27 {dimension_numbers = #tpu.dot_dimension_numbers<[1], [0], [0], [1], [0, 0, 1, 1], [], []>} : vector<24x24xbf16>, vector<24x32xbf16>, vector<24x32xf32> -> vector<24x32xf32>
    %c0_28 = arith.constant 0 : index
    %c32 = arith.constant 32 : index
    %82 = vector.load %arg14[%c0_28, %c32] : memref<48x128xf32, #tpu.memory_space<vmem>>, vector<24x32xf32>
    tpu.vector_store %arg14[%c0_28, %c32], %81 {strides = array<i32>} : memref<48x128xf32, #tpu.memory_space<vmem>>, vector<24x32xf32>,
    %83 = vector.extract_strided_slice %35 {offsets = [0, 64], sizes = [24, 32], strides = [1, 1]} : vector<48x128xf32> to vector<24x32xf32>
    %84 = vector.extract_strided_slice %36 {offsets = [0, 64], sizes = [24, 32], strides = [1, 1]} : vector<48x128xf32> to vector<24x32xf32>
    %85 = vector.extract_strided_slice %37 {offsets = [0, 64], sizes = [24, 32], strides = [1, 1]} : vector<48x128xf32> to vector<24x32xf32>
    %86 = arith.truncf %83 : vector<24x32xf32> to vector<24x32xbf16>
    %87 = arith.truncf %84 : vector<24x32xf32> to vector<24x32xbf16>
    %cst_29 = arith.constant dense<0.000000e+00> : vector<24x24xf32>
    %88 = tpu.matmul %86, %87, %cst_29 {dimension_numbers = #tpu.dot_dimension_numbers<[1], [1], [0], [0], [0, 0, 1, 0], [], []>} : vector<24x32xbf16>, vector<24x32xbf16>, vector<24x24xf32> -> vector<24x24xf32>
    %89 = vector.broadcast %38 : vector<1x24xf32> to vector<24x24xf32>
    %90 = arith.addf %88, %89 : vector<24x24xf32>
    %cst_30 = arith.constant dense<0xFF800000> : vector<24xf32>
    %91 = vector.multi_reduction <maximumf>, %90, %cst_30 [1] : vector<24x24xf32> to vector<24xf32>
    %92 = vector.shape_cast %91 : vector<24xf32> to vector<24x1xf32>
    %93 = vector.broadcast %92 : vector<24x1xf32> to vector<24x24xf32>
    %94 = arith.subf %90, %93 : vector<24x24xf32>
    %95 = math.exp %94 : vector<24x24xf32>
    %cst_31 = arith.constant dense<0.000000e+00> : vector<24xf32>
    %96 = vector.multi_reduction <add>, %95, %cst_31 [1] : vector<24x24xf32> to vector<24xf32>
    %97 = vector.shape_cast %96 : vector<24xf32> to vector<24x1xf32>
    %98 = tpu.reciprocal %97 {approx = true} : vector<24x1xf32> -> vector<24x1xf32>
    %99 = vector.broadcast %98 : vector<24x1xf32> to vector<24x24xf32>
    %100 = arith.mulf %95, %99 : vector<24x24xf32>
    %101 = arith.truncf %100 : vector<24x24xf32> to vector<24x24xbf16>
    %102 = arith.truncf %85 : vector<24x32xf32> to vector<24x32xbf16>
    %cst_32 = arith.constant dense<0.000000e+00> : vector<24x32xf32>
    %103 = tpu.matmul %101, %102, %cst_32 {dimension_numbers = #tpu.dot_dimension_numbers<[1], [0], [0], [1], [0, 0, 1, 1], [], []>} : vector<24x24xbf16>, vector<24x32xbf16>, vector<24x32xf32> -> vector<24x32xf32>
    %c0_33 = arith.constant 0 : index
    %c64 = arith.constant 64 : index
    %104 = vector.load %arg14[%c0_33, %c64] : memref<48x128xf32, #tpu.memory_space<vmem>>, vector<24x32xf32>
    tpu.vector_store %arg14[%c0_33, %c64], %103 {strides = array<i32>} : memref<48x128xf32, #tpu.memory_space<vmem>>, vector<24x32xf32>,
    %105 = vector.extract_strided_slice %35 {offsets = [0, 96], sizes = [24, 32], strides = [1, 1]} : vector<48x128xf32> to vector<24x32xf32>
    %106 = vector.extract_strided_slice %36 {offsets = [0, 96], sizes = [24, 32], strides = [1, 1]} : vector<48x128xf32> to vector<24x32xf32>
    %107 = vector.extract_strided_slice %37 {offsets = [0, 96], sizes = [24, 32], strides = [1, 1]} : vector<48x128xf32> to vector<24x32xf32>
    %108 = arith.truncf %105 : vector<24x32xf32> to vector<24x32xbf16>
    %109 = arith.truncf %106 : vector<24x32xf32> to vector<24x32xbf16>
    %cst_34 = arith.constant dense<0.000000e+00> : vector<24x24xf32>
    %110 = tpu.matmul %108, %109, %cst_34 {dimension_numbers = #tpu.dot_dimension_numbers<[1], [1], [0], [0], [0, 0, 1, 0], [], []>} : vector<24x32xbf16>, vector<24x32xbf16>, vector<24x24xf32> -> vector<24x24xf32>
    %111 = vector.broadcast %38 : vector<1x24xf32> to vector<24x24xf32>
    %112 = arith.addf %110, %111 : vector<24x24xf32>
    %cst_35 = arith.constant dense<0xFF800000> : vector<24xf32>
    %113 = vector.multi_reduction <maximumf>, %112, %cst_35 [1] : vector<24x24xf32> to vector<24xf32>
    %114 = vector.shape_cast %113 : vector<24xf32> to vector<24x1xf32>
    %115 = vector.broadcast %114 : vector<24x1xf32> to vector<24x24xf32>
    %116 = arith.subf %112, %115 : vector<24x24xf32>
    %117 = math.exp %116 : vector<24x24xf32>
    %cst_36 = arith.constant dense<0.000000e+00> : vector<24xf32>
    %118 = vector.multi_reduction <add>, %117, %cst_36 [1] : vector<24x24xf32> to vector<24xf32>
    %119 = vector.shape_cast %118 : vector<24xf32> to vector<24x1xf32>
    %120 = tpu.reciprocal %119 {approx = true} : vector<24x1xf32> -> vector<24x1xf32>
    %121 = vector.broadcast %120 : vector<24x1xf32> to vector<24x24xf32>
    %122 = arith.mulf %117, %121 : vector<24x24xf32>
    %123 = arith.truncf %122 : vector<24x24xf32> to vector<24x24xbf16>
    %124 = arith.truncf %107 : vector<24x32xf32> to vector<24x32xbf16>
    %cst_37 = arith.constant dense<0.000000e+00> : vector<24x32xf32>
    %125 = tpu.matmul %123, %124, %cst_37 {dimension_numbers = #tpu.dot_dimension_numbers<[1], [0], [0], [1], [0, 0, 1, 1], [], []>} : vector<24x24xbf16>, vector<24x32xbf16>, vector<24x32xf32> -> vector<24x32xf32>
    %c0_38 = arith.constant 0 : index
    %c96 = arith.constant 96 : index
    %126 = vector.load %arg14[%c0_38, %c96] : memref<48x128xf32, #tpu.memory_space<vmem>>, vector<24x32xf32>
    tpu.vector_store %arg14[%c0_38, %c96], %125 {strides = array<i32>} : memref<48x128xf32, #tpu.memory_space<vmem>>, vector<24x32xf32>,
    %127 = vector.extract_strided_slice %35 {offsets = [24, 0], sizes = [24, 32], strides = [1, 1]} : vector<48x128xf32> to vector<24x32xf32>
    %128 = vector.extract_strided_slice %36 {offsets = [24, 0], sizes = [24, 32], strides = [1, 1]} : vector<48x128xf32> to vector<24x32xf32>
    %129 = vector.extract_strided_slice %37 {offsets = [24, 0], sizes = [24, 32], strides = [1, 1]} : vector<48x128xf32> to vector<24x32xf32>
    %130 = arith.truncf %127 : vector<24x32xf32> to vector<24x32xbf16>
    %131 = arith.truncf %128 : vector<24x32xf32> to vector<24x32xbf16>
    %cst_39 = arith.constant dense<0.000000e+00> : vector<24x24xf32>
    %132 = tpu.matmul %130, %131, %cst_39 {dimension_numbers = #tpu.dot_dimension_numbers<[1], [1], [0], [0], [0, 0, 1, 0], [], []>} : vector<24x32xbf16>, vector<24x32xbf16>, vector<24x24xf32> -> vector<24x24xf32>
    %133 = vector.broadcast %38 : vector<1x24xf32> to vector<24x24xf32>
    %134 = arith.addf %132, %133 : vector<24x24xf32>
    %cst_40 = arith.constant dense<0xFF800000> : vector<24xf32>
    %135 = vector.multi_reduction <maximumf>, %134, %cst_40 [1] : vector<24x24xf32> to vector<24xf32>
    %136 = vector.shape_cast %135 : vector<24xf32> to vector<24x1xf32>
    %137 = vector.broadcast %136 : vector<24x1xf32> to vector<24x24xf32>
    %138 = arith.subf %134, %137 : vector<24x24xf32>
    %139 = math.exp %138 : vector<24x24xf32>
    %cst_41 = arith.constant dense<0.000000e+00> : vector<24xf32>
    %140 = vector.multi_reduction <add>, %139, %cst_41 [1] : vector<24x24xf32> to vector<24xf32>
    %141 = vector.shape_cast %140 : vector<24xf32> to vector<24x1xf32>
    %142 = tpu.reciprocal %141 {approx = true} : vector<24x1xf32> -> vector<24x1xf32>
    %143 = vector.broadcast %142 : vector<24x1xf32> to vector<24x24xf32>
    %144 = arith.mulf %139, %143 : vector<24x24xf32>
    %145 = arith.truncf %144 : vector<24x24xf32> to vector<24x24xbf16>
    %146 = arith.truncf %129 : vector<24x32xf32> to vector<24x32xbf16>
    %cst_42 = arith.constant dense<0.000000e+00> : vector<24x32xf32>
    %147 = tpu.matmul %145, %146, %cst_42 {dimension_numbers = #tpu.dot_dimension_numbers<[1], [0], [0], [1], [0, 0, 1, 1], [], []>} : vector<24x24xbf16>, vector<24x32xbf16>, vector<24x32xf32> -> vector<24x32xf32>
    %c24 = arith.constant 24 : index
    %c0_43 = arith.constant 0 : index
    %148 = vector.load %arg14[%c24, %c0_43] : memref<48x128xf32, #tpu.memory_space<vmem>>, vector<24x32xf32>
    tpu.vector_store %arg14[%c24, %c0_43], %147 {strides = array<i32>} : memref<48x128xf32, #tpu.memory_space<vmem>>, vector<24x32xf32>,
    %149 = vector.extract_strided_slice %35 {offsets = [24, 32], sizes = [24, 32], strides = [1, 1]} : vector<48x128xf32> to vector<24x32xf32>
    %150 = vector.extract_strided_slice %36 {offsets = [24, 32], sizes = [24, 32], strides = [1, 1]} : vector<48x128xf32> to vector<24x32xf32>
    %151 = vector.extract_strided_slice %37 {offsets = [24, 32], sizes = [24, 32], strides = [1, 1]} : vector<48x128xf32> to vector<24x32xf32>
    %152 = arith.truncf %149 : vector<24x32xf32> to vector<24x32xbf16>
    %153 = arith.truncf %150 : vector<24x32xf32> to vector<24x32xbf16>
    %cst_44 = arith.constant dense<0.000000e+00> : vector<24x24xf32>
    %154 = tpu.matmul %152, %153, %cst_44 {dimension_numbers = #tpu.dot_dimension_numbers<[1], [1], [0], [0], [0, 0, 1, 0], [], []>} : vector<24x32xbf16>, vector<24x32xbf16>, vector<24x24xf32> -> vector<24x24xf32>
    %155 = vector.broadcast %38 : vector<1x24xf32> to vector<24x24xf32>
    %156 = arith.addf %154, %155 : vector<24x24xf32>
    %cst_45 = arith.constant dense<0xFF800000> : vector<24xf32>
    %157 = vector.multi_reduction <maximumf>, %156, %cst_45 [1] : vector<24x24xf32> to vector<24xf32>
    %158 = vector.shape_cast %157 : vector<24xf32> to vector<24x1xf32>
    %159 = vector.broadcast %158 : vector<24x1xf32> to vector<24x24xf32>
    %160 = arith.subf %156, %159 : vector<24x24xf32>
    %161 = math.exp %160 : vector<24x24xf32>
    %cst_46 = arith.constant dense<0.000000e+00> : vector<24xf32>
    %162 = vector.multi_reduction <add>, %161, %cst_46 [1] : vector<24x24xf32> to vector<24xf32>
    %163 = vector.shape_cast %162 : vector<24xf32> to vector<24x1xf32>
    %164 = tpu.reciprocal %163 {approx = true} : vector<24x1xf32> -> vector<24x1xf32>
    %165 = vector.broadcast %164 : vector<24x1xf32> to vector<24x24xf32>
    %166 = arith.mulf %161, %165 : vector<24x24xf32>
    %167 = arith.truncf %166 : vector<24x24xf32> to vector<24x24xbf16>
    %168 = arith.truncf %151 : vector<24x32xf32> to vector<24x32xbf16>
    %cst_47 = arith.constant dense<0.000000e+00> : vector<24x32xf32>
    %169 = tpu.matmul %167, %168, %cst_47 {dimension_numbers = #tpu.dot_dimension_numbers<[1], [0], [0], [1], [0, 0, 1, 1], [], []>} : vector<24x24xbf16>, vector<24x32xbf16>, vector<24x32xf32> -> vector<24x32xf32>
    %c24_48 = arith.constant 24 : index
    %c32_49 = arith.constant 32 : index
    %170 = vector.load %arg14[%c24_48, %c32_49] : memref<48x128xf32, #tpu.memory_space<vmem>>, vector<24x32xf32>
    tpu.vector_store %arg14[%c24_48, %c32_49], %169 {strides = array<i32>} : memref<48x128xf32, #tpu.memory_space<vmem>>, vector<24x32xf32>,
    %171 = vector.extract_strided_slice %35 {offsets = [24, 64], sizes = [24, 32], strides = [1, 1]} : vector<48x128xf32> to vector<24x32xf32>
    %172 = vector.extract_strided_slice %36 {offsets = [24, 64], sizes = [24, 32], strides = [1, 1]} : vector<48x128xf32> to vector<24x32xf32>
    %173 = vector.extract_strided_slice %37 {offsets = [24, 64], sizes = [24, 32], strides = [1, 1]} : vector<48x128xf32> to vector<24x32xf32>
    %174 = arith.truncf %171 : vector<24x32xf32> to vector<24x32xbf16>
    %175 = arith.truncf %172 : vector<24x32xf32> to vector<24x32xbf16>
    %cst_50 = arith.constant dense<0.000000e+00> : vector<24x24xf32>
    %176 = tpu.matmul %174, %175, %cst_50 {dimension_numbers = #tpu.dot_dimension_numbers<[1], [1], [0], [0], [0, 0, 1, 0], [], []>} : vector<24x32xbf16>, vector<24x32xbf16>, vector<24x24xf32> -> vector<24x24xf32>
    %177 = vector.broadcast %38 : vector<1x24xf32> to vector<24x24xf32>
    %178 = arith.addf %176, %177 : vector<24x24xf32>
    %cst_51 = arith.constant dense<0xFF800000> : vector<24xf32>
    %179 = vector.multi_reduction <maximumf>, %178, %cst_51 [1] : vector<24x24xf32> to vector<24xf32>
    %180 = vector.shape_cast %179 : vector<24xf32> to vector<24x1xf32>
    %181 = vector.broadcast %180 : vector<24x1xf32> to vector<24x24xf32>
    %182 = arith.subf %178, %181 : vector<24x24xf32>
    %183 = math.exp %182 : vector<24x24xf32>
    %cst_52 = arith.constant dense<0.000000e+00> : vector<24xf32>
    %184 = vector.multi_reduction <add>, %183, %cst_52 [1] : vector<24x24xf32> to vector<24xf32>
    %185 = vector.shape_cast %184 : vector<24xf32> to vector<24x1xf32>
    %186 = tpu.reciprocal %185 {approx = true} : vector<24x1xf32> -> vector<24x1xf32>
    %187 = vector.broadcast %186 : vector<24x1xf32> to vector<24x24xf32>
    %188 = arith.mulf %183, %187 : vector<24x24xf32>
    %189 = arith.truncf %188 : vector<24x24xf32> to vector<24x24xbf16>
    %190 = arith.truncf %173 : vector<24x32xf32> to vector<24x32xbf16>
    %cst_53 = arith.constant dense<0.000000e+00> : vector<24x32xf32>
    %191 = tpu.matmul %189, %190, %cst_53 {dimension_numbers = #tpu.dot_dimension_numbers<[1], [0], [0], [1], [0, 0, 1, 1], [], []>} : vector<24x24xbf16>, vector<24x32xbf16>, vector<24x32xf32> -> vector<24x32xf32>
    %c24_54 = arith.constant 24 : index
    %c64_55 = arith.constant 64 : index
    %192 = vector.load %arg14[%c24_54, %c64_55] : memref<48x128xf32, #tpu.memory_space<vmem>>, vector<24x32xf32>
    tpu.vector_store %arg14[%c24_54, %c64_55], %191 {strides = array<i32>} : memref<48x128xf32, #tpu.memory_space<vmem>>, vector<24x32xf32>,
    %193 = vector.extract_strided_slice %35 {offsets = [24, 96], sizes = [24, 32], strides = [1, 1]} : vector<48x128xf32> to vector<24x32xf32>
    %194 = vector.extract_strided_slice %36 {offsets = [24, 96], sizes = [24, 32], strides = [1, 1]} : vector<48x128xf32> to vector<24x32xf32>
    %195 = vector.extract_strided_slice %37 {offsets = [24, 96], sizes = [24, 32], strides = [1, 1]} : vector<48x128xf32> to vector<24x32xf32>
    %196 = arith.truncf %193 : vector<24x32xf32> to vector<24x32xbf16>
    %197 = arith.truncf %194 : vector<24x32xf32> to vector<24x32xbf16>
    %cst_56 = arith.constant dense<0.000000e+00> : vector<24x24xf32>
    %198 = tpu.matmul %196, %197, %cst_56 {dimension_numbers = #tpu.dot_dimension_numbers<[1], [1], [0], [0], [0, 0, 1, 0], [], []>} : vector<24x32xbf16>, vector<24x32xbf16>, vector<24x24xf32> -> vector<24x24xf32>
    %199 = vector.broadcast %38 : vector<1x24xf32> to vector<24x24xf32>
    %200 = arith.addf %198, %199 : vector<24x24xf32>
    %cst_57 = arith.constant dense<0xFF800000> : vector<24xf32>
    %201 = vector.multi_reduction <maximumf>, %200, %cst_57 [1] : vector<24x24xf32> to vector<24xf32>
    %202 = vector.shape_cast %201 : vector<24xf32> to vector<24x1xf32>
    %203 = vector.broadcast %202 : vector<24x1xf32> to vector<24x24xf32>
    %204 = arith.subf %200, %203 : vector<24x24xf32>
    %205 = math.exp %204 : vector<24x24xf32>
    %cst_58 = arith.constant dense<0.000000e+00> : vector<24xf32>
    %206 = vector.multi_reduction <add>, %205, %cst_58 [1] : vector<24x24xf32> to vector<24xf32>
    %207 = vector.shape_cast %206 : vector<24xf32> to vector<24x1xf32>
    %208 = tpu.reciprocal %207 {approx = true} : vector<24x1xf32> -> vector<24x1xf32>
    %209 = vector.broadcast %208 : vector<24x1xf32> to vector<24x24xf32>
    %210 = arith.mulf %205, %209 : vector<24x24xf32>
    %211 = arith.truncf %210 : vector<24x24xf32> to vector<24x24xbf16>
    %212 = arith.truncf %195 : vector<24x32xf32> to vector<24x32xbf16>
    %cst_59 = arith.constant dense<0.000000e+00> : vector<24x32xf32>
    %213 = tpu.matmul %211, %212, %cst_59 {dimension_numbers = #tpu.dot_dimension_numbers<[1], [0], [0], [1], [0, 0, 1, 1], [], []>} : vector<24x24xbf16>, vector<24x32xbf16>, vector<24x32xf32> -> vector<24x32xf32>
    %c24_60 = arith.constant 24 : index
    %c96_61 = arith.constant 96 : index
    %214 = vector.load %arg14[%c24_60, %c96_61] : memref<48x128xf32, #tpu.memory_space<vmem>>, vector<24x32xf32>
    tpu.vector_store %arg14[%c24_60, %c96_61], %213 {strides = array<i32>} : memref<48x128xf32, #tpu.memory_space<vmem>>, vector<24x32xf32>,
    %c0_62 = arith.constant 0 : index
    %c0_63 = arith.constant 0 : index
    %215 = vector.load %arg14[%c0_62, %c0_63] : memref<48x128xf32, #tpu.memory_space<vmem>>, vector<48x128xf32>
    %216 = arith.truncf %215 : vector<48x128xf32> to vector<48x128xbf16>
    %c0_64 = arith.constant 0 : index
    %c0_65 = arith.constant 0 : index
    %217 = vector.load %arg6[%c0_64, %c0_65] : memref<128x128xbf16, #tpu.memory_space<vmem>>, vector<128x128xbf16>
    %cst_66 = arith.constant dense<0.000000e+00> : vector<48x128xf32>
    %218 = tpu.matmul %216, %217, %cst_66 {dimension_numbers = #tpu.dot_dimension_numbers<[1], [0], [0], [1], [0, 0, 1, 1], [], []>} : vector<48x128xbf16>, vector<128x128xbf16>, vector<48x128xf32> -> vector<48x128xf32>
    %c0_67 = arith.constant 0 : index
    %c0_68 = arith.constant 0 : index
    %219 = vector.load %arg7[%c0_67, %c0_68] : memref<1x128xf32, #tpu.memory_space<vmem>>, vector<1x128xf32>
    %220 = vector.broadcast %219 : vector<1x128xf32> to vector<48x128xf32>
    %221 = arith.addf %218, %220 : vector<48x128xf32>
    %222 = arith.addf %2, %221 : vector<48x128xf32>
    %223 = arith.truncf %222 : vector<48x128xf32> to vector<48x128xbf16>
    %c0_69 = arith.constant 0 : index
    %c0_70 = arith.constant 0 : index
    %224 = vector.load %arg8[%c0_69, %c0_70] : memref<128x256xbf16, #tpu.memory_space<vmem>>, vector<128x256xbf16>
    %cst_71 = arith.constant dense<0.000000e+00> : vector<48x256xf32>
    %225 = tpu.matmul %223, %224, %cst_71 {dimension_numbers = #tpu.dot_dimension_numbers<[1], [0], [0], [1], [0, 0, 1, 1], [], []>} : vector<48x128xbf16>, vector<128x256xbf16>, vector<48x256xf32> -> vector<48x256xf32>
    %c0_72 = arith.constant 0 : index
    %c0_73 = arith.constant 0 : index
    %226 = vector.load %arg9[%c0_72, %c0_73] : memref<1x256xf32, #tpu.memory_space<vmem>>, vector<1x256xf32>
    %227 = vector.broadcast %226 : vector<1x256xf32> to vector<48x256xf32>
    %228 = arith.addf %225, %227 : vector<48x256xf32>
    %cst_74 = arith.constant 5.000000e-01 : f32
    %229 = vector.broadcast %cst_74 : f32 to vector<48x256xf32>
    %230 = arith.mulf %229, %228 : vector<48x256xf32>
    %cst_75 = arith.constant 0.707106769 : f32
    %231 = vector.broadcast %cst_75 : f32 to vector<48x256xf32>
    %232 = arith.mulf %228, %231 : vector<48x256xf32>
    %233 = math.erf %232 : vector<48x256xf32>
    %cst_76 = arith.constant 1.000000e+00 : f32
    %234 = vector.broadcast %cst_76 : f32 to vector<48x256xf32>
    %235 = arith.addf %234, %233 : vector<48x256xf32>
    %236 = arith.mulf %230, %235 : vector<48x256xf32>
    %237 = arith.truncf %236 : vector<48x256xf32> to vector<48x256xbf16>
    %c0_77 = arith.constant 0 : index
    %c0_78 = arith.constant 0 : index
    %238 = vector.load %arg10[%c0_77, %c0_78] : memref<256x128xbf16, #tpu.memory_space<vmem>>, vector<256x128xbf16>
    %cst_79 = arith.constant dense<0.000000e+00> : vector<48x128xf32>
    %239 = tpu.matmul %237, %238, %cst_79 {dimension_numbers = #tpu.dot_dimension_numbers<[1], [0], [0], [1], [0, 0, 1, 1], [], []>} : vector<48x256xbf16>, vector<256x128xbf16>, vector<48x128xf32> -> vector<48x128xf32>
    %c0_80 = arith.constant 0 : index
    %c0_81 = arith.constant 0 : index
    %240 = vector.load %arg11[%c0_80, %c0_81] : memref<1x128xf32, #tpu.memory_space<vmem>>, vector<1x128xf32>
    %241 = vector.broadcast %240 : vector<1x128xf32> to vector<48x128xf32>
    %242 = arith.addf %239, %241 : vector<48x128xf32>
    %243 = arith.addf %222, %242 : vector<48x128xf32>
    %244 = vector.shape_cast %243 : vector<48x128xf32> to vector<2x24x128xf32>
    %245 = arith.truncf %244 : vector<2x24x128xf32> to vector<2x24x128xbf16>
    %c0_82 = arith.constant 0 : index
    %c0_83 = arith.constant 0 : index
    %c0_84 = arith.constant 0 : index
    %246 = vector.load %arg13[%c0_82, %c0_83, %c0_84] : memref<2x24x128xbf16, #tpu.memory_space<vmem>>, vector<2x24x128xbf16>
    tpu.vector_store %arg13[%c0_82, %c0_83, %c0_84], %245 {strides = array<i32>} : memref<2x24x128xbf16, #tpu.memory_space<vmem>>, vector<2x24x128xbf16>,
    return
  }
  func.func @transform_0(%arg0: i32) -> (i32, i32, i32) {
    %c0_i32 = arith.constant 0 : i32
    %c0_i32_0 = arith.constant 0 : i32
    %c0_i32_1 = arith.constant 0 : i32
    return %arg0, %c0_i32, %c0_i32_0 : i32, i32, i32
  }
  func.func @transform_1(%arg0: i32) -> (i32, i32) {
    %c0_i32 = arith.constant 0 : i32
    %c0_i32_0 = arith.constant 0 : i32
    %c0_i32_1 = arith.constant 0 : i32
    return %c0_i32, %c0_i32_0 : i32, i32
  }
  func.func @transform_2(%arg0: i32) -> (i32, i32) {
    %c0_i32 = arith.constant 0 : i32
    %c0_i32_0 = arith.constant 0 : i32
    %c0_i32_1 = arith.constant 0 : i32
    return %c0_i32, %c0_i32_0 : i32, i32
  }
  func.func @transform_3(%arg0: i32) -> (i32, i32) {
    %c0_i32 = arith.constant 0 : i32
    %c0_i32_0 = arith.constant 0 : i32
    %c0_i32_1 = arith.constant 0 : i32
    return %c0_i32, %c0_i32_0 : i32, i32
  }
  func.func @transform_4(%arg0: i32) -> (i32, i32) {
    %c0_i32 = arith.constant 0 : i32
    %c0_i32_0 = arith.constant 0 : i32
    %c0_i32_1 = arith.constant 0 : i32
    return %c0_i32, %c0_i32_0 : i32, i32
  }
  func.func @transform_5(%arg0: i32) -> (i32, i32) {
    %c0_i32 = arith.constant 0 : i32
    %c0_i32_0 = arith.constant 0 : i32
    %c0_i32_1 = arith.constant 0 : i32
    return %c0_i32, %c0_i32_0 : i32, i32
  }
  func.func @transform_6(%arg0: i32) -> (i32, i32) {
    %c0_i32 = arith.constant 0 : i32
    %c0_i32_0 = arith.constant 0 : i32
    %c0_i32_1 = arith.constant 0 : i32
    return %c0_i32, %c0_i32_0 : i32, i32
  }
  func.func @transform_7(%arg0: i32) -> (i32, i32) {
    %c0_i32 = arith.constant 0 : i32
    %c0_i32_0 = arith.constant 0 : i32
    %c0_i32_1 = arith.constant 0 : i32
    return %c0_i32, %c0_i32_0 : i32, i32
  }
  func.func @transform_8(%arg0: i32) -> (i32, i32) {
    %c0_i32 = arith.constant 0 : i32
    %c0_i32_0 = arith.constant 0 : i32
    %c0_i32_1 = arith.constant 0 : i32
    return %c0_i32, %c0_i32_0 : i32, i32
  }
  func.func @transform_9(%arg0: i32) -> (i32, i32) {
    %c0_i32 = arith.constant 0 : i32
    %c0_i32_0 = arith.constant 0 : i32
    %c0_i32_1 = arith.constant 0 : i32
    return %c0_i32, %c0_i32_0 : i32, i32
  }
  func.func @transform_10(%arg0: i32) -> (i32, i32) {
    %c0_i32 = arith.constant 0 : i32
    %c0_i32_0 = arith.constant 0 : i32
    %c0_i32_1 = arith.constant 0 : i32
    return %c0_i32, %c0_i32_0 : i32, i32
  }
  func.func @transform_11(%arg0: i32) -> (i32, i32) {
    %c0_i32 = arith.constant 0 : i32
    %c0_i32_0 = arith.constant 0 : i32
    %c0_i32_1 = arith.constant 0 : i32
    return %c0_i32, %c0_i32_0 : i32, i32
  }
  func.func @transform_12(%arg0: i32) -> (i32, i32, i32) {
    %c0_i32 = arith.constant 0 : i32
    %c0_i32_0 = arith.constant 0 : i32
    %c0_i32_1 = arith.constant 0 : i32
    return %arg0, %c0_i32, %c0_i32_0 : i32, i32, i32
  }
}

</mosaic_0001>

<bundles_post_ra>
// kernel: vit_forward.4
= control target key start
LH: loop header
LB: loop body
LE: loop exit
PB: predicated region body
PF: predicated region fallthrough
CT: control target
= control target key end

     0   :  { %v218_v0 = vmov 0.0   ;;  %vm219_vm0 = vmmov 0   ;;  %vm44_vm1 = vcmask 130048   ;;  %s270_s1 = inlined_call_operand.vmem [shape: bf16[16,128], index: 1, kind: input, shape index: {}]   ;;  %s271_s0 = inlined_call_operand.vmem [shape: bf16[2,24,16], index: 0, kind: input, shape index: {}]   ;;  %s272_s2 = inlined_call_operand.vmem [shape: f32[24,128], index: 2, kind: input, shape index: {}]   ;;  %s273_s3 = inlined_call_operand.vmem [shape: bf16[2,24,128], index: 3, kind: output, shape index: {}]  }
   0x1   :  { %210 = vmatprep.subr.bf16.mxu1 %v218_v0  ;;  %v214_v1 = vld [vmem:[%s270_s1] sm:$0xff]   ;;  %202 = vmatprep.mubr.msk.bf16.mxu1 %vm219_vm0, %v218_v0  ;;  %v215_v2 = vld [vmem:[%s271_s0 + $0x8] sm:$0xff]   ;;  %v217_v4 = vld [vmem:[%s271_s0 + $0x10] sm:$0xff]  }
   0x2   :  { %196 = vmatprep.subr.bf16.mxu0 %v218_v0  ;;  %198 = vmatprep.mubr.msk.bf16.mxu0 %vm219_vm0, %v218_v0  ;;  %v216_v3 = vld [vmem:[%s271_s0] sm:$0xff]   ;;  %v113_v6 = vld [vmem:[%s272_s2 + $0x10] sm:$0xff]  ;;  %v112_v9 = vld [vmem:[%s272_s2 + $0x8] sm:$0xff] }
   0x3   :  { %211 = vmatpush3.bf16.msra.mxu1 %v214_v1  ;;  %197 = vmatpush3.bf16.msra.mxu0 %v214_v1  ;;  %v111_v7 = vld [vmem:[%s272_s2] sm:$0xff] }
   0x6   :  { %203 = vmatmul.mubr.msk.bf16.vlgmr.msra.gmra.mrb[0].mxu1 %vm44_vm1, %v215_v2  ;;  %199 = vmatmul.mubr.msk.bf16.vlgmr.msra.gmra.mrb[0].mxu0 %vm44_vm1, %v216_v3 }
   0x7   :  { %206 = vmatprep.mubr.msk.bf16.mxu1 %vm219_vm0, %v218_v0 }
   0xe   :  { %207 = vmatmul.mubr.msk.bf16.gmra.mrb[4].mxu1 %vm44_vm1, %v217_v4 }
  0xd9   :  { %v96_v5 = vpop.f32.mrb[0].mxu1  ;;  %v88_v8 = vpop.f32.mrb[0].mxu0 }
  0xda   :  { %v204_v10 = vpop.f32.mrb[1].mxu1  ;;  %v114_v11 = vadd.f32 %v111_v7, %v88_v8  ;;  %v200_v12 = vpop.f32.mrb[1].mxu0  ;;  %v116_v15 = vadd.f32 %v113_v6, %v96_v5 }
  0xdb   :  { %v99_v13 = vpop.f32.mrb[2].mxu1  ;;  %v91_v14 = vpop.f32.mrb[2].mxu0 }
  0xdc   :  { %v117_v16 = vadd.f32 %v111_v7, %v99_v13  ;;  %v205_v17 = vpop.f32.mrb[3].mxu1  ;;  %v115_v18 = vadd.f32 %v112_v9, %v91_v14  ;;  %v201_v19 = vpop.f32.mrb[3].mxu0 }
  0xde   :  { %v183_v20 = vpack.c.bf16 %v117_v16, %v116_v15  ;;  %v178_v21 = vpack.c.bf16 %v115_v18, %v114_v11 }
  0xe0   :  { %190 = vst [vmem:[%s273_s3 + $0x8] sm:$0xff] %v183_v20   ;;  %179 = vst [vmem:[%s273_s3] sm:$0xff] %v178_v21  }
  0xe1   :  { %v104_v22 = vpop.f32.mrb[4].mxu1 }
  0xe2   :  { %v208_v23 = vpop.f32.mrb[5].mxu1  ;;  %v118_v25 = vadd.f32 %v112_v9, %v104_v22 }
  0xe3   :  { %v107_v24 = vpop.f32.mrb[6].mxu1 }
  0xe4   :  { %v119_v26 = vadd.f32 %v113_v6, %v107_v24  ;;  %v209_v27 = vpop.f32.mrb[7].mxu1 }
  0xe6   :  { %v188_v28 = vpack.c.bf16 %v119_v26, %v118_v25 }
  0xe8   :  { %191 = vst [vmem:[%s273_s3 + $0x10] sm:$0xff] %v188_v28  }

// kernel: vit_forward.7
= control target key start
LH: loop header
LB: loop body
LE: loop exit
PB: predicated region body
PF: predicated region fallthrough
CT: control target
= control target key end

     0   :  { %14 = vsyncpa [#allocation3], 0  ;;  %vm35_vm0 = vcmask 1041408   ;;  %s790_s0 = inlined_call_operand.vmem [shape: bf16[2,128], index: 0, kind: input, shape index: {}]   ;;  %s791_s1 = inlined_call_operand.vmem [shape: f32[1,128], index: 1, kind: input, shape index: {}]   ;;  %s792_s2 = inlined_call_operand.vmem [shape: f32[1,128], index: 2, kind: input, shape index: {}]   ;;  %s793_s3 = inlined_call_operand.vmem [shape: bf16[128,256], index: 3, kind: input, shape index: {}]   ;;  %s794_s4 = inlined_call_operand.vmem [shape: f32[1,256], index: 4, kind: input, shape index: {}]   ;;  %s795_s5 = inlined_call_operand.vmem [shape: bf16[256,8], index: 5, kind: input, shape index: {}]   ;;  %s796_s6 = inlined_call_operand.vmem [shape: f32[1,8], index: 6, kind: input, shape index: {}]   ;;  %s797_s7 = inlined_call_operand.hbm [shape: f32[2,8], index: 7, kind: output, shape index: {0}]   ;;  %s798_s8 = inlined_call_operand.hbm [shape: f32[2,8], index: 8, kind: output, shape index: {1}]  }
   0x1   :  { %v31_v0 = vld [vmem:[%s790_s0] sm:$0x1] }
   0x2   :  { %v32_v1 = vunpack.c.l.bf16 %v31_v0 }
   0x4   :  { %v36_v2 = vsel %vm35_vm0, %v32_v1, 0.0 }
   0x5   :  { %37 = vadd.xlane.f32.xlu0 %v36_v2 }
   0x6   :  { %15 = vsyncpa [#allocation5], 0  ;;  %v503_v3 = vld [vmem:[%s793_s3 + $0x4] ss:$8 sps:$4 sm:$0xff]   ;;  %v505_v4 = vld [vmem:[%s793_s3] ss:$8 sps:$4 sm:$0xff]   ;;  %v83_v51 = vlaneseq }
   0x7   :  { %v506_v5 = vld [vmem:[%s793_s3 + $0x14] ss:$8 sps:$4 sm:$0xff]   ;;  %173 = vmatprep.subr.bf16.mxu0 %v503_v3  ;;  %v508_v6 = vld [vmem:[%s793_s3 + $0x10] ss:$8 sps:$4 sm:$0xff]   ;;  %v509_v7 = vld [vmem:[%s793_s3 + $0x24] ss:$8 sps:$4 sm:$0xff]  }
   0x8   :  { %174 = vmatpush1.bf16.msra.mxu0 %v505_v4  ;;  %v511_v13 = vld [vmem:[%s793_s3 + $0x20] ss:$8 sps:$4 sm:$0xff]   ;;  %v512_v14 = vld [vmem:[%s793_s3 + $0x34] ss:$8 sps:$4 sm:$0xff]   ;;  %v514_v15 = vld [vmem:[%s793_s3 + $0x30] ss:$8 sps:$4 sm:$0xff]  }
   0x9   :  { %175 = vmatprep.subr.bf16.mxu0 %v506_v5  ;;  %v515_v16 = vld [vmem:[%s793_s3 + $0x44] ss:$8 sps:$4 sm:$0xff]   ;;  %v517_v17 = vld [vmem:[%s793_s3 + $0x40] ss:$8 sps:$4 sm:$0xff]   ;;  %v518_v18 = vld [vmem:[%s793_s3 + $0x54] ss:$8 sps:$4 sm:$0xff]  }
   0xa   :  { %v601_v19 = vmov 0   ;;  %v520_v20 = vld [vmem:[%s793_s3 + $0x50] ss:$8 sps:$4 sm:$0xff]   ;;  %v521_v21 = vld [vmem:[%s793_s3 + $0x64] ss:$8 sps:$4 sm:$0xff]   ;;  %v84_v52 = vshrl.u32 %v83_v51, 7 }
   0xb   :  { %205 = vmatprep.mubr.bf16.mxu0 %v601_v19  ;;  %v523_v22 = vld [vmem:[%s793_s3 + $0x60] ss:$8 sps:$4 sm:$0xff]   ;;  %v524_v23 = vld [vmem:[%s793_s3 + $0x74] ss:$8 sps:$4 sm:$0xff]   ;;  %v526_v24 = vld [vmem:[%s793_s3 + $0x70] ss:$8 sps:$4 sm:$0xff]  }
   0xc   :  { %176 = vmatpush1.bf16.msra.mxu0 %v508_v6  ;;  %v527_v25 = vld [vmem:[%s795_s5 + $0x40] sm:$0xff]   ;;  %v529_v27 = vld [vmem:[%s795_s5 + $0x48] sm:$0xff]   ;;  %v531_v39 = vld [vmem:[%s795_s5 + $0x50] sm:$0xff]   ;;  %v85_v53 = vsub.s32 0, %v84_v52  ;;  %v89_v55 = vsub.s32 1, %v84_v52  ;;  %vm401_vm1 = vcmask 58368  }
   0xd   :  { %177 = vmatprep.subr.bf16.mxu0 %v509_v7  ;;  %v528_v26 = vld [vmem:[%s795_s5] sm:$0xff]   ;;  %478 = vmatprep.subr.bf16.mxu1 %v527_v25  ;;  %v530_v28 = vld [vmem:[%s795_s5 + $0x8] sm:$0xff]   ;;  %v532_v40 = vld [vmem:[%s795_s5 + $0x10] sm:$0xff]  }
   0xe   :  { %479 = vmatpush3.bf16.msra.mxu1 %v528_v26  ;;  %v443_v33 = vld [vmem:[%s791_s1] ss:$0 sm:$0xff]  ;;  %v533_v41 = vld [vmem:[%s795_s5 + $0x58] sm:$0xff]   ;;  %v537_v45 = vld [vmem:[%s795_s5 + $0x68] sm:$0xff]  }
   0xf   :  { %480 = vmatprep.subr.bf16.mxu1 %v529_v27  ;;  %v444_v35 = vld [vmem:[%s792_s2] ss:$0 sm:$0xff]  ;;  %v534_v42 = vld [vmem:[%s795_s5 + $0x18] sm:$0xff]   ;;  %v538_v46 = vld [vmem:[%s795_s5 + $0x28] sm:$0xff]  }
  0x10   :  { %178 = vmatpush1.bf16.msra.mxu0 %v511_v13  ;;  %v535_v43 = vld [vmem:[%s795_s5 + $0x60] sm:$0xff]   ;;  %v539_v47 = vld [vmem:[%s795_s5 + $0x70] sm:$0xff]   ;;  %v541_v49 = vld [vmem:[%s795_s5 + $0x78] sm:$0xff]  }
  0x11   :  { %179 = vmatprep.subr.bf16.mxu0 %v512_v14  ;;  %v536_v44 = vld [vmem:[%s795_s5 + $0x20] sm:$0xff]   ;;  %v540_v48 = vld [vmem:[%s795_s5 + $0x30] sm:$0xff]   ;;  %v542_v50 = vld [vmem:[%s795_s5 + $0x38] sm:$0xff]  }
  0x12   :  { %481 = vmatpush3.bf16.msra.mxu1 %v530_v28  ;;  %v81_v54 = vld [vmem:[%s794_s4] sm:$0x3] }
  0x13   :  { %482 = vmatprep.subr.bf16.mxu1 %v531_v39  ;;  %v86_v56 = vrot.slane %v81_v54, %v85_v53  ;;  %v90_v57 = vrot.slane %v81_v54, %v89_v55  ;;  %v461_v13 = vld [vmem:[%s796_s6] ss:$0 sm:$0xff]  ;;  %s602_s6 = smov [#allocation4]  }
  0x14   :  { %180 = vmatpush1.bf16.msra.mxu0 %v514_v15  ;;  %s431_s26 = sshll.u32 %s602_s6, 4  ;;  %s432_s26 = int_to_ptr.vmem [resolvable:$true] %s431_s26 }
  0x15   :  { %181 = vmatprep.subr.bf16.mxu0 %v515_v16  ;;  %s553_s27 = scalar_lea.vmem %s432_s26, 32  ;;  %p558_p1 = scmp.lt.s32.totalorder %s432_s26, %s432_s26 }
  0x16   :  { %483 = vmatpush3.bf16.msra.mxu1 %v532_v40  ;;  %p554_p0 = scmp.ne.s32.totalorder %s432_s26, %s553_s27  ;;  %p559_p2 = scmp.lt.s32.totalorder %s553_s27, %s553_s27 }
  0x17   :  { %484 = vmatprep.subr.bf16.mxu1 %v533_v41 }
  0x18   :  { %182 = vmatpush1.bf16.msra.mxu0 %v517_v17  ;;  %p560_p3 = por %p559_p2, %p558_p1 }
  0x19   :  { %183 = vmatprep.subr.bf16.mxu0 %v518_v18 }
  0x1a   :  { %485 = vmatpush3.bf16.msra.mxu1 %v534_v42  ;;  %p561_p4 = pnand %p560_p3, %p554_p0 }
  0x1b   :  { %486 = vmatprep.subr.bf16.mxu1 %v535_v43 }
  0x1c   :  { %184 = vmatpush1.bf16.msra.mxu0 %v520_v20 }
  0x1d   :  { %185 = vmatprep.subr.bf16.mxu0 %v521_v21 }
  0x1e   :  { %487 = vmatpush3.bf16.msra.mxu1 %v536_v44 }
  0x1f   :  { %488 = vmatprep.subr.bf16.mxu1 %v537_v45 }
  0x20   :  { %186 = vmatpush1.bf16.msra.mxu0 %v523_v22 }
  0x21   :  { %187 = vmatprep.subr.bf16.mxu0 %v524_v23 }
  0x22   :  { %489 = vmatpush3.bf16.msra.mxu1 %v538_v46 }
  0x23   :  { %490 = vmatprep.subr.bf16.mxu1 %v539_v47 }
  0x24   :  { %188 = vmatpush1.bf16.msra.mxu0 %v526_v24 }
  0x26   :  { %491 = vmatpush3.bf16.msra.mxu1 %v540_v48 }
  0x27   :  { %492 = vmatprep.subr.bf16.mxu1 %v541_v49 }
  0x2a   :  { %493 = vmatpush3.bf16.msra.mxu1 %v542_v50 }
  0x92   :  { %v38_v8 = vpop.xlane.xlu0 %37 }
  0x93   :  { %v40_v9 = vmul.f32 0.0078125, %v38_v8 }
  0x95   :  { %v41_v10 = vsub.f32 %v32_v1, %v40_v9 }
  0x97   :  { %v42_v11 = vmul.f32 %v41_v10, %v41_v10 }
  0x99   :  { %v43_v12 = vsel %vm35_vm0, %v42_v11, 0.0 }
  0x9a   :  { %44 = vadd.xlane.f32.xlu0 %v43_v12 }
 0x127   :  { %v45_v29 = vpop.xlane.xlu0 %44 }
 0x128   :  { %v46_v30 = vmul.f32 0.0078125, %v45_v29 }
 0x12a   :  { %v47_v31 = vadd.f32 1e-05, %v46_v30 }
 0x12c   :  { %543 = vrsqrt.f32 %v47_v31 }
 0x136   :  { %v544_v32 = vpop.eup %543 }
 0x137   :  { %v49_v34 = vmul.f32 %v544_v32, %v41_v10 }
 0x139   :  { %v56_v36 = vmul.f32 %v443_v33, %v49_v34 }
 0x13b   :  { %v63_v37 = vadd.f32 %v444_v35, %v56_v36 }
 0x13d   :  { %v64_v38 = vpack.c.bf16 %v63_v37, %v63_v37 }
 0x13f   :  { %206 = vmatmul.mubr.bf16.vlgmr.msra.gmra.mrb[0].mxu0 %v64_v38 }
 0x212   :  { %v207_v58 = vpop.f32.mrb[0].mxu0 }
 0x213   :  { %v208_v59 = vadd.f32 %v207_v58, %v86_v56  ;;  %v209_v60 = vpop.f32.mrb[1].mxu0 }
 0x214   :  { %v210_v61 = vadd.f32 %v209_v60, %v90_v57  ;;  %v211_v62 = vpop.f32.mrb[2].mxu0 }
 0x215   :  { %v216_v63 = vmul.f32 0.70710677, %v208_v59  ;;  %v212_v0 = vpop.f32.mrb[3].mxu0  ;;  %v214_v4 = vmul.f32 0.5, %v208_v59 }
 0x216   :  { %v217_v1 = vmul.f32 0.70710677, %v210_v61  ;;  %v215_v6 = vmul.f32 0.5, %v210_v61 }
 0x217   :  { %545 = verf.f32 %v216_v63 }
 0x218   :  { %547 = verf.f32 %v217_v1 }
 0x221   :  { %v546_v2 = vpop.eup %545 }
 0x222   :  { %v548_v3 = vpop.eup %547  ;;  %v220_v5 = vadd.f32 1.0, %v546_v2 }
 0x223   :  { %v221_v7 = vadd.f32 1.0, %v548_v3 }
 0x224   :  { %v222_v8 = vmul.f32 %v220_v5, %v214_v4 }
 0x225   :  { %v223_v9 = vmul.f32 %v221_v7, %v215_v6 }
 0x226   :  { %v224_v11 = vpack.c.bf16 %v222_v8, %v222_v8 }
 0x227   :  { %v225_v10 = vpack.c.bf16 %v223_v9, %v223_v9 }
 0x229   :  { %393 = vmatprep.mubr.bf16.mxu1 %v225_v10 }
 0x22a   :  { %394 = vmatmul.mubr.bf16.vlgmr.msra.gmra.mrb[0].mxu1 %v224_v11 }
 0x2fd   :  { %v494_v12 = vpop.f32.mrb[0].mxu1 }
 0x2fe   :  { %v495_v14 = vpop.f32.mrb[1].mxu1 }
 0x2ff   :  { %v496_v15 = vadd.f32 %v495_v14, %v494_v12  ;;  %v497_v16 = vpop.f32.mrb[2].mxu1 }
 0x300   :  { %v498_v17 = vpop.f32.mrb[3].mxu1 }
 0x301   :  { %v396_v18 = vadd.f32 %v496_v15, %v461_v13 }
 0x303   :  { %v402_v19 = vsel %vm401_vm1, %v396_v18, -inf  ;;  %414 = vst.msk [vmem:[#allocation4] sm:$0x3] %vm401_vm1, %v396_v18 }
 0x304   :  { %403 = vmax.xlane.f32.xlu1 %v402_v19 }
 0x391   :  { %v404_v20 = vpop.xlane.xlu1 %403 }
 0x392   :  { %v405_v21 = vsub.f32 %v396_v18, %v404_v20 }
 0x394   :  { %v406_v22 = vmul.f32 1.442695, %v405_v21 }
 0x396   :  { %549 = vpow2.f32 %v406_v22 }
 0x3a0   :  { %v550_v23 = vpop.eup %549 }
 0x3a1   :  { %v408_v24 = vsel %vm401_vm1, %v550_v23, 0.0 }
 0x3a2   :  { %409 = vadd.xlane.f32.xlu1 %v408_v24 }
 0x3a3   :  { %564 = shalt.err (!%p561_p4)
}
 0x3a4   :  { %s565_s1 = scalar_lea.hbm %s798_s8, 32 }
 0x3a5   :  { %p566_p5 = scmp.ne.s32.totalorder %s798_s8, %s565_s1  ;;  %p569_p6 = scmp.lt.u32.totalorder %s565_s1, %s798_s8 }
 0x3a7   :  { %p571_p7 = pnand %p569_p6, %p566_p5 }
 0x3a9   :  { %574 = shalt.err (!%p571_p7)
}
 0x3aa   :  { %434 = dma.vmem_to_hbm [thread:$0]  %s432_s26, 32, %s798_s8, [#allocation5]  }
 0x3ab   :  { %s603_s0 = smov [#allocation2]  }
 0x3ac   :  { %s421_s13 = sshll.u32 %s603_s0, 4  ;;  %s422_s13 = int_to_ptr.vmem [resolvable:$true] %s421_s13 }
 0x3ad   :  { %s575_s14 = scalar_lea.vmem %s422_s13, 32  ;;  %p580_p9 = scmp.lt.s32.totalorder %s422_s13, %s422_s13 }
 0x3ae   :  { %p576_p8 = scmp.ne.s32.totalorder %s422_s13, %s575_s14  ;;  %p581_p10 = scmp.lt.s32.totalorder %s575_s14, %s575_s14 }
 0x3b0   :  { %p582_p11 = por %p581_p10, %p580_p9 }
 0x3b2   :  { %p583_p12 = pnand %p582_p11, %p576_p8 }
 0x42f   :  { %v410_v25 = vpop.xlane.xlu1 %409 }
 0x430   :  { %551 = vrcp.f32 %v410_v25 }
 0x43a   :  { %v552_v26 = vpop.eup %551 }
 0x43b   :  { %v412_v27 = vmul.f32 %v552_v26, %v550_v23 }
 0x43d   :  { %413 = vst.msk [vmem:[#allocation2] sm:$0x3] %vm401_vm1, %v412_v27 }
 0x43e   :  { %586 = shalt.err (!%p583_p12)
}
 0x43f   :  { %s587_s8 = scalar_lea.hbm %s797_s7, 32 }
 0x440   :  { %p588_p13 = scmp.ne.s32.totalorder %s797_s7, %s587_s8  ;;  %p591_p0 = scmp.lt.u32.totalorder %s587_s8, %s797_s7 }
 0x442   :  { %p593_p1 = pnand %p591_p0, %p588_p13 }
 0x444   :  { %596 = shalt.err (!%p593_p1)
}
 0x445   :  { %424 = dma.vmem_to_hbm [thread:$0]  %s422_s13, 32, %s797_s7, [#allocation3]  }
 0x446   :  { %597 = dma.done.wait [#allocation3], 32  }
 0x447   :  { %598 = vsyncadd [#allocation3], 4294967264 }
 0x448   :  { %599 = dma.done.wait [#allocation5], 32  }
 0x449   :  { %600 = vsyncadd [#allocation5], 4294967264 }
 0x44a   :  { %441 = vsyncpa [#allocation3], 1 }
 0x44b   :  { %442 = vsyncpa [#allocation5], 1 }

// kernel: vit_forward.5
= control target key start
LH: loop header
LB: loop body
LE: loop exit
PB: predicated region body
PF: predicated region fallthrough
CT: control target
= control target key end

     0   :  { %v3188_v7 = vmov 0.0   ;;  %v3189_v50 = vmov 0   ;;  %vm3190_vm0 = vmmov 0   ;;  %vm464_vm1 = vcmask 261120   ;;  %s3191_s22 = smov 96   ;;  %s3192_s23 = smov 64   ;;  %s4027_s0 = inlined_call_operand.vmem [shape: bf16[2,24,128], index: 0, kind: input, shape index: {}]   ;;  %s4028_s3 = inlined_call_operand.vmem [shape: bf16[128,384], index: 3, kind: input, shape index: {}]   ;;  %s4029_s1 = inlined_call_operand.vmem [shape: f32[1,128], index: 1, kind: input, shape index: {}]   ;;  %s4030_s2 = inlined_call_operand.vmem [shape: f32[1,128], index: 2, kind: input, shape index: {}]   ;;  %s4031_s4 = inlined_call_operand.vmem [shape: f32[1,384], index: 4, kind: input, shape index: {}]   ;;  %s4032_s11 = inlined_call_operand.vmem [shape: f32[1,24], index: 11, kind: input, shape index: {}]   ;;  %s4033_s5 = inlined_call_operand.vmem [shape: bf16[128,128], index: 5, kind: input, shape index: {}]   ;;  %s4034_s7 = inlined_call_operand.vmem [shape: bf16[128,256], index: 7, kind: input, shape index: {}]   ;;  %s4035_s9 = inlined_call_operand.vmem [shape: bf16[256,128], index: 9, kind: input, shape index: {}]   ;;  %s4036_s6 = inlined_call_operand.vmem [shape: f32[1,128], index: 6, kind: input, shape index: {}]   ;;  %s4037_s8 = inlined_call_operand.vmem [shape: f32[1,256], index: 8, kind: input, shape index: {}]   ;;  %s4038_s10 = inlined_call_operand.vmem [shape: f32[1,128], index: 10, kind: input, shape index: {}]   ;;  %s4039_s12 = inlined_call_operand.vmem [shape: bf16[2,24,128], index: 12, kind: output, shape index: {}]  }
   0x1   :  { %v2611_v0 = vld [vmem:[%s4027_s0] sm:$0xff]   ;;  %v2637_v1 = vld [vmem:[%s4027_s0 + $0x8] sm:$0xff]   ;;  %2761 = vmatprep.subr.bf16.mxu1 %v3188_v7  ;;  %v2638_v25 = vld [vmem:[%s4027_s0 + $0x10] sm:$0xff]   ;;  %359 = vmatprep.mubr.bf16.mxu0 %v3189_v50  ;;  %vm569_vm2 = vcmask 1043456   ;;  %vm525_vm3 = vcmask 195584   ;;  %s3193_s24 = smov 32  }
   0x2   :  { %v3265_v2 = vunpack.c.l.bf16 %v2611_v0  ;;  %v3267_v3 = vunpack.c.l.bf16 %v2637_v1  ;;  %v3271_v4 = vunpack.c.h.bf16 %v2611_v0  ;;  %v3273_v5 = vunpack.c.h.bf16 %v2637_v1  ;;  %v2975_v6 = vld [vmem:[%s4028_s3 + $0x4] ss:$12 sps:$4 sm:$0xff]   ;;  %v2977_v8 = vld [vmem:[%s4028_s3] ss:$12 sps:$4 sm:$0xff]   ;;  %v2978_v9 = vld [vmem:[%s4028_s3 + $0x8] ss:$12 sps:$4 sm:$0xff]   ;;  %2777 = vmatprep.mubr.msk.bf16.mxu1 %vm3190_vm0, %v3188_v7 }
   0x3   :  { %327 = vmatprep.subr.bf16.mxu0 %v2975_v6  ;;  %v2979_v10 = vld [vmem:[%s4028_s3 + $0x1c] ss:$12 sps:$4 sm:$0xff]   ;;  %2762 = vmatpush3.bf16.msra.mxu1 %v2978_v9  ;;  %v3312_v27 = vunpack.c.l.bf16 %v2638_v25  ;;  %v3317_v29 = vunpack.c.h.bf16 %v2638_v25  ;;  %v2981_v30 = vld [vmem:[%s4028_s3 + $0x18] ss:$12 sps:$4 sm:$0xff]   ;;  %v2982_v31 = vld [vmem:[%s4028_s3 + $0x20] ss:$12 sps:$4 sm:$0xff]  }
   0x4   :  { %56 = vadd.xlane.f32.xlu0 %v3265_v2  ;;  %60 = vadd.xlane.f32.xlu1 %v3267_v3  ;;  %v2983_v32 = vld [vmem:[%s4028_s3 + $0x34] ss:$12 sps:$4 sm:$0xff]   ;;  %v2985_v33 = vld [vmem:[%s4028_s3 + $0x30] ss:$12 sps:$4 sm:$0xff]   ;;  %v2986_v34 = vld [vmem:[%s4028_s3 + $0x38] ss:$12 sps:$4 sm:$0xff]  }
   0x5   :  { %328 = vmatpush1.bf16.msra.mxu0 %v2977_v8  ;;  %2763 = vmatprep.subr.bf16.mxu1 %v3188_v7  ;;  %v2987_v35 = vld [vmem:[%s4028_s3 + $0x4c] ss:$12 sps:$4 sm:$0xff]   ;;  %v2989_v36 = vld [vmem:[%s4028_s3 + $0x48] ss:$12 sps:$4 sm:$0xff]   ;;  %v2990_v37 = vld [vmem:[%s4028_s3 + $0x50] ss:$12 sps:$4 sm:$0xff]  }
   0x6   :  { %329 = vmatprep.subr.bf16.mxu0 %v2979_v10  ;;  %v2991_v38 = vld [vmem:[%s4028_s3 + $0x64] ss:$12 sps:$4 sm:$0xff]   ;;  %v2993_v39 = vld [vmem:[%s4028_s3 + $0x60] ss:$12 sps:$4 sm:$0xff]   ;;  %v2994_v40 = vld [vmem:[%s4028_s3 + $0x68] ss:$12 sps:$4 sm:$0xff]  }
   0x7   :  { %2764 = vmatpush3.bf16.msra.mxu1 %v2982_v31  ;;  %v2995_v41 = vld [vmem:[%s4028_s3 + $0x7c] ss:$12 sps:$4 sm:$0xff]   ;;  %v2997_v42 = vld [vmem:[%s4028_s3 + $0x78] ss:$12 sps:$4 sm:$0xff]   ;;  %v2998_v43 = vld [vmem:[%s4028_s3 + $0x80] ss:$12 sps:$4 sm:$0xff]  }
   0x8   :  { %58 = vadd.xlane.f32.xlu0 %v3271_v4  ;;  %62 = vadd.xlane.f32.xlu1 %v3273_v5  ;;  %v2999_v44 = vld [vmem:[%s4028_s3 + $0x94] ss:$12 sps:$4 sm:$0xff]   ;;  %v3001_v45 = vld [vmem:[%s4028_s3 + $0x90] ss:$12 sps:$4 sm:$0xff]   ;;  %v3002_v46 = vld [vmem:[%s4028_s3 + $0x98] ss:$12 sps:$4 sm:$0xff]  }
   0x9   :  { %330 = vmatpush1.bf16.msra.mxu0 %v2981_v30  ;;  %2765 = vmatprep.subr.bf16.mxu1 %v3188_v7  ;;  %v3003_v47 = vld [vmem:[%s4028_s3 + $0xac] ss:$12 sps:$4 sm:$0xff]   ;;  %v3005_v48 = vld [vmem:[%s4028_s3 + $0xa8] ss:$12 sps:$4 sm:$0xff]   ;;  %v3006_v49 = vld [vmem:[%s4028_s3 + $0xb0] ss:$12 sps:$4 sm:$0xff]  }
   0xa   :  { %331 = vmatprep.subr.bf16.mxu0 %v2983_v32  ;;  %vm807_vm4 = vcmask 523520   ;;  %vm988_vm5 = vcmask 785920   ;;  %vm1169_vm6 = vcmask 1048320  }
   0xb   :  { %2766 = vmatpush3.bf16.msra.mxu1 %v2986_v34 }
   0xc   :  { %2767 = vmatprep.subr.bf16.mxu1 %v3188_v7 }
   0xd   :  { %332 = vmatpush1.bf16.msra.mxu0 %v2985_v33 }
   0xe   :  { %333 = vmatprep.subr.bf16.mxu0 %v2987_v35 }
   0xf   :  { %2768 = vmatpush3.bf16.msra.mxu1 %v2990_v37 }
  0x10   :  { %2769 = vmatprep.subr.bf16.mxu1 %v3188_v7 }
  0x11   :  { %334 = vmatpush1.bf16.msra.mxu0 %v2989_v36 }
  0x12   :  { %335 = vmatprep.subr.bf16.mxu0 %v2991_v38 }
  0x13   :  { %2770 = vmatpush3.bf16.msra.mxu1 %v2994_v40 }
  0x14   :  { %2771 = vmatprep.subr.bf16.mxu1 %v3188_v7 }
  0x15   :  { %336 = vmatpush1.bf16.msra.mxu0 %v2993_v39 }
  0x16   :  { %337 = vmatprep.subr.bf16.mxu0 %v2995_v41 }
  0x17   :  { %2772 = vmatpush3.bf16.msra.mxu1 %v2998_v43 }
  0x18   :  { %2773 = vmatprep.subr.bf16.mxu1 %v3188_v7 }
  0x19   :  { %338 = vmatpush1.bf16.msra.mxu0 %v2997_v42 }
  0x1a   :  { %339 = vmatprep.subr.bf16.mxu0 %v2999_v44 }
  0x1b   :  { %2774 = vmatpush3.bf16.msra.mxu1 %v3002_v46 }
  0x1c   :  { %2775 = vmatprep.subr.bf16.mxu1 %v3188_v7 }
  0x1d   :  { %340 = vmatpush1.bf16.msra.mxu0 %v3001_v45 }
  0x1e   :  { %341 = vmatprep.subr.bf16.mxu0 %v3003_v47 }
  0x1f   :  { %2776 = vmatpush3.bf16.msra.mxu1 %v3006_v49  ;;  %v184_v49 = vlaneseq }
  0x21   :  { %342 = vmatpush1.bf16.msra.mxu0 %v3005_v48 }
  0x91   :  { %v57_v11 = vpop.xlane.xlu0 %56  ;;  %v61_v12 = vpop.xlane.xlu1 %60 }
  0x92   :  { %v69_v13 = vmul.f32 0.0078125, %v57_v11  ;;  %v71_v14 = vmul.f32 0.0078125, %v61_v12 }
  0x94   :  { %v3292_v15 = vsub.f32 %v3265_v2, %v69_v13  ;;  %v3295_v16 = vsub.f32 %v3267_v3, %v71_v14  ;;  %v2497_v14 = vld [vmem:[%s4029_s1] ss:$0 sm:$0xff] }
  0x95   :  { %v59_v17 = vpop.xlane.xlu0 %58  ;;  %v63_v18 = vpop.xlane.xlu1 %62 }
  0x96   :  { %v70_v19 = vmul.f32 0.0078125, %v59_v17  ;;  %v81_v20 = vmul.f32 %v3292_v15, %v3292_v15  ;;  %v72_v21 = vmul.f32 0.0078125, %v63_v18  ;;  %v83_v22 = vmul.f32 %v3295_v16, %v3295_v16 }
  0x98   :  { %87 = vadd.xlane.f32.xlu0 %v81_v20  ;;  %v3302_v23 = vsub.f32 %v3271_v4, %v70_v19  ;;  %v3305_v24 = vsub.f32 %v3273_v5, %v72_v21  ;;  %v2498_v21 = vld [vmem:[%s4030_s2] ss:$0 sm:$0xff] }
  0x9a   :  { %v82_v26 = vmul.f32 %v3302_v23, %v3302_v23  ;;  %v84_v28 = vmul.f32 %v3305_v24, %v3305_v24 }
  0x9c   :  { %91 = vadd.xlane.f32.xlu0 %v83_v22  ;;  %89 = vadd.xlane.f32.xlu1 %v82_v26 }
  0xa0   :  { %64 = vadd.xlane.f32.xlu0 %v3312_v27  ;;  %93 = vadd.xlane.f32.xlu1 %v84_v28 }
  0xa4   :  { %66 = vadd.xlane.f32.xlu1 %v3317_v29 }
 0x125   :  { %v88_v51 = vpop.xlane.xlu0 %87 }
 0x126   :  { %v99_v52 = vmul.f32 0.0078125, %v88_v51  ;;  %v3407_v51 = vshrl.u32 %v184_v49, 7 }
 0x128   :  { %v105_v53 = vadd.f32 1e-05, %v99_v52  ;;  %v186_v52 = vsub.s32 0, %v3407_v51 }
 0x129   :  { %v90_v54 = vpop.xlane.xlu1 %89  ;;  %v92_v55 = vpop.xlane.xlu0 %91 }
 0x12a   :  { %3055 = vrsqrt.f32 %v105_v53  ;;  %v100_v56 = vmul.f32 0.0078125, %v90_v54  ;;  %v101_v57 = vmul.f32 0.0078125, %v92_v55  ;;  %v182_v53 = vld [vmem:[%s4031_s4] sm:$0x7]  ;;  %v194_v54 = vsub.s32 2, %v3407_v51 }
 0x12b   :  { %v190_v55 = vsub.s32 1, %v3407_v51 }
 0x12c   :  { %v106_v58 = vadd.f32 1e-05, %v100_v56  ;;  %v107_v59 = vadd.f32 1e-05, %v101_v57  ;;  %v3417_v56 = vrot.slane %v182_v53, %v186_v52  ;;  %v3419_v57 = vrot.slane %v182_v53, %v194_v54 }
 0x12d   :  { %v94_v60 = vpop.xlane.xlu1 %93  ;;  %v65_v61 = vpop.xlane.xlu0 %64 }
 0x12e   :  { %3057 = vrsqrt.f32 %v106_v58  ;;  %v102_v62 = vmul.f32 0.0078125, %v94_v60  ;;  %v73_v63 = vmul.f32 0.0078125, %v65_v61  ;;  %v3423_v60 = vrot.slane %v182_v53, %v190_v55 }
 0x12f   :  { %3059 = vrsqrt.f32 %v107_v59 }
 0x130   :  { %v108_v0 = vadd.f32 1e-05, %v102_v62  ;;  %v79_v1 = vsub.f32 %v3312_v27, %v73_v63 }
 0x131   :  { %v67_v6 = vpop.xlane.xlu1 %66 }
 0x132   :  { %3061 = vrsqrt.f32 %v108_v0  ;;  %v74_v8 = vmul.f32 0.0078125, %v67_v6  ;;  %v85_v9 = vmul.f32 %v79_v1, %v79_v1 }
 0x134   :  { %v3056_v10 = vpop.eup %3055  ;;  %95 = vadd.xlane.f32.xlu0 %v85_v9  ;;  %v80_v11 = vsub.f32 %v3317_v29, %v74_v8 }
 0x135   :  { %v117_v12 = vmul.f32 %v3056_v10, %v3292_v15 }
 0x136   :  { %v86_v13 = vmul.f32 %v80_v11, %v80_v11 }
 0x137   :  { %v129_v19 = vmul.f32 %v2497_v14, %v117_v12 }
 0x138   :  { %v3058_v17 = vpop.eup %3057  ;;  %97 = vadd.xlane.f32.xlu1 %v86_v13 }
 0x139   :  { %v118_v18 = vmul.f32 %v3058_v17, %v3302_v23  ;;  %v3060_v20 = vpop.eup %3059  ;;  %v141_v26 = vadd.f32 %v2498_v21, %v129_v19 }
 0x13a   :  { %v119_v15 = vmul.f32 %v3060_v20, %v3295_v16 }
 0x13b   :  { %v130_v22 = vmul.f32 %v2497_v14, %v118_v18 }
 0x13c   :  { %v3062_v25 = vpop.eup %3061  ;;  %v131_v33 = vmul.f32 %v2497_v14, %v119_v15 }
 0x13d   :  { %v142_v28 = vadd.f32 %v2498_v21, %v130_v22  ;;  %v120_v30 = vmul.f32 %v3062_v25, %v3305_v24 }
 0x13e   :  { %v143_v34 = vadd.f32 %v2498_v21, %v131_v33 }
 0x13f   :  { %v147_v31 = vpack.c.bf16 %v142_v28, %v141_v26  ;;  %v132_v32 = vmul.f32 %v2497_v14, %v120_v30 }
 0x141   :  { %360 = vmatmul.mubr.bf16.vlgmr.msra.gmra.mrb[0].mxu0 %v147_v31  ;;  %2778 = vmatmul.mubr.bf16.vlgmr.msra.gmra.mrb[0].mxu1 %v147_v31  ;;  %v144_v23 = vadd.f32 %v2498_v21, %v132_v32 }
 0x142   :  { %369 = vmatprep.mubr.bf16.mxu0 %v3189_v50  ;;  %2781 = vmatprep.mubr.msk.bf16.mxu1 %vm3190_vm0, %v3188_v7 }
 0x143   :  { %v148_v35 = vpack.c.bf16 %v144_v23, %v143_v34 }
 0x149   :  { %370 = vmatmul.mubr.bf16.gmra.mrb[4].mxu0 %v148_v35  ;;  %2782 = vmatmul.mubr.bf16.gmra.mrb[4].mxu1 %v148_v35 }
 0x14a   :  { %379 = vmatprep.mubr.bf16.mxu0 %v3189_v50  ;;  %2785 = vmatprep.mubr.msk.bf16.mxu1 %vm3190_vm0, %v3188_v7 }
 0x1c1   :  { %v96_v16 = vpop.xlane.xlu0 %95 }
 0x1c2   :  { %v103_v24 = vmul.f32 0.0078125, %v96_v16 }
 0x1c4   :  { %v109_v36 = vadd.f32 1e-05, %v103_v24 }
 0x1c5   :  { %v98_v37 = vpop.xlane.xlu1 %97 }
 0x1c6   :  { %3063 = vrsqrt.f32 %v109_v36  ;;  %v104_v38 = vmul.f32 0.0078125, %v98_v37 }
 0x1c8   :  { %v110_v39 = vadd.f32 1e-05, %v104_v38 }
 0x1ca   :  { %3065 = vrsqrt.f32 %v110_v39 }
 0x1d0   :  { %v3064_v40 = vpop.eup %3063 }
 0x1d1   :  { %v121_v41 = vmul.f32 %v3064_v40, %v79_v1 }
 0x1d3   :  { %v133_v44 = vmul.f32 %v2497_v14, %v121_v41 }
 0x1d4   :  { %v3066_v42 = vpop.eup %3065 }
 0x1d5   :  { %v122_v43 = vmul.f32 %v3066_v42, %v80_v11  ;;  %v145_v46 = vadd.f32 %v2498_v21, %v133_v44 }
 0x1d7   :  { %v134_v45 = vmul.f32 %v2497_v14, %v122_v43 }
 0x1d9   :  { %v146_v47 = vadd.f32 %v2498_v21, %v134_v45 }
 0x1db   :  { %v149_v48 = vpack.c.bf16 %v146_v47, %v145_v46 }
 0x1dd   :  { %380 = vmatmul.mubr.bf16.gmra.mrb[8].mxu0 %v149_v48  ;;  %2786 = vmatmul.mubr.bf16.gmra.mrb[8].mxu1 %v149_v48 }
 0x214   :  { %v361_v58 = vpop.f32.mrb[0].mxu0  ;;  %v424_v59 = vpop.f32.mrb[0].mxu1 }
 0x215   :  { %v362_v61 = vadd.f32 %v361_v58, %v3417_v56  ;;  %v363_v62 = vpop.f32.mrb[1].mxu0  ;;  %v2779_v63 = vpop.f32.mrb[1].mxu1  ;;  %v425_v6 = vadd.f32 %v424_v59, %v3419_v57 }
 0x216   :  { %v365_v0 = vpop.f32.mrb[2].mxu0  ;;  %v427_v1 = vpop.f32.mrb[2].mxu1  ;;  %v364_v12 = vadd.f32 %v363_v62, %v3423_v60 }
 0x217   :  { %v366_v8 = vadd.f32 %v365_v0, %v3417_v56  ;;  %v428_v9 = vadd.f32 %v427_v1, %v3419_v57  ;;  %v367_v10 = vpop.f32.mrb[3].mxu0  ;;  %v2780_v11 = vpop.f32.mrb[3].mxu1  ;;  %v447_v14 = vmul.f32 0.17677669, %v362_v61  ;;  %v3485_v1 = vld [vmem:[%s4032_s11] ss:$0 sm:$0xff] }
 0x218   :  { %v368_v13 = vadd.f32 %v367_v10, %v3423_v60 }
 0x219   :  { %v448_v17 = vmul.f32 0.17677669, %v366_v8  ;;  %v3431_v18 = vpack.c.bf16 %v428_v9, %v425_v6 }
 0x21a   :  { %v3433_v19 = vpack.c.bf16 %v368_v13, %v364_v12 }
 0x21b   :  { %v3435_v20 = vpack.c.bf16 %v448_v17, %v447_v14 }
 0x21c   :  { %v371_v21 = vpop.f32.mrb[4].mxu0  ;;  %v432_v22 = vpop.f32.mrb[4].mxu1  ;;  %2945 = vmatprep.subr.msk.bf16.mxu0 %vm464_vm1, %v3433_v19  ;;  %v472_v25 = vsel %vm464_vm1, %v3433_v19, 0 }
 0x21d   :  { %v373_v26 = vpop.f32.mrb[5].mxu0  ;;  %v2783_v28 = vpop.f32.mrb[5].mxu1  ;;  %2790 = vmatpush3.bf16.xpose.msra.mxu0 %v472_v25  ;;  %2793 = vmatprep.mubr.msk.bf16.mxu0 %vm464_vm1, %v3435_v20  ;;  %v372_v34 = vadd.f32 %v371_v21, %v3417_v56  ;;  %v433_v24 = vadd.f32 %v432_v22, %v3419_v57 }
 0x21e   :  { %v374_v15 = vadd.f32 %v373_v26, %v3423_v60  ;;  %v375_v30 = vpop.f32.mrb[6].mxu0  ;;  %v435_v31 = vpop.f32.mrb[6].mxu1 }
 0x21f   :  { %v377_v32 = vpop.f32.mrb[7].mxu0  ;;  %v2784_v33 = vpop.f32.mrb[7].mxu1  ;;  %v449_v16 = vmul.f32 0.17677669, %v372_v34  ;;  %v3455_v37 = vpack.c.bf16 %v433_v24, %v433_v24  ;;  %v376_v39 = vadd.f32 %v375_v30, %v3417_v56  ;;  %v436_v42 = vadd.f32 %v435_v31, %v3419_v57 }
 0x220   :  { %v3444_v23 = vpack.c.bf16 %v374_v15, %v374_v15  ;;  %v378_v47 = vadd.f32 %v377_v32, %v3423_v60 }
 0x221   :  { %v3453_v36 = vpack.c.bf16 %v449_v16, %v449_v16  ;;  %v571_v38 = vsel %vm569_vm2, %v3455_v37, 0  ;;  %v450_v54 = vmul.f32 0.17677669, %v376_v39 }
 0x222   :  { %2946 = vmatprep.subr.msk.bf16.mxu0 %vm464_vm1, %v3444_v23  ;;  %v475_v35 = vsel %vm464_vm1, %v3444_v23, 0 }
 0x225   :  { %2792 = vmatpush3.bf16.xpose.msra.mxu0 %v475_v35 }
 0x226   :  { %2797 = vmatprep.subr.bf16.mxu0 %v3431_v18 }
 0x22c   :  { %2794 = vmatmul.mubr.msk.bf16.vlgmr.msra.gmra.mrb[12].mxu0 %vm464_vm1, %v3453_v36 }
 0x22d   :  { %2798 = vmatpush3.bf16.msra.mxu0 %v3431_v18 }
 0x22e   :  { %2947 = vmatprep.subr.msk.bf16.mxu0 %vm569_vm2, %v3455_v37 }
 0x231   :  { %2800 = vmatpush3.bf16.msra.mxu0 %v571_v38 }
 0x2b0   :  { %v381_v40 = vpop.f32.mrb[8].mxu0  ;;  %v440_v41 = vpop.f32.mrb[8].mxu1 }
 0x2b1   :  { %v382_v43 = vadd.f32 %v381_v40, %v3417_v56  ;;  %v441_v44 = vadd.f32 %v440_v41, %v3419_v57  ;;  %v383_v45 = vpop.f32.mrb[9].mxu0  ;;  %v2787_v46 = vpop.f32.mrb[9].mxu1 }
 0x2b2   :  { %v384_v48 = vadd.f32 %v383_v45, %v3423_v60  ;;  %v3470_v49 = vpop.f32.mrb[10].mxu0  ;;  %v3472_v53 = vpop.f32.mrb[10].mxu1 }
 0x2b3   :  { %v451_v58 = vmul.f32 0.17677669, %v382_v43  ;;  %v3474_v59 = vpack.c.bf16 %v441_v44, %v436_v42  ;;  %v3476_v61 = vpop.f32.mrb[11].mxu0  ;;  %v2788_v62 = vpop.f32.mrb[11].mxu1 }
 0x2b4   :  { %v3478_v63 = vpack.c.bf16 %v384_v48, %v378_v47 }
 0x2b5   :  { %v3480_v0 = vpack.c.bf16 %v451_v58, %v450_v54 }
 0x2ff   :  { %v2795_v6 = vpop.f32.mrb[12].mxu0 }
 0x300   :  { %v511_v8 = vpop.f32.mrb[13].mxu0  ;;  %v520_v12 = vadd.f32 %v2795_v6, %v3485_v1 }
 0x301   :  { %v512_v9 = vadd.f32 %v3485_v1, %v511_v8  ;;  %v2796_v10 = vpop.f32.mrb[14].mxu0 }
 0x302   :  { %v514_v11 = vpop.f32.mrb[15].mxu0  ;;  %v532_v21 = vsel %vm525_vm3, %v520_v12, -inf }
 0x303   :  { %v515_v13 = vadd.f32 %v3485_v1, %v514_v11  ;;  %v526_v14 = vsel %vm525_vm3, %v512_v9, -inf }
 0x304   :  { %527 = vmax.xlane.f32.xlu0 %v526_v14 }
 0x305   :  { %v529_v17 = vsel %vm525_vm3, %v515_v13, -inf }
 0x306   :  { %530 = vmax.xlane.f32.xlu1 %v529_v17 }
 0x308   :  { %533 = vmax.xlane.f32.xlu0 %v532_v21 }
 0x391   :  { %v528_v22 = vpop.xlane.xlu0 %527 }
 0x392   :  { %v535_v25 = vsub.f32 %v512_v9, %v528_v22 }
 0x393   :  { %v531_v26 = vpop.xlane.xlu1 %530 }
 0x394   :  { %v538_v28 = vmul.f32 1.442695, %v535_v25  ;;  %v536_v15 = vsub.f32 %v515_v13, %v531_v26 }
 0x395   :  { %v534_v30 = vpop.xlane.xlu0 %533 }
 0x396   :  { %3067 = vpow2.f32 %v538_v28  ;;  %v540_v31 = vmul.f32 1.442695, %v536_v15  ;;  %v537_v32 = vsub.f32 %v520_v12, %v534_v30 }
 0x398   :  { %3069 = vpow2.f32 %v540_v31  ;;  %v542_v33 = vmul.f32 1.442695, %v537_v32 }
 0x39a   :  { %3071 = vpow2.f32 %v542_v33 }
 0x3a0   :  { %v3068_v34 = vpop.eup %3067 }
 0x3a1   :  { %v544_v35 = vsel %vm525_vm3, %v3068_v34, 0.0 }
 0x3a2   :  { %v3070_v16 = vpop.eup %3069  ;;  %545 = vadd.xlane.f32.xlu1 %v544_v35 }
 0x3a3   :  { %v547_v24 = vsel %vm525_vm3, %v3070_v16, 0.0 }
 0x3a4   :  { %v3072_v38 = vpop.eup %3071  ;;  %548 = vadd.xlane.f32.xlu0 %v547_v24 }
 0x3a5   :  { %v550_v39 = vsel %vm525_vm3, %v3072_v38, 0.0 }
 0x3a6   :  { %551 = vadd.xlane.f32.xlu1 %v550_v39 }
 0x3b7   :  { %634 = vrot.lane.b32.xlu1 %v3444_v23, %s3191_s22 }
 0x3ba   :  { %632 = vrot.lane.b32.xlu0 %v3433_v19, %s3191_s22 }
 0x3bb   :  { %626 = vrot.lane.b32.xlu1 %v3435_v20, %s3191_s22 }
 0x3bf   :  { %628 = vrot.lane.b32.xlu1 %v3453_v36, %s3191_s22 }
 0x42f   :  { %v546_v40 = vpop.xlane.xlu1 %545 }
 0x430   :  { %3073 = vrcp.f32 %v546_v40 }
 0x431   :  { %v549_v41 = vpop.xlane.xlu0 %548 }
 0x432   :  { %3075 = vrcp.f32 %v549_v41 }
 0x433   :  { %v552_v42 = vpop.xlane.xlu1 %551 }
 0x434   :  { %3077 = vrcp.f32 %v552_v42 }
 0x435   :  { %v633_v43 = vpop.permute.xlu0 %632 }
 0x436   :  { %2948 = vmatprep.subr.msk.bf16.mxu0 %vm464_vm1, %v633_v43  ;;  %v643_v8 = vsel %vm464_vm1, %v633_v43, 0 }
 0x437   :  { %v635_v46 = vpop.permute.xlu1 %634 }
 0x438   :  { %v646_v10 = vsel %vm464_vm1, %v635_v46, 0 }
 0x43a   :  { %v3074_v44 = vpop.eup %3073 }
 0x43b   :  { %v556_v47 = vmul.f32 %v3074_v44, %v3068_v34  ;;  %v627_v9 = vpop.permute.xlu1 %626 }
 0x43c   :  { %v3076_v45 = vpop.eup %3075 }
 0x43d   :  { %v557_v48 = vmul.f32 %v3076_v45, %v3070_v16 }
 0x43e   :  { %v3078_v54 = vpop.eup %3077 }
 0x43f   :  { %v559_v58 = vpack.c.bf16 %v557_v48, %v556_v47  ;;  %v558_v62 = vmul.f32 %v3078_v54, %v3072_v38  ;;  %v629_v11 = vpop.permute.xlu1 %628 }
 0x441   :  { %2801 = vmatprep.mubr.msk.bf16.mxu0 %vm525_vm3, %v559_v58  ;;  %v560_v6 = vpack.c.bf16 %v558_v62, %v558_v62 }
 0x443   :  { %2802 = vmatmul.mubr.msk.bf16.vlgmr.msra.gmra.mrb[16].mxu0 %vm525_vm3, %v560_v6 }
 0x444   :  { %2806 = vmatpush3.bf16.xpose.msra.mxu0 %v643_v8  ;;  %2809 = vmatprep.mubr.msk.bf16.mxu0 %vm464_vm1, %v627_v9 }
 0x445   :  { %2949 = vmatprep.subr.msk.bf16.mxu0 %vm464_vm1, %v635_v46 }
 0x44c   :  { %2808 = vmatpush3.bf16.xpose.msra.mxu0 %v646_v10 }
 0x453   :  { %2810 = vmatmul.mubr.msk.bf16.vlgmr.msra.gmra.mrb[20].mxu0 %vm464_vm1, %v629_v11 }
 0x516   :  { %v2803_v12 = vpop.f32.mrb[16].mxu0 }
 0x517   :  { %623 = vst.msk [vmem:[#allocation2 + $0x10] sm:$0xff] %vm464_vm1, %v2803_v12  ;;  %v607_v13 = vpop.f32.mrb[17].mxu0 }
 0x518   :  { %621 = vst.msk [vmem:[#allocation2] sm:$0xff] %vm464_vm1, %v607_v13  ;;  %v2804_v14 = vpop.f32.mrb[18].mxu0 }
 0x519   :  { %v610_v17 = vpop.f32.mrb[19].mxu0 }
 0x51a   :  { %622 = vst.msk [vmem:[#allocation2 + $0x8] sm:$0xff] %vm464_vm1, %v610_v17 }
 0x526   :  { %v2811_v21 = vpop.f32.mrb[20].mxu0 }
 0x527   :  { %v682_v22 = vpop.f32.mrb[21].mxu0  ;;  %v691_v15 = vadd.f32 %v2811_v21, %v3485_v1 }
 0x528   :  { %v683_v25 = vadd.f32 %v3485_v1, %v682_v22  ;;  %v2812_v26 = vpop.f32.mrb[22].mxu0 }
 0x529   :  { %v685_v28 = vpop.f32.mrb[23].mxu0  ;;  %v702_v33 = vsel %vm525_vm3, %v691_v15, -inf }
 0x52a   :  { %v686_v30 = vadd.f32 %v3485_v1, %v685_v28  ;;  %v696_v31 = vsel %vm525_vm3, %v683_v25, -inf }
 0x52b   :  { %697 = vmax.xlane.f32.xlu0 %v696_v31 }
 0x52c   :  { %v699_v32 = vsel %vm525_vm3, %v686_v30, -inf }
 0x52d   :  { %700 = vmax.xlane.f32.xlu1 %v699_v32 }
 0x52f   :  { %703 = vmax.xlane.f32.xlu0 %v702_v33 }
 0x5b8   :  { %v698_v34 = vpop.xlane.xlu0 %697 }
 0x5b9   :  { %v705_v35 = vsub.f32 %v683_v25, %v698_v34 }
 0x5ba   :  { %v701_v16 = vpop.xlane.xlu1 %700 }
 0x5bb   :  { %v708_v24 = vmul.f32 1.442695, %v705_v35  ;;  %v706_v38 = vsub.f32 %v686_v30, %v701_v16 }
 0x5bc   :  { %v704_v39 = vpop.xlane.xlu0 %703 }
 0x5bd   :  { %3079 = vpow2.f32 %v708_v24  ;;  %v710_v40 = vmul.f32 1.442695, %v706_v38  ;;  %v707_v41 = vsub.f32 %v691_v15, %v704_v39 }
 0x5bf   :  { %3081 = vpow2.f32 %v710_v40  ;;  %v712_v42 = vmul.f32 1.442695, %v707_v41 }
 0x5c1   :  { %3083 = vpow2.f32 %v712_v42 }
 0x5c7   :  { %v3080_v43 = vpop.eup %3079 }
 0x5c8   :  { %v714_v44 = vsel %vm525_vm3, %v3080_v43, 0.0 }
 0x5c9   :  { %v3082_v45 = vpop.eup %3081  ;;  %715 = vadd.xlane.f32.xlu0 %v714_v44 }
 0x5ca   :  { %v717_v47 = vsel %vm525_vm3, %v3082_v45, 0.0 }
 0x5cb   :  { %v3084_v46 = vpop.eup %3083 }
 0x5cc   :  { %v720_v48 = vsel %vm525_vm3, %v3084_v46, 0.0 }
 0x5cd   :  { %718 = vadd.xlane.f32.xlu0 %v717_v47  ;;  %721 = vadd.xlane.f32.xlu1 %v720_v48 }
 0x5de   :  { %735 = vrot.lane.b32.xlu1 %v3455_v37, %s3191_s22 }
 0x5e2   :  { %815 = vrot.lane.b32.xlu1 %v3433_v19, %s3192_s23 }
 0x5e3   :  { %733 = vrot.lane.b32.xlu0 %v3431_v18, %s3191_s22 }
 0x5e6   :  { %817 = vrot.lane.b32.xlu1 %v3444_v23, %s3192_s23 }
 0x5e7   :  { %811 = vrot.lane.b32.xlu0 %v3435_v20, %s3192_s23 }
 0x5ea   :  { %813 = vrot.lane.b32.xlu1 %v3453_v36, %s3192_s23 }
 0x656   :  { %v716_v54 = vpop.xlane.xlu0 %715 }
 0x657   :  { %3085 = vrcp.f32 %v716_v54 }
 0x65a   :  { %v722_v58 = vpop.xlane.xlu1 %721  ;;  %v719_v62 = vpop.xlane.xlu0 %718 }
 0x65b   :  { %3087 = vrcp.f32 %v722_v58 }
 0x65c   :  { %3089 = vrcp.f32 %v719_v62 }
 0x65e   :  { %v736_v6 = vpop.permute.xlu1 %735  ;;  %v734_v8 = vpop.permute.xlu0 %733 }
 0x65f   :  { %2813 = vmatprep.subr.bf16.mxu1 %v734_v8  ;;  %v745_v9 = vsel %vm569_vm2, %v736_v6, 0 }
 0x660   :  { %2814 = vmatpush3.bf16.msra.mxu1 %v734_v8 }
 0x661   :  { %2950 = vmatprep.subr.msk.bf16.mxu1 %vm569_vm2, %v736_v6  ;;  %v3086_v10 = vpop.eup %3085 }
 0x662   :  { %v816_v11 = vpop.permute.xlu1 %815  ;;  %v726_v17 = vmul.f32 %v3086_v10, %v3080_v43  ;;  %v812_v28 = vpop.permute.xlu0 %811 }
 0x663   :  { %v826_v26 = vsel %vm464_vm1, %v816_v11, 0 }
 0x664   :  { %2816 = vmatpush3.bf16.msra.mxu1 %v745_v9 }
 0x665   :  { %v3088_v12 = vpop.eup %3087  ;;  %2951 = vmatprep.subr.msk.bf16.mxu1 %vm464_vm1, %v816_v11 }
 0x666   :  { %v3090_v13 = vpop.eup %3089  ;;  %v728_v14 = vmul.f32 %v3088_v12, %v3084_v46  ;;  %v818_v15 = vpop.permute.xlu1 %817 }
 0x667   :  { %v727_v21 = vmul.f32 %v3090_v13, %v3082_v45  ;;  %v829_v30 = vsel %vm464_vm1, %v818_v15, 0 }
 0x668   :  { %v730_v22 = vpack.c.bf16 %v728_v14, %v728_v14 }
 0x669   :  { %v729_v25 = vpack.c.bf16 %v727_v21, %v726_v17 }
 0x66a   :  { %v814_v31 = vpop.permute.xlu1 %813 }
 0x66b   :  { %2817 = vmatprep.mubr.msk.bf16.mxu1 %vm525_vm3, %v729_v25 }
 0x66c   :  { %2818 = vmatmul.mubr.msk.bf16.vlgmr.msra.gmra.mrb[12].mxu1 %vm525_vm3, %v730_v22 }
 0x66d   :  { %2825 = vmatprep.mubr.msk.bf16.mxu1 %vm464_vm1, %v812_v28  ;;  %2822 = vmatpush3.bf16.xpose.msra.mxu1 %v826_v26 }
 0x66e   :  { %2952 = vmatprep.subr.msk.bf16.mxu1 %vm464_vm1, %v818_v15 }
 0x675   :  { %2824 = vmatpush3.bf16.xpose.msra.mxu1 %v829_v30 }
 0x67c   :  { %2826 = vmatmul.mubr.msk.bf16.vlgmr.msra.gmra.mrb[16].mxu1 %vm464_vm1, %v814_v31 }
 0x73f   :  { %v3546_v32 = vpop.f32.mrb[12].mxu1 }
 0x740   :  { %v3548_v33 = vpop.f32.mrb[13].mxu1 }
 0x741   :  { %v2820_v34 = vpop.f32.mrb[14].mxu1 }
 0x742   :  { %v3550_v35 = vpop.f32.mrb[15].mxu1 }
 0x74f   :  { %v2827_v16 = vpop.f32.mrb[16].mxu1 }
 0x750   :  { %v865_v24 = vpop.f32.mrb[17].mxu1  ;;  %v874_v41 = vadd.f32 %v2827_v16, %v3485_v1 }
 0x751   :  { %v866_v38 = vadd.f32 %v3485_v1, %v865_v24  ;;  %v2828_v39 = vpop.f32.mrb[18].mxu1 }
 0x752   :  { %v868_v40 = vpop.f32.mrb[19].mxu1  ;;  %v885_v45 = vsel %vm525_vm3, %v874_v41, -inf }
 0x753   :  { %v869_v42 = vadd.f32 %v3485_v1, %v868_v40  ;;  %v879_v43 = vsel %vm525_vm3, %v866_v38, -inf }
 0x754   :  { %880 = vmax.xlane.f32.xlu0 %v879_v43 }
 0x755   :  { %v882_v44 = vsel %vm525_vm3, %v869_v42, -inf }
 0x756   :  { %883 = vmax.xlane.f32.xlu1 %v882_v44 }
 0x758   :  { %886 = vmax.xlane.f32.xlu0 %v885_v45 }
 0x7e1   :  { %v881_v46 = vpop.xlane.xlu0 %880 }
 0x7e2   :  { %v888_v47 = vsub.f32 %v866_v38, %v881_v46 }
 0x7e3   :  { %v884_v48 = vpop.xlane.xlu1 %883 }
 0x7e4   :  { %v891_v54 = vmul.f32 1.442695, %v888_v47  ;;  %v889_v58 = vsub.f32 %v869_v42, %v884_v48  ;;  %v444_v42 = vadd.f32 %v3472_v53, %v3419_v57 }
 0x7e5   :  { %v887_v62 = vpop.xlane.xlu0 %886 }
 0x7e6   :  { %3091 = vpow2.f32 %v891_v54  ;;  %v893_v6 = vmul.f32 1.442695, %v889_v58  ;;  %v890_v8 = vsub.f32 %v874_v41, %v887_v62  ;;  %v3585_v44 = vpack.c.bf16 %v444_v42, %v444_v42 }
 0x7e8   :  { %3093 = vpow2.f32 %v893_v6  ;;  %v895_v9 = vmul.f32 1.442695, %v890_v8  ;;  %v1281_v45 = vsel %vm569_vm2, %v3585_v44, 0 }
 0x7ea   :  { %3095 = vpow2.f32 %v895_v9 }
 0x7f0   :  { %v3092_v10 = vpop.eup %3091 }
 0x7f1   :  { %v897_v11 = vsel %vm525_vm3, %v3092_v10, 0.0 }
 0x7f2   :  { %v3094_v12 = vpop.eup %3093  ;;  %898 = vadd.xlane.f32.xlu0 %v897_v11 }
 0x7f3   :  { %v900_v14 = vsel %vm525_vm3, %v3094_v12, 0.0 }
 0x7f4   :  { %v3096_v13 = vpop.eup %3095 }
 0x7f5   :  { %v903_v17 = vsel %vm525_vm3, %v3096_v13, 0.0 }
 0x7f6   :  { %901 = vadd.xlane.f32.xlu0 %v900_v14  ;;  %904 = vadd.xlane.f32.xlu1 %v903_v17 }
 0x807   :  { %916 = vrot.lane.b32.xlu1 %v3455_v37, %s3192_s23 }
 0x80b   :  { %996 = vrot.lane.b32.xlu1 %v3433_v19, %s3193_s24 }
 0x80c   :  { %914 = vrot.lane.b32.xlu0 %v3431_v18, %s3192_s23 }
 0x80f   :  { %998 = vrot.lane.b32.xlu1 %v3444_v23, %s3193_s24 }
 0x810   :  { %992 = vrot.lane.b32.xlu0 %v3435_v20, %s3193_s24 }
 0x813   :  { %994 = vrot.lane.b32.xlu1 %v3453_v36, %s3193_s24 }
 0x87f   :  { %v899_v21 = vpop.xlane.xlu0 %898 }
 0x880   :  { %3097 = vrcp.f32 %v899_v21 }
 0x883   :  { %v905_v22 = vpop.xlane.xlu1 %904  ;;  %v902_v25 = vpop.xlane.xlu0 %901 }
 0x884   :  { %3099 = vrcp.f32 %v905_v22 }
 0x885   :  { %3101 = vrcp.f32 %v902_v25 }
 0x887   :  { %v917_v26 = vpop.permute.xlu1 %916  ;;  %v915_v19 = vpop.permute.xlu0 %914 }
 0x888   :  { %2829 = vmatprep.subr.bf16.mxu0 %v915_v19  ;;  %v926_v23 = vsel %vm569_vm2, %v917_v26, 0 }
 0x889   :  { %2830 = vmatpush3.bf16.msra.mxu0 %v915_v19 }
 0x88a   :  { %2953 = vmatprep.subr.msk.bf16.mxu0 %vm569_vm2, %v917_v26  ;;  %v3098_v28 = vpop.eup %3097 }
 0x88b   :  { %v997_v15 = vpop.permute.xlu1 %996  ;;  %v909_v31 = vmul.f32 %v3098_v28, %v3092_v10  ;;  %v993_v39 = vpop.permute.xlu0 %992 }
 0x88c   :  { %v1007_v38 = vsel %vm464_vm1, %v997_v15, 0 }
 0x88d   :  { %2832 = vmatpush3.bf16.msra.mxu0 %v926_v23 }
 0x88e   :  { %v3100_v20 = vpop.eup %3099  ;;  %2954 = vmatprep.subr.msk.bf16.mxu0 %vm464_vm1, %v997_v15 }
 0x88f   :  { %v3102_v36 = vpop.eup %3101  ;;  %v911_v30 = vmul.f32 %v3100_v20, %v3096_v13  ;;  %v999_v40 = vpop.permute.xlu1 %998 }
 0x890   :  { %v910_v34 = vmul.f32 %v3102_v36, %v3094_v12  ;;  %v1010_v41 = vsel %vm464_vm1, %v999_v40, 0 }
 0x891   :  { %v913_v16 = vpack.c.bf16 %v911_v30, %v911_v30 }
 0x892   :  { %v912_v24 = vpack.c.bf16 %v910_v34, %v909_v31 }
 0x893   :  { %v995_v43 = vpop.permute.xlu1 %994 }
 0x894   :  { %2833 = vmatprep.mubr.msk.bf16.mxu0 %vm525_vm3, %v912_v24 }
 0x895   :  { %2834 = vmatmul.mubr.msk.bf16.vlgmr.msra.gmra.mrb[24].mxu0 %vm525_vm3, %v913_v16 }
 0x896   :  { %2841 = vmatprep.mubr.msk.bf16.mxu0 %vm464_vm1, %v993_v39  ;;  %2838 = vmatpush3.bf16.xpose.msra.mxu0 %v1007_v38 }
 0x897   :  { %2955 = vmatprep.subr.msk.bf16.mxu0 %vm464_vm1, %v999_v40 }
 0x89e   :  { %2840 = vmatpush3.bf16.xpose.msra.mxu0 %v1010_v41 }
 0x89f   :  { %2861 = vmatprep.subr.bf16.mxu0 %v3474_v59 }
 0x8a5   :  { %2842 = vmatmul.mubr.msk.bf16.vlgmr.msra.gmra.mrb[28].mxu0 %vm464_vm1, %v995_v43 }
 0x8a6   :  { %2862 = vmatpush3.bf16.msra.mxu0 %v3474_v59 }
 0x8a7   :  { %2959 = vmatprep.subr.msk.bf16.mxu0 %vm569_vm2, %v3585_v44 }
 0x8aa   :  { %2864 = vmatpush3.bf16.msra.mxu0 %v1281_v45 }
 0x968   :  { %v3593_v46 = vpop.f32.mrb[24].mxu0 }
 0x969   :  { %v3595_v47 = vpop.f32.mrb[25].mxu0 }
 0x96a   :  { %v2836_v48 = vpop.f32.mrb[26].mxu0 }
 0x96b   :  { %v3597_v57 = vpop.f32.mrb[27].mxu0  ;;  %v388_v48 = vadd.f32 %v3476_v61, %v3423_v60  ;;  %v386_v60 = vadd.f32 %v3470_v49, %v3417_v56 }
 0x978   :  { %v2843_v53 = vpop.f32.mrb[28].mxu0 }
 0x979   :  { %v1046_v54 = vpop.f32.mrb[29].mxu0  ;;  %v1055_v8 = vadd.f32 %v2843_v53, %v3485_v1 }
 0x97a   :  { %v1047_v58 = vadd.f32 %v3485_v1, %v1046_v54  ;;  %v2844_v62 = vpop.f32.mrb[30].mxu0 }
 0x97b   :  { %v1049_v6 = vpop.f32.mrb[31].mxu0  ;;  %v1066_v12 = vsel %vm525_vm3, %v1055_v8, -inf  ;;  %v1184_v62 = vsel %vm464_vm1, %v3478_v63, 0 }
 0x97c   :  { %v1050_v9 = vadd.f32 %v3485_v1, %v1049_v6  ;;  %v1060_v10 = vsel %vm525_vm3, %v1047_v58, -inf  ;;  %v452_v6 = vmul.f32 0.17677669, %v386_v60 }
 0x97d   :  { %1061 = vmax.xlane.f32.xlu0 %v1060_v10 }
 0x97e   :  { %v1063_v11 = vsel %vm525_vm3, %v1050_v9, -inf }
 0x97f   :  { %1064 = vmax.xlane.f32.xlu1 %v1063_v11 }
 0x981   :  { %1067 = vmax.xlane.f32.xlu0 %v1066_v12 }
 0xa0a   :  { %v1062_v13 = vpop.xlane.xlu0 %1061 }
 0xa0b   :  { %v1069_v14 = vsub.f32 %v1047_v58, %v1062_v13  ;;  %v3619_v58 = vpack.c.bf16 %v388_v48, %v388_v48 }
 0xa0c   :  { %v1065_v17 = vpop.xlane.xlu1 %1064 }
 0xa0d   :  { %v1072_v21 = vmul.f32 1.442695, %v1069_v14  ;;  %v1070_v22 = vsub.f32 %v1050_v9, %v1065_v17  ;;  %v1187_v61 = vsel %vm464_vm1, %v3619_v58, 0 }
 0xa0e   :  { %v1068_v25 = vpop.xlane.xlu0 %1067 }
 0xa0f   :  { %3103 = vpow2.f32 %v1072_v21  ;;  %v1074_v26 = vmul.f32 1.442695, %v1070_v22  ;;  %v1071_v19 = vsub.f32 %v1055_v8, %v1068_v25  ;;  %v3632_v8 = vpack.c.bf16 %v452_v6, %v452_v6 }
 0xa11   :  { %3105 = vpow2.f32 %v1074_v26  ;;  %v1076_v23 = vmul.f32 1.442695, %v1071_v19 }
 0xa13   :  { %3107 = vpow2.f32 %v1076_v23 }
 0xa19   :  { %v3104_v28 = vpop.eup %3103 }
 0xa1a   :  { %v1078_v15 = vsel %vm525_vm3, %v3104_v28, 0.0 }
 0xa1b   :  { %v3106_v20 = vpop.eup %3105  ;;  %1079 = vadd.xlane.f32.xlu0 %v1078_v15 }
 0xa1c   :  { %v1081_v30 = vsel %vm525_vm3, %v3106_v20, 0.0 }
 0xa1d   :  { %v3108_v36 = vpop.eup %3107 }
 0xa1e   :  { %v1084_v31 = vsel %vm525_vm3, %v3108_v36, 0.0 }
 0xa1f   :  { %1082 = vadd.xlane.f32.xlu0 %v1081_v30  ;;  %1085 = vadd.xlane.f32.xlu1 %v1084_v31 }
 0xa30   :  { %1097 = vrot.lane.b32.xlu1 %v3455_v37, %s3193_s24 }
 0xa35   :  { %1095 = vrot.lane.b32.xlu0 %v3431_v18, %s3193_s24 }
 0xaa8   :  { %v1080_v34 = vpop.xlane.xlu0 %1079 }
 0xaa9   :  { %3109 = vrcp.f32 %v1080_v34 }
 0xaac   :  { %v1086_v16 = vpop.xlane.xlu1 %1085  ;;  %v1083_v24 = vpop.xlane.xlu0 %1082 }
 0xaad   :  { %3111 = vrcp.f32 %v1086_v16 }
 0xaae   :  { %3113 = vrcp.f32 %v1083_v24 }
 0xab0   :  { %v1096_v38 = vpop.permute.xlu0 %1095  ;;  %v1098_v39 = vpop.permute.xlu1 %1097 }
 0xab1   :  { %2845 = vmatprep.subr.bf16.mxu1 %v1096_v38  ;;  %v1107_v40 = vsel %vm569_vm2, %v1098_v39, 0 }
 0xab2   :  { %2846 = vmatpush3.bf16.msra.mxu1 %v1096_v38 }
 0xab3   :  { %2956 = vmatprep.subr.msk.bf16.mxu1 %vm569_vm2, %v1098_v39  ;;  %v3110_v41 = vpop.eup %3109 }
 0xab4   :  { %v1090_v43 = vmul.f32 %v3110_v41, %v3104_v28 }
 0xab6   :  { %2848 = vmatpush3.bf16.msra.mxu1 %v1107_v40 }
 0xab7   :  { %v3112_v37 = vpop.eup %3111  ;;  %2957 = vmatprep.subr.msk.bf16.mxu1 %vm464_vm1, %v3478_v63 }
 0xab8   :  { %v3114_v18 = vpop.eup %3113  ;;  %v1092_v42 = vmul.f32 %v3112_v37, %v3108_v36 }
 0xab9   :  { %v1091_v45 = vmul.f32 %v3114_v18, %v3106_v20 }
 0xaba   :  { %v1094_v53 = vpack.c.bf16 %v1092_v42, %v1092_v42 }
 0xabb   :  { %v1093_v54 = vpack.c.bf16 %v1091_v45, %v1090_v43 }
 0xabd   :  { %2849 = vmatprep.mubr.msk.bf16.mxu1 %vm525_vm3, %v1093_v54 }
 0xabe   :  { %2850 = vmatmul.mubr.msk.bf16.vlgmr.msra.gmra.mrb[20].mxu1 %vm525_vm3, %v1094_v53 }
 0xabf   :  { %2857 = vmatprep.mubr.msk.bf16.mxu1 %vm464_vm1, %v3480_v0  ;;  %2854 = vmatpush3.bf16.xpose.msra.mxu1 %v1184_v62 }
 0xac0   :  { %2958 = vmatprep.subr.msk.bf16.mxu1 %vm464_vm1, %v3619_v58 }
 0xac7   :  { %2856 = vmatpush3.bf16.xpose.msra.mxu1 %v1187_v61 }
 0xace   :  { %2858 = vmatmul.mubr.msk.bf16.vlgmr.msra.gmra.mrb[24].mxu1 %vm464_vm1, %v3632_v8 }
 0xb91   :  { %v3636_v9 = vpop.f32.mrb[20].mxu1 }
 0xb92   :  { %v3638_v10 = vpop.f32.mrb[21].mxu1 }
 0xb93   :  { %v2852_v11 = vpop.f32.mrb[22].mxu1 }
 0xb94   :  { %v3640_v12 = vpop.f32.mrb[23].mxu1 }
 0xba1   :  { %v2859_v13 = vpop.f32.mrb[24].mxu1 }
 0xba2   :  { %v1223_v14 = vpop.f32.mrb[25].mxu1  ;;  %v1232_v25 = vadd.f32 %v2859_v13, %v3485_v1 }
 0xba3   :  { %v1224_v56 = vadd.f32 %v3485_v1, %v1223_v14  ;;  %v2860_v49 = vpop.f32.mrb[26].mxu1 }
 0xba4   :  { %v1226_v17 = vpop.f32.mrb[27].mxu1  ;;  %v1243_v19 = vsel %vm525_vm3, %v1232_v25, -inf }
 0xba5   :  { %v1227_v21 = vadd.f32 %v3485_v1, %v1226_v17  ;;  %v1237_v22 = vsel %vm525_vm3, %v1224_v56, -inf }
 0xba6   :  { %1238 = vmax.xlane.f32.xlu1 %v1237_v22 }
 0xba7   :  { %v1240_v26 = vsel %vm525_vm3, %v1227_v21, -inf }
 0xba8   :  { %1241 = vmax.xlane.f32.xlu0 %v1240_v26 }
 0xbac   :  { %1244 = vmax.xlane.f32.xlu0 %v1243_v19 }
 0xc33   :  { %v1239_v23 = vpop.xlane.xlu1 %1238 }
 0xc34   :  { %v1246_v28 = vsub.f32 %v1224_v56, %v1239_v23 }
 0xc35   :  { %v1242_v15 = vpop.xlane.xlu0 %1241 }
 0xc36   :  { %v1249_v20 = vmul.f32 1.442695, %v1246_v28  ;;  %v1247_v36 = vsub.f32 %v1227_v21, %v1242_v15 }
 0xc38   :  { %3115 = vpow2.f32 %v1249_v20  ;;  %v1251_v30 = vmul.f32 1.442695, %v1247_v36 }
 0xc39   :  { %v1245_v31 = vpop.xlane.xlu0 %1244 }
 0xc3a   :  { %3117 = vpow2.f32 %v1251_v30  ;;  %v1248_v34 = vsub.f32 %v1232_v25, %v1245_v31 }
 0xc3c   :  { %v1253_v16 = vmul.f32 1.442695, %v1248_v34 }
 0xc3e   :  { %3119 = vpow2.f32 %v1253_v16 }
 0xc42   :  { %v3116_v24 = vpop.eup %3115 }
 0xc43   :  { %v1255_v38 = vsel %vm525_vm3, %v3116_v24, 0.0 }
 0xc44   :  { %v3118_v39 = vpop.eup %3117  ;;  %1256 = vadd.xlane.f32.xlu1 %v1255_v38 }
 0xc45   :  { %v1258_v40 = vsel %vm525_vm3, %v3118_v39, 0.0 }
 0xc46   :  { %1259 = vadd.xlane.f32.xlu0 %v1258_v40 }
 0xc48   :  { %v3120_v41 = vpop.eup %3119 }
 0xc49   :  { %v1261_v37 = vsel %vm525_vm3, %v3120_v41, 0.0 }
 0xc4a   :  { %1262 = vadd.xlane.f32.xlu1 %v1261_v37 }
 0xc5b   :  { %1344 = vrot.lane.b32.xlu1 %v3619_v58, %s3191_s22 }
 0xc5c   :  { %1342 = vrot.lane.b32.xlu0 %v3478_v63, %s3191_s22 }
 0xc5f   :  { %1336 = vrot.lane.b32.xlu1 %v3480_v0, %s3191_s22 }
 0xc63   :  { %1338 = vrot.lane.b32.xlu1 %v3632_v8, %s3191_s22 }
 0xcd1   :  { %v1257_v18 = vpop.xlane.xlu1 %1256 }
 0xcd2   :  { %3121 = vrcp.f32 %v1257_v18 }
 0xcd3   :  { %v1260_v42 = vpop.xlane.xlu0 %1259 }
 0xcd4   :  { %3123 = vrcp.f32 %v1260_v42 }
 0xcd7   :  { %v1343_v43 = vpop.permute.xlu0 %1342  ;;  %v1263_v45 = vpop.xlane.xlu1 %1262 }
 0xcd8   :  { %3125 = vrcp.f32 %v1263_v45  ;;  %2960 = vmatprep.subr.msk.bf16.mxu0 %vm464_vm1, %v1343_v43  ;;  %v1353_v14 = vsel %vm464_vm1, %v1343_v43, 0 }
 0xcdb   :  { %v1345_v60 = vpop.permute.xlu1 %1344 }
 0xcdc   :  { %v3122_v48 = vpop.eup %3121  ;;  %v1356_v49 = vsel %vm464_vm1, %v1345_v60, 0 }
 0xcdd   :  { %v1267_v54 = vmul.f32 %v3122_v48, %v3116_v24 }
 0xcde   :  { %v3124_v53 = vpop.eup %3123 }
 0xcdf   :  { %v1268_v62 = vmul.f32 %v3124_v53, %v3118_v39  ;;  %v1337_v56 = vpop.permute.xlu1 %1336 }
 0xce1   :  { %v1270_v61 = vpack.c.bf16 %v1268_v62, %v1267_v54 }
 0xce2   :  { %v3126_v6 = vpop.eup %3125 }
 0xce3   :  { %v1269_v11 = vmul.f32 %v3126_v6, %v3120_v41  ;;  %2865 = vmatprep.mubr.msk.bf16.mxu0 %vm525_vm3, %v1270_v61  ;;  %v1339_v17 = vpop.permute.xlu1 %1338 }
 0xce5   :  { %v1271_v13 = vpack.c.bf16 %v1269_v11, %v1269_v11 }
 0xce7   :  { %2866 = vmatmul.mubr.msk.bf16.vlgmr.msra.gmra.mrb[32].mxu0 %vm525_vm3, %v1271_v13 }
 0xce8   :  { %2870 = vmatpush3.bf16.xpose.msra.mxu0 %v1353_v14  ;;  %2873 = vmatprep.mubr.msk.bf16.mxu0 %vm464_vm1, %v1337_v56 }
 0xce9   :  { %2961 = vmatprep.subr.msk.bf16.mxu0 %vm464_vm1, %v1345_v60 }
 0xcf0   :  { %2872 = vmatpush3.bf16.xpose.msra.mxu0 %v1356_v49 }
 0xcf7   :  { %2874 = vmatmul.mubr.msk.bf16.vlgmr.msra.gmra.mrb[36].mxu0 %vm464_vm1, %v1339_v17 }
 0xdba   :  { %v2867_v21 = vpop.f32.mrb[32].mxu0 }
 0xdbb   :  { %1333 = vst.msk [vmem:[#allocation2 + $0x28] sm:$0xff] %vm464_vm1, %v2867_v21  ;;  %v1317_v22 = vpop.f32.mrb[33].mxu0 }
 0xdbc   :  { %1331 = vst.msk [vmem:[#allocation2 + $0x18] sm:$0xff] %vm464_vm1, %v1317_v22  ;;  %v2868_v25 = vpop.f32.mrb[34].mxu0 }
 0xdbd   :  { %v1320_v26 = vpop.f32.mrb[35].mxu0 }
 0xdbe   :  { %1332 = vst.msk [vmem:[#allocation2 + $0x20] sm:$0xff] %vm464_vm1, %v1320_v26 }
 0xdca   :  { %v2875_v19 = vpop.f32.mrb[36].mxu0 }
 0xdcb   :  { %v1392_v23 = vpop.f32.mrb[37].mxu0  ;;  %v1401_v36 = vadd.f32 %v2875_v19, %v3485_v1 }
 0xdcc   :  { %v1393_v28 = vadd.f32 %v3485_v1, %v1392_v23  ;;  %v2876_v15 = vpop.f32.mrb[38].mxu0 }
 0xdcd   :  { %v1395_v20 = vpop.f32.mrb[39].mxu0  ;;  %v1412_v16 = vsel %vm525_vm3, %v1401_v36, -inf }
 0xdce   :  { %v1396_v30 = vadd.f32 %v3485_v1, %v1395_v20  ;;  %v1406_v31 = vsel %vm525_vm3, %v1393_v28, -inf }
 0xdcf   :  { %1407 = vmax.xlane.f32.xlu0 %v1406_v31 }
 0xdd0   :  { %v1409_v34 = vsel %vm525_vm3, %v1396_v30, -inf }
 0xdd1   :  { %1410 = vmax.xlane.f32.xlu1 %v1409_v34 }
 0xdd3   :  { %1413 = vmax.xlane.f32.xlu0 %v1412_v16 }
 0xe5c   :  { %v1408_v24 = vpop.xlane.xlu0 %1407 }
 0xe5d   :  { %v1415_v38 = vsub.f32 %v1393_v28, %v1408_v24 }
 0xe5e   :  { %v1411_v39 = vpop.xlane.xlu1 %1410 }
 0xe5f   :  { %v1418_v40 = vmul.f32 1.442695, %v1415_v38  ;;  %v1416_v41 = vsub.f32 %v1396_v30, %v1411_v39 }
 0xe60   :  { %v1414_v37 = vpop.xlane.xlu0 %1413 }
 0xe61   :  { %3127 = vpow2.f32 %v1418_v40  ;;  %v1420_v18 = vmul.f32 1.442695, %v1416_v41  ;;  %v1417_v42 = vsub.f32 %v1401_v36, %v1414_v37 }
 0xe63   :  { %3129 = vpow2.f32 %v1420_v18  ;;  %v1422_v43 = vmul.f32 1.442695, %v1417_v42 }
 0xe65   :  { %3131 = vpow2.f32 %v1422_v43 }
 0xe6b   :  { %v3128_v45 = vpop.eup %3127 }
 0xe6c   :  { %v1424_v48 = vsel %vm525_vm3, %v3128_v45, 0.0 }
 0xe6d   :  { %v3130_v53 = vpop.eup %3129  ;;  %1425 = vadd.xlane.f32.xlu0 %v1424_v48 }
 0xe6e   :  { %v1427_v62 = vsel %vm525_vm3, %v3130_v53, 0.0 }
 0xe6f   :  { %v3132_v54 = vpop.eup %3131 }
 0xe70   :  { %v1430_v60 = vsel %vm525_vm3, %v3132_v54, 0.0 }
 0xe71   :  { %1428 = vadd.xlane.f32.xlu0 %v1427_v62  ;;  %1431 = vadd.xlane.f32.xlu1 %v1430_v60 }
 0xe82   :  { %1445 = vrot.lane.b32.xlu1 %v3585_v44, %s3191_s22 }
 0xe86   :  { %1524 = vrot.lane.b32.xlu1 %v3478_v63, %s3192_s23 }
 0xe87   :  { %1443 = vrot.lane.b32.xlu0 %v3474_v59, %s3191_s22 }
 0xe8a   :  { %1526 = vrot.lane.b32.xlu1 %v3619_v58, %s3192_s23 }
 0xe8b   :  { %1520 = vrot.lane.b32.xlu0 %v3480_v0, %s3192_s23 }
 0xe8e   :  { %1522 = vrot.lane.b32.xlu1 %v3632_v8, %s3192_s23 }
 0xefa   :  { %v1426_v61 = vpop.xlane.xlu0 %1425 }
 0xefb   :  { %3133 = vrcp.f32 %v1426_v61 }
 0xefe   :  { %v1432_v6 = vpop.xlane.xlu1 %1431  ;;  %v1429_v11 = vpop.xlane.xlu0 %1428 }
 0xeff   :  { %3135 = vrcp.f32 %v1432_v6 }
 0xf00   :  { %3137 = vrcp.f32 %v1429_v11 }
 0xf02   :  { %v1446_v13 = vpop.permute.xlu1 %1445  ;;  %v1444_v14 = vpop.permute.xlu0 %1443 }
 0xf03   :  { %2877 = vmatprep.subr.bf16.mxu1 %v1444_v14  ;;  %v1455_v56 = vsel %vm569_vm2, %v1446_v13, 0 }
 0xf04   :  { %2878 = vmatpush3.bf16.msra.mxu1 %v1444_v14 }
 0xf05   :  { %2962 = vmatprep.subr.msk.bf16.mxu1 %vm569_vm2, %v1446_v13  ;;  %v3134_v49 = vpop.eup %3133 }
 0xf06   :  { %v1525_v17 = vpop.permute.xlu1 %1524  ;;  %v1436_v26 = vmul.f32 %v3134_v49, %v3128_v45  ;;  %v1521_v20 = vpop.permute.xlu0 %1520 }
 0xf07   :  { %v1535_v15 = vsel %vm464_vm1, %v1525_v17, 0 }
 0xf08   :  { %2880 = vmatpush3.bf16.msra.mxu1 %v1455_v56 }
 0xf09   :  { %v3136_v21 = vpop.eup %3135  ;;  %2963 = vmatprep.subr.msk.bf16.mxu1 %vm464_vm1, %v1525_v17 }
 0xf0a   :  { %v3138_v22 = vpop.eup %3137  ;;  %v1438_v25 = vmul.f32 %v3136_v21, %v3132_v54  ;;  %v1527_v36 = vpop.permute.xlu1 %1526 }
 0xf0b   :  { %v1437_v19 = vmul.f32 %v3138_v22, %v3130_v53  ;;  %v1538_v30 = vsel %vm464_vm1, %v1527_v36, 0 }
 0xf0c   :  { %v1440_v23 = vpack.c.bf16 %v1438_v25, %v1438_v25 }
 0xf0d   :  { %v1439_v28 = vpack.c.bf16 %v1437_v19, %v1436_v26 }
 0xf0e   :  { %v1523_v31 = vpop.permute.xlu1 %1522 }
 0xf0f   :  { %2881 = vmatprep.mubr.msk.bf16.mxu1 %vm525_vm3, %v1439_v28 }
 0xf10   :  { %2882 = vmatmul.mubr.msk.bf16.vlgmr.msra.gmra.mrb[28].mxu1 %vm525_vm3, %v1440_v23 }
 0xf11   :  { %2889 = vmatprep.mubr.msk.bf16.mxu1 %vm464_vm1, %v1521_v20  ;;  %2886 = vmatpush3.bf16.xpose.msra.mxu1 %v1535_v15 }
 0xf12   :  { %2964 = vmatprep.subr.msk.bf16.mxu1 %vm464_vm1, %v1527_v36 }
 0xf19   :  { %2888 = vmatpush3.bf16.xpose.msra.mxu1 %v1538_v30 }
 0xf20   :  { %2890 = vmatmul.mubr.msk.bf16.vlgmr.msra.gmra.mrb[32].mxu1 %vm464_vm1, %v1523_v31 }
 0xfe3   :  { %v3701_v34 = vpop.f32.mrb[28].mxu1 }
 0xfe4   :  { %v3703_v16 = vpop.f32.mrb[29].mxu1 }
 0xfe5   :  { %v2884_v24 = vpop.f32.mrb[30].mxu1 }
 0xfe6   :  { %v3705_v38 = vpop.f32.mrb[31].mxu1 }
 0xff3   :  { %v2891_v39 = vpop.f32.mrb[32].mxu1 }
 0xff4   :  { %v1574_v40 = vpop.f32.mrb[33].mxu1  ;;  %v1583_v42 = vadd.f32 %v2891_v39, %v3485_v1 }
 0xff5   :  { %v1575_v41 = vadd.f32 %v3485_v1, %v1574_v40  ;;  %v2892_v37 = vpop.f32.mrb[34].mxu1 }
 0xff6   :  { %v1577_v18 = vpop.f32.mrb[35].mxu1  ;;  %v1594_v53 = vsel %vm525_vm3, %v1583_v42, -inf }
 0xff7   :  { %v1578_v43 = vadd.f32 %v3485_v1, %v1577_v18  ;;  %v1588_v45 = vsel %vm525_vm3, %v1575_v41, -inf }
 0xff8   :  { %1589 = vmax.xlane.f32.xlu0 %v1588_v45 }
 0xff9   :  { %v1591_v48 = vsel %vm525_vm3, %v1578_v43, -inf }
 0xffa   :  { %1592 = vmax.xlane.f32.xlu1 %v1591_v48 }
 0xffc   :  { %1595 = vmax.xlane.f32.xlu0 %v1594_v53 }
0x1085   :  { %v1590_v54 = vpop.xlane.xlu0 %1589 }
0x1086   :  { %v1597_v62 = vsub.f32 %v1575_v41, %v1590_v54 }
0x1087   :  { %v1593_v60 = vpop.xlane.xlu1 %1592 }
0x1088   :  { %v1600_v61 = vmul.f32 1.442695, %v1597_v62  ;;  %v1598_v6 = vsub.f32 %v1578_v43, %v1593_v60  ;;  %v3187_v60 = vld [vmem:[%s4032_s11] ss:$0 sm:$0xff] }
0x1089   :  { %v1596_v11 = vpop.xlane.xlu0 %1595 }
0x108a   :  { %3139 = vpow2.f32 %v1600_v61  ;;  %v1602_v13 = vmul.f32 1.442695, %v1598_v6  ;;  %v1599_v14 = vsub.f32 %v1583_v42, %v1596_v11 }
0x108c   :  { %3141 = vpow2.f32 %v1602_v13  ;;  %v1604_v1 = vmul.f32 1.442695, %v1599_v14 }
0x108e   :  { %3143 = vpow2.f32 %v1604_v1 }
0x1094   :  { %v3140_v56 = vpop.eup %3139 }
0x1095   :  { %v1606_v49 = vsel %vm525_vm3, %v3140_v56, 0.0 }
0x1096   :  { %v3142_v17 = vpop.eup %3141  ;;  %1607 = vadd.xlane.f32.xlu0 %v1606_v49 }
0x1097   :  { %v1609_v22 = vsel %vm525_vm3, %v3142_v17, 0.0 }
0x1098   :  { %v3144_v21 = vpop.eup %3143 }
0x1099   :  { %v1612_v25 = vsel %vm525_vm3, %v3144_v21, 0.0 }
0x109a   :  { %1610 = vadd.xlane.f32.xlu0 %v1609_v22  ;;  %1613 = vadd.xlane.f32.xlu1 %v1612_v25 }
0x10ab   :  { %1625 = vrot.lane.b32.xlu1 %v3585_v44, %s3192_s23 }
0x10af   :  { %1704 = vrot.lane.b32.xlu1 %v3478_v63, %s3193_s24 }
0x10b0   :  { %1623 = vrot.lane.b32.xlu0 %v3474_v59, %s3192_s23 }
0x10b3   :  { %1706 = vrot.lane.b32.xlu1 %v3619_v58, %s3193_s24 }
0x10b4   :  { %1700 = vrot.lane.b32.xlu0 %v3480_v0, %s3193_s24 }
0x10b7   :  { %1702 = vrot.lane.b32.xlu1 %v3632_v8, %s3193_s24 }
0x1123   :  { %v1608_v26 = vpop.xlane.xlu0 %1607 }
0x1124   :  { %3145 = vrcp.f32 %v1608_v26 }
0x1127   :  { %v1614_v19 = vpop.xlane.xlu1 %1613  ;;  %v1611_v23 = vpop.xlane.xlu0 %1610 }
0x1128   :  { %3147 = vrcp.f32 %v1614_v19 }
0x1129   :  { %3149 = vrcp.f32 %v1611_v23 }
0x112b   :  { %v1626_v28 = vpop.permute.xlu1 %1625  ;;  %v1624_v63 = vpop.permute.xlu0 %1623 }
0x112c   :  { %2893 = vmatprep.subr.bf16.mxu0 %v1624_v63  ;;  %v1635_v58 = vsel %vm569_vm2, %v1626_v28, 0 }
0x112d   :  { %2894 = vmatpush3.bf16.msra.mxu0 %v1624_v63 }
0x112e   :  { %2965 = vmatprep.subr.msk.bf16.mxu0 %vm569_vm2, %v1626_v28  ;;  %v3146_v15 = vpop.eup %3145 }
0x112f   :  { %v1705_v20 = vpop.permute.xlu1 %1704  ;;  %v1618_v30 = vmul.f32 %v3146_v15, %v3140_v56  ;;  %v1701_v41 = vpop.permute.xlu0 %1700 }
0x1130   :  { %v1715_v40 = vsel %vm464_vm1, %v1705_v20, 0 }
0x1131   :  { %2896 = vmatpush3.bf16.msra.mxu0 %v1635_v58 }
0x1132   :  { %v3148_v0 = vpop.eup %3147  ;;  %2966 = vmatprep.subr.msk.bf16.mxu0 %vm464_vm1, %v1705_v20 }
0x1133   :  { %v3150_v8 = vpop.eup %3149  ;;  %v1620_v36 = vmul.f32 %v3148_v0, %v3144_v21  ;;  %v1707_v37 = vpop.permute.xlu1 %1706 }
0x1134   :  { %v1619_v31 = vmul.f32 %v3150_v8, %v3142_v17  ;;  %v1718_v18 = vsel %vm464_vm1, %v1707_v37, 0 }
0x1135   :  { %v1622_v24 = vpack.c.bf16 %v1620_v36, %v1620_v36 }
0x1136   :  { %v1621_v39 = vpack.c.bf16 %v1619_v31, %v1618_v30 }
0x1137   :  { %v1703_v42 = vpop.permute.xlu1 %1702 }
0x1138   :  { %2897 = vmatprep.mubr.msk.bf16.mxu0 %vm525_vm3, %v1621_v39 }
0x1139   :  { %2898 = vmatmul.mubr.msk.bf16.vlgmr.msra.gmra.mrb[40].mxu0 %vm525_vm3, %v1622_v24 }
0x113a   :  { %2905 = vmatprep.mubr.msk.bf16.mxu0 %vm464_vm1, %v1701_v41  ;;  %2902 = vmatpush3.bf16.xpose.msra.mxu0 %v1715_v40  ;;  %v3007_v40 = vld [vmem:[%s4033_s5] sm:$0xff]  }
0x113b   :  { %2967 = vmatprep.subr.msk.bf16.mxu0 %vm464_vm1, %v1707_v37 }
0x1142   :  { %2904 = vmatpush3.bf16.xpose.msra.mxu0 %v1718_v18  ;;  %v3008_v18 = vld [vmem:[%s4033_s5 + $0x8] sm:$0xff]  }
0x1149   :  { %2906 = vmatmul.mubr.msk.bf16.vlgmr.msra.gmra.mrb[44].mxu0 %vm464_vm1, %v1703_v42 }
0x114a   :  { %2166 = vmatprep.mubr.bf16.mxu0 %v3189_v50 }
0x120c   :  { %v3739_v43 = vpop.f32.mrb[40].mxu0 }
0x120d   :  { %v1671_v45 = vpop.f32.mrb[41].mxu0 }
0x120e   :  { %v2900_v48 = vpop.f32.mrb[42].mxu0 }
0x120f   :  { %v1674_v53 = vpop.f32.mrb[43].mxu0  ;;  %v3009_v48 = vld [vmem:[%s4033_s5 + $0x10] sm:$0xff]  }
0x121c   :  { %v2907_v54 = vpop.f32.mrb[44].mxu0 }
0x121d   :  { %v1754_v62 = vpop.f32.mrb[45].mxu0  ;;  %v1763_v13 = vadd.f32 %v3187_v60, %v2907_v54 }
0x121e   :  { %v1755_v61 = vadd.f32 %v3187_v60, %v1754_v62  ;;  %v2908_v6 = vpop.f32.mrb[46].mxu0  ;;  %v3010_v62 = vld [vmem:[%s4033_s5 + $0x18] sm:$0xff]  }
0x121f   :  { %v1757_v11 = vpop.f32.mrb[47].mxu0  ;;  %v1774_v49 = vsel %vm525_vm3, %v1763_v13, -inf  ;;  %v3011_v6 = vld [vmem:[%s4033_s5 + $0x20] sm:$0xff]  }
0x1220   :  { %v1758_v14 = vadd.f32 %v3187_v60, %v1757_v11  ;;  %v1768_v1 = vsel %vm525_vm3, %v1755_v61, -inf }
0x1221   :  { %1769 = vmax.xlane.f32.xlu0 %v1768_v1  ;;  %v3013_v1 = vld [vmem:[%s4033_s5 + $0x30] sm:$0xff]  }
0x1222   :  { %v1771_v56 = vsel %vm525_vm3, %v1758_v14, -inf }
0x1223   :  { %1772 = vmax.xlane.f32.xlu1 %v1771_v56  ;;  %v3014_v56 = vld [vmem:[%s4033_s5 + $0x38] sm:$0xff]  }
0x1225   :  { %1775 = vmax.xlane.f32.xlu0 %v1774_v49 }
0x12ae   :  { %v1770_v17 = vpop.xlane.xlu0 %1769 }
0x12af   :  { %v1777_v21 = vsub.f32 %v1755_v61, %v1770_v17 }
0x12b0   :  { %v1773_v22 = vpop.xlane.xlu1 %1772 }
0x12b1   :  { %v1780_v25 = vmul.f32 1.442695, %v1777_v21  ;;  %v1778_v26 = vsub.f32 %v1758_v14, %v1773_v22  ;;  %v3012_v14 = vld [vmem:[%s4033_s5 + $0x28] sm:$0xff]  }
0x12b2   :  { %v1776_v19 = vpop.xlane.xlu0 %1775  ;;  %v3015_v22 = vld [vmem:[%s4034_s7] ss:$8 sps:$4 sm:$0xff]  }
0x12b3   :  { %3151 = vpow2.f32 %v1780_v25  ;;  %v1782_v23 = vmul.f32 1.442695, %v1778_v26  ;;  %v1779_v28 = vsub.f32 %v1763_v13, %v1776_v19  ;;  %v3017_v25 = vld [vmem:[%s4034_s7 + $0x4] ss:$8 sps:$4 sm:$0xff]   ;;  %v3020_v26 = vld [vmem:[%s4034_s7 + $0x14] ss:$8 sps:$4 sm:$0xff]  }
0x12b4   :  { %2134 = vmatprep.subr.bf16.mxu0 %v3017_v25  ;;  %v3018_v19 = vld [vmem:[%s4034_s7 + $0x10] ss:$8 sps:$4 sm:$0xff]  }
0x12b5   :  { %3153 = vpow2.f32 %v1782_v23  ;;  %v1784_v63 = vmul.f32 1.442695, %v1779_v28  ;;  %2135 = vmatpush1.bf16.msra.mxu0 %v3015_v22  ;;  %v3023_v23 = vld [vmem:[%s4034_s7 + $0x24] ss:$8 sps:$4 sm:$0xff]   ;;  %v3021_v28 = vld [vmem:[%s4034_s7 + $0x20] ss:$8 sps:$4 sm:$0xff]  }
0x12b6   :  { %2136 = vmatprep.subr.bf16.mxu0 %v3020_v26  ;;  %v2042_v22 = vld [vmem:[%s4037_s8] sm:$0x3] }
0x12b7   :  { %3155 = vpow2.f32 %v1784_v63  ;;  %v3026_v63 = vld [vmem:[%s4034_s7 + $0x34] ss:$8 sps:$4 sm:$0xff]   ;;  %v3962_v25 = vrot.slane %v2042_v22, %v186_v52  ;;  %v3966_v26 = vrot.slane %v2042_v22, %v190_v55 }
0x12b9   :  { %2137 = vmatpush1.bf16.msra.mxu0 %v3018_v19 }
0x12ba   :  { %2138 = vmatprep.subr.bf16.mxu0 %v3023_v23 }
0x12bd   :  { %v3152_v58 = vpop.eup %3151  ;;  %2139 = vmatpush1.bf16.msra.mxu0 %v3021_v28 }
0x12be   :  { %v1786_v15 = vsel %vm525_vm3, %v3152_v58, 0.0  ;;  %2140 = vmatprep.subr.bf16.mxu0 %v3026_v63 }
0x12bf   :  { %v3154_v20 = vpop.eup %3153  ;;  %1787 = vadd.xlane.f32.xlu0 %v1786_v15  ;;  %v3029_v15 = vld [vmem:[%s4034_s7 + $0x44] ss:$8 sps:$4 sm:$0xff]  }
0x12c0   :  { %v1789_v8 = vsel %vm525_vm3, %v3154_v20, 0.0 }
0x12c1   :  { %v3156_v0 = vpop.eup %3155 }
0x12c2   :  { %v1792_v36 = vsel %vm525_vm3, %v3156_v0, 0.0 }
0x12c3   :  { %1790 = vadd.xlane.f32.xlu0 %v1789_v8  ;;  %1793 = vadd.xlane.f32.xlu1 %v1792_v36  ;;  %v3030_v8 = vld [vmem:[%s4034_s7 + $0x50] ss:$8 sps:$4 sm:$0xff]   ;;  %v3035_v36 = vld [vmem:[%s4034_s7 + $0x64] ss:$8 sps:$4 sm:$0xff]  }
0x12d4   :  { %1805 = vrot.lane.b32.xlu1 %v3585_v44, %s3193_s24 }
0x12d8   :  { %798 = vrot.lane.b32.xlu1 %v3548_v33, %s3193_s24 }
0x12d9   :  { %1803 = vrot.lane.b32.xlu0 %v3474_v59, %s3193_s24 }
0x12dc   :  { %800 = vrot.lane.b32.xlu1 %v3550_v35, %s3193_s24 }
0x12dd   :  { %979 = vrot.lane.b32.xlu0 %v3595_v47, %s3192_s23 }
0x12e0   :  { %981 = vrot.lane.b32.xlu1 %v3597_v57, %s3192_s23 }
0x12e1   :  { %1160 = vrot.lane.b32.xlu0 %v3638_v10, %s3191_s22 }
0x12e4   :  { %1162 = vrot.lane.b32.xlu1 %v3640_v12, %s3191_s22 }
0x12e5   :  { %802 = vrot.lane.b32.xlu0 %v3546_v32, %s3193_s24 }
0x12e8   :  { %1508 = vrot.lane.b32.xlu1 %v3703_v16, %s3193_s24 }
0x12e9   :  { %983 = vrot.lane.b32.xlu0 %v3593_v46, %s3192_s23 }
0x12ec   :  { %1688 = vrot.lane.b32.xlu1 %v1671_v45, %s3192_s23 }
0x12ed   :  { %1164 = vrot.lane.b32.xlu0 %v3636_v9, %s3191_s22 }
0x12f0   :  { %1512 = vrot.lane.b32.xlu1 %v3701_v34, %s3193_s24 }
0x12f1   :  { %1510 = vrot.lane.b32.xlu0 %v3705_v38, %s3193_s24 }
0x12f5   :  { %1690 = vrot.lane.b32.xlu0 %v1674_v53, %s3192_s23 }
0x134c   :  { %v1788_v59 = vpop.xlane.xlu0 %1787 }
0x134d   :  { %3157 = vrcp.f32 %v1788_v59  ;;  %v3033_v59 = vld [vmem:[%s4034_s7 + $0x60] ss:$8 sps:$4 sm:$0xff]  }
0x1350   :  { %v1794_v32 = vpop.xlane.xlu1 %1793  ;;  %v1791_v33 = vpop.xlane.xlu0 %1790 }
0x1351   :  { %3159 = vrcp.f32 %v1794_v32  ;;  %v3038_v32 = vld [vmem:[%s4034_s7 + $0x74] ss:$8 sps:$4 sm:$0xff]  }
0x1352   :  { %3161 = vrcp.f32 %v1791_v33  ;;  %v3036_v33 = vld [vmem:[%s4034_s7 + $0x70] ss:$8 sps:$4 sm:$0xff]  }
0x1354   :  { %v1806_v35 = vpop.permute.xlu1 %1805  ;;  %v1804_v44 = vpop.permute.xlu0 %1803 }
0x1355   :  { %2909 = vmatprep.subr.bf16.mxu1 %v1804_v44  ;;  %v1815_v57 = vsel %vm569_vm2, %v1806_v35, 0 }
0x1356   :  { %2910 = vmatpush3.bf16.msra.mxu1 %v1804_v44 }
0x1357   :  { %2968 = vmatprep.subr.msk.bf16.mxu1 %vm569_vm2, %v1806_v35  ;;  %v3158_v9 = vpop.eup %3157 }
0x1358   :  { %v799_v46 = vpop.permute.xlu1 %798  ;;  %v980_v47 = vpop.permute.xlu0 %979  ;;  %v1798_v30 = vmul.f32 %v3158_v9, %v3152_v58  ;;  %v3024_v58 = vld [vmem:[%s4034_s7 + $0x30] ss:$8 sps:$4 sm:$0xff]   ;;  %v3040_v9 = vld [vmem:[%s4035_s9] sm:$0xff]  }
0x1359   :  { %808 = vst.msk [vmem:[#allocation2] sm:$0xff] %vm807_vm4, %v799_v46  ;;  %2141 = vmatpush1.bf16.msra.mxu0 %v3024_v58 }
0x135a   :  { %989 = vst.msk [vmem:[#allocation2] sm:$0xff] %vm988_vm5, %v980_v47  ;;  %2912 = vmatpush3.bf16.msra.mxu1 %v1815_v57  ;;  %2142 = vmatprep.subr.bf16.mxu0 %v3029_v15  ;;  %v3039_v57 = vld [vmem:[%s4035_s9 + $0x40] sm:$0xff]  }
0x135b   :  { %v3160_v10 = vpop.eup %3159  ;;  %2917 = vmatprep.subr.bf16.mxu1 %v3188_v7 }
0x135c   :  { %v3162_v12 = vpop.eup %3161  ;;  %v1800_v34 = vmul.f32 %v3160_v10, %v3156_v0  ;;  %v801_v16 = vpop.permute.xlu1 %800  ;;  %v3032_v0 = vld [vmem:[%s4034_s7 + $0x54] ss:$8 sps:$4 sm:$0xff]   ;;  %v3041_v10 = vld [vmem:[%s4035_s9 + $0x48] sm:$0xff]  }
0x135d   :  { %v1161_v38 = vpop.permute.xlu0 %1160  ;;  %809 = vst.msk [vmem:[#allocation2 + $0x8] sm:$0xff] %vm807_vm4, %v801_v16  ;;  %v1799_v31 = vmul.f32 %v3162_v12, %v3154_v20  ;;  %v3027_v20 = vld [vmem:[%s4034_s7 + $0x40] ss:$8 sps:$4 sm:$0xff]  }
0x135e   :  { %1170 = vst.msk [vmem:[#allocation2] sm:$0xff] %vm1169_vm6, %v1161_v38  ;;  %v1802_v24 = vpack.c.bf16 %v1800_v34, %v1800_v34  ;;  %2143 = vmatpush1.bf16.msra.mxu0 %v3027_v20  ;;  %v3902_v12 = vld [vmem:[%s4036_s6] ss:$0 sm:$0xff] }
0x135f   :  { %v1801_v39 = vpack.c.bf16 %v1799_v31, %v1798_v30  ;;  %2144 = vmatprep.subr.bf16.mxu0 %v3032_v0 }
0x1360   :  { %v982_v41 = vpop.permute.xlu1 %981 }
0x1361   :  { %v803_v37 = vpop.permute.xlu0 %802  ;;  %990 = vst.msk [vmem:[#allocation2 + $0x8] sm:$0xff] %vm988_vm5, %v982_v41  ;;  %2913 = vmatprep.mubr.msk.bf16.mxu1 %vm525_vm3, %v1801_v39 }
0x1362   :  { %810 = vst.msk [vmem:[#allocation2 + $0x10] sm:$0xff] %vm807_vm4, %v803_v37  ;;  %2914 = vmatmul.mubr.msk.bf16.vlgmr.msra.gmra.mrb[36].mxu1 %vm525_vm3, %v1802_v24  ;;  %2145 = vmatpush1.bf16.msra.mxu0 %v3030_v8 }
0x1363   :  { %2918 = vmatpush3.bf16.msra.mxu1 %v3007_v40  ;;  %2933 = vmatprep.mubr.msk.bf16.mxu1 %vm3190_vm0, %v3188_v7 }
0x1364   :  { %v1163_v42 = vpop.permute.xlu1 %1162  ;;  %2919 = vmatprep.subr.bf16.mxu1 %v3188_v7  ;;  %2146 = vmatprep.subr.bf16.mxu0 %v3035_v36 }
0x1365   :  { %v984_v45 = vpop.permute.xlu0 %983  ;;  %1171 = vst.msk [vmem:[#allocation2 + $0x8] sm:$0xff] %vm1169_vm6, %v1163_v42  ;;  %v1880_v17 = vld [vmem:[#allocation2] sm:$0xff] }
0x1366   :  { %991 = vst.msk [vmem:[#allocation2 + $0x10] sm:$0xff] %vm988_vm5, %v984_v45  ;;  %2147 = vmatpush1.bf16.msra.mxu0 %v3033_v59 }
0x1367   :  { %2920 = vmatpush3.bf16.msra.mxu1 %v3008_v18  ;;  %2148 = vmatprep.subr.bf16.mxu0 %v3038_v32 }
0x1368   :  { %v1509_v53 = vpop.permute.xlu1 %1508  ;;  %2921 = vmatprep.subr.bf16.mxu1 %v3188_v7 }
0x1369   :  { %v1165_v54 = vpop.permute.xlu0 %1164  ;;  %1517 = vst.msk [vmem:[#allocation2 + $0x18] sm:$0xff] %vm807_vm4, %v1509_v53 }
0x136a   :  { %1172 = vst.msk [vmem:[#allocation2 + $0x10] sm:$0xff] %vm1169_vm6, %v1165_v54  ;;  %2149 = vmatpush1.bf16.msra.mxu0 %v3036_v33  ;;  %v3044_v54 = vld [vmem:[%s4035_s9 + $0x10] sm:$0xff]  }
0x136b   :  { %2922 = vmatpush3.bf16.msra.mxu1 %v3009_v48 }
0x136c   :  { %v1689_v60 = vpop.permute.xlu1 %1688  ;;  %2923 = vmatprep.subr.bf16.mxu1 %v3188_v7  ;;  %v1881_v49 = vld [vmem:[#allocation2 + $0x8] sm:$0xff] }
0x136d   :  { %v1511_v61 = vpop.permute.xlu0 %1510  ;;  %1697 = vst.msk [vmem:[#allocation2 + $0x18] sm:$0xff] %vm988_vm5, %v1689_v60  ;;  %v1886_v21 = vpack.c.bf16 %v1881_v49, %v1880_v17  ;;  %v3046_v60 = vld [vmem:[%s4035_s9 + $0x18] sm:$0xff]   ;;  %v3052_v49 = vld [vmem:[%s4035_s9 + $0x30] sm:$0xff]  }
0x136e   :  { %1518 = vst.msk [vmem:[#allocation2 + $0x20] sm:$0xff] %vm807_vm4, %v1511_v61  ;;  %v3053_v17 = vld [vmem:[%s4035_s9 + $0x78] sm:$0xff]  }
0x136f   :  { %2924 = vmatpush3.bf16.msra.mxu1 %v3010_v62  ;;  %v3045_v62 = vld [vmem:[%s4035_s9 + $0x58] sm:$0xff]  }
0x1370   :  { %v1513_v11 = vpop.permute.xlu1 %1512  ;;  %2925 = vmatprep.subr.bf16.mxu1 %v3188_v7 }
0x1371   :  { %v1691_v13 = vpop.permute.xlu0 %1690  ;;  %1519 = vst.msk [vmem:[#allocation2 + $0x28] sm:$0xff] %vm807_vm4, %v1513_v11  ;;  %v1882_v45 = vld [vmem:[#allocation2 + $0x10] sm:$0xff]  ;;  %v3047_v11 = vld [vmem:[%s4035_s9 + $0x60] sm:$0xff]  }
0x1372   :  { %1698 = vst.msk [vmem:[#allocation2 + $0x20] sm:$0xff] %vm988_vm5, %v1691_v13 }
0x1373   :  { %2926 = vmatpush3.bf16.msra.mxu1 %v3011_v6 }
0x1374   :  { %2927 = vmatprep.subr.bf16.mxu1 %v3188_v7 }
0x1377   :  { %2928 = vmatpush3.bf16.msra.mxu1 %v3012_v14  ;;  %v3049_v14 = vld [vmem:[%s4035_s9 + $0x68] sm:$0xff]  }
0x1378   :  { %2929 = vmatprep.subr.bf16.mxu1 %v3188_v7 }
0x137b   :  { %2930 = vmatpush3.bf16.msra.mxu1 %v3013_v1  ;;  %v3050_v1 = vld [vmem:[%s4035_s9 + $0x28] sm:$0xff]  }
0x137c   :  { %2931 = vmatprep.subr.bf16.mxu1 %v3188_v7 }
0x137f   :  { %2932 = vmatpush3.bf16.msra.mxu1 %v3014_v56  ;;  %v3051_v56 = vld [vmem:[%s4035_s9 + $0x70] sm:$0xff]  }
0x1380   :  { %2727 = vmatprep.subr.bf16.mxu1 %v3039_v57 }
0x1382   :  { %2934 = vmatmul.mubr.bf16.vlgmr.msra.gmra.mrb[40].mxu1 %v1886_v21  ;;  %v3054_v21 = vld [vmem:[%s4035_s9 + $0x38] sm:$0xff]  }
0x1383   :  { %2937 = vmatprep.mubr.msk.bf16.mxu1 %vm3190_vm0, %v3188_v7  ;;  %2728 = vmatpush3.bf16.msra.mxu1 %v3040_v9 }
0x1384   :  { %2729 = vmatprep.subr.bf16.mxu1 %v3041_v10 }
0x1435   :  { %v2915_v35 = vpop.f32.mrb[36].mxu1 }
0x1436   :  { %v1851_v44 = vpop.f32.mrb[37].mxu1 }
0x1437   :  { %1868 = vrot.lane.b32.xlu1 %v1851_v44, %s3191_s22  ;;  %v2916_v46 = vpop.f32.mrb[38].mxu1 }
0x1438   :  { %v1854_v47 = vpop.f32.mrb[39].mxu1 }
0x1439   :  { %1870 = vrot.lane.b32.xlu0 %v1854_v47, %s3191_s22 }
0x143b   :  { %1692 = vrot.lane.b32.xlu1 %v3739_v43, %s3192_s23  ;;  %v3042_v43 = vld [vmem:[%s4035_s9 + $0x8] sm:$0xff]  }
0x143c   :  { %2730 = vmatpush3.bf16.msra.mxu1 %v3042_v43 }
0x143f   :  { %1872 = vrot.lane.b32.xlu1 %v2915_v35, %s3191_s22 }
0x1455   :  { %v1994_v34 = vpop.f32.mrb[40].mxu1 }
0x1456   :  { %v1995_v16 = vadd.f32 %v3902_v12, %v1994_v34  ;;  %v2935_v38 = vpop.f32.mrb[41].mxu1 }
0x1457   :  { %v1997_v30 = vpop.f32.mrb[42].mxu1 }
0x1458   :  { %v1998_v31 = vadd.f32 %v3902_v12, %v1997_v30  ;;  %v2936_v24 = vpop.f32.mrb[43].mxu1  ;;  %v3907_v39 = vadd.f32 %v3265_v2, %v1995_v16 }
0x145a   :  { %v3910_v40 = vadd.f32 %v3271_v4, %v1998_v31  ;;  %v3043_v4 = vld [vmem:[%s4035_s9 + $0x50] sm:$0xff]  }
0x145b   :  { %2731 = vmatprep.subr.bf16.mxu1 %v3043_v4 }
0x145c   :  { %v2023_v41 = vpack.c.bf16 %v3910_v40, %v3907_v39  ;;  %2732 = vmatpush3.bf16.msra.mxu1 %v3044_v54 }
0x145d   :  { %2733 = vmatprep.subr.bf16.mxu1 %v3045_v62 }
0x145e   :  { %2167 = vmatmul.mubr.bf16.vlgmr.msra.gmra.mrb[48].mxu0 %v2023_v41 }
0x145f   :  { %2176 = vmatprep.mubr.bf16.mxu0 %v3189_v50 }
0x1460   :  { %2734 = vmatpush3.bf16.msra.mxu1 %v3046_v60 }
0x1461   :  { %2735 = vmatprep.subr.bf16.mxu1 %v3047_v11 }
0x14a9   :  { %v1869_v37 = vpop.permute.xlu1 %1868 }
0x14aa   :  { %1877 = vst.msk [vmem:[#allocation2 + $0x18] sm:$0xff] %vm1169_vm6, %v1869_v37 }
0x14ab   :  { %v1871_v18 = vpop.permute.xlu0 %1870 }
0x14ac   :  { %1878 = vst.msk [vmem:[#allocation2 + $0x20] sm:$0xff] %vm1169_vm6, %v1871_v18 }
0x14ad   :  { %v1693_v42 = vpop.permute.xlu1 %1692 }
0x14ae   :  { %1699 = vst.msk [vmem:[#allocation2 + $0x28] sm:$0xff] %vm988_vm5, %v1693_v42 }
0x14b1   :  { %v1873_v2 = vpop.permute.xlu1 %1872  ;;  %v1883_v48 = vld [vmem:[#allocation2 + $0x18] sm:$0xff] }
0x14b2   :  { %1879 = vst.msk [vmem:[#allocation2 + $0x28] sm:$0xff] %vm1169_vm6, %v1873_v2  ;;  %v1887_v53 = vpack.c.bf16 %v1883_v48, %v1882_v45 }
0x14b3   :  { %v1884_v61 = vld [vmem:[#allocation2 + $0x20] sm:$0xff] }
0x14b4   :  { %2938 = vmatmul.mubr.bf16.gmra.mrb[44].mxu1 %v1887_v53 }
0x14b5   :  { %2941 = vmatprep.mubr.msk.bf16.mxu1 %vm3190_vm0, %v3188_v7  ;;  %v3048_v7 = vld [vmem:[%s4035_s9 + $0x20] sm:$0xff]  }
0x14b6   :  { %2736 = vmatpush3.bf16.msra.mxu1 %v3048_v7 }
0x14b7   :  { %2737 = vmatprep.subr.bf16.mxu1 %v3049_v14  ;;  %v3996_v14 = vld [vmem:[%s4038_s10] ss:$0 sm:$0xff] }
0x14b9   :  { %v1885_v6 = vld [vmem:[#allocation2 + $0x28] sm:$0xff] }
0x14ba   :  { %v1888_v13 = vpack.c.bf16 %v1885_v6, %v1884_v61  ;;  %2738 = vmatpush3.bf16.msra.mxu1 %v3050_v1 }
0x14bb   :  { %2739 = vmatprep.subr.bf16.mxu1 %v3051_v56 }
0x14bc   :  { %2942 = vmatmul.mubr.bf16.gmra.mrb[48].mxu1 %v1888_v13 }
0x14be   :  { %2740 = vmatpush3.bf16.msra.mxu1 %v3052_v49 }
0x14bf   :  { %2741 = vmatprep.subr.bf16.mxu1 %v3053_v17 }
0x14c2   :  { %2742 = vmatpush3.bf16.msra.mxu1 %v3054_v21 }
0x1531   :  { %v2168_v19 = vpop.f32.mrb[48].mxu0 }
0x1532   :  { %v2169_v23 = vadd.f32 %v2168_v19, %v3962_v25  ;;  %v2170_v28 = vpop.f32.mrb[49].mxu0 }
0x1533   :  { %v2171_v63 = vadd.f32 %v2170_v28, %v3966_v26  ;;  %v2172_v58 = vpop.f32.mrb[50].mxu0 }
0x1534   :  { %v2209_v15 = vmul.f32 0.70710677, %v2169_v23  ;;  %v2173_v20 = vadd.f32 %v2172_v58, %v3962_v25  ;;  %v2174_v0 = vpop.f32.mrb[51].mxu0  ;;  %v2197_v46 = vmul.f32 0.5, %v2169_v23 }
0x1535   :  { %v2210_v8 = vmul.f32 0.70710677, %v2171_v63  ;;  %v2175_v36 = vadd.f32 %v2174_v0, %v3966_v26  ;;  %v2198_v9 = vmul.f32 0.5, %v2171_v63 }
0x1536   :  { %3163 = verf.f32 %v2209_v15  ;;  %v2211_v52 = vmul.f32 0.70710677, %v2173_v20  ;;  %v2199_v47 = vmul.f32 0.5, %v2173_v20 }
0x1537   :  { %3165 = verf.f32 %v2210_v8  ;;  %v2212_v51 = vmul.f32 0.70710677, %v2175_v36  ;;  %v2200_v10 = vmul.f32 0.5, %v2175_v36 }
0x1538   :  { %3167 = verf.f32 %v2211_v52 }
0x1539   :  { %3169 = verf.f32 %v2212_v51 }
0x1540   :  { %v3164_v55 = vpop.eup %3163 }
0x1541   :  { %v3166_v59 = vpop.eup %3165  ;;  %v2233_v32 = vadd.f32 1.0, %v3164_v55 }
0x1542   :  { %v3168_v33 = vpop.eup %3167  ;;  %v2234_v35 = vadd.f32 1.0, %v3166_v59 }
0x1543   :  { %v3170_v44 = vpop.eup %3169  ;;  %v2235_v57 = vadd.f32 1.0, %v3168_v33  ;;  %v2245_v34 = vmul.f32 %v2233_v32, %v2197_v46 }
0x1544   :  { %v2236_v43 = vadd.f32 1.0, %v3170_v44  ;;  %v2246_v38 = vmul.f32 %v2234_v35, %v2198_v9 }
0x1545   :  { %v2247_v16 = vmul.f32 %v2235_v57, %v2199_v47 }
0x1546   :  { %v2248_v30 = vmul.f32 %v2236_v43, %v2200_v10 }
0x1547   :  { %v2257_v31 = vpack.c.bf16 %v2247_v16, %v2245_v34 }
0x1548   :  { %v2258_v24 = vpack.c.bf16 %v2248_v30, %v2246_v38 }
0x154a   :  { %2430 = vmatprep.mubr.bf16.mxu1 %v2258_v24 }
0x154b   :  { %2431 = vmatmul.mubr.bf16.vlgmr.msra.gmra.mrb[52].mxu1 %v2257_v31 }
0x1587   :  { %v2002_v41 = vpop.f32.mrb[44].mxu1 }
0x1588   :  { %v2003_v37 = vadd.f32 %v3902_v12, %v2002_v41  ;;  %v2939_v18 = vpop.f32.mrb[45].mxu1 }
0x1589   :  { %v2005_v42 = vpop.f32.mrb[46].mxu1 }
0x158a   :  { %v2006_v2 = vadd.f32 %v3902_v12, %v2005_v42  ;;  %v2940_v45 = vpop.f32.mrb[47].mxu1  ;;  %v3975_v48 = vadd.f32 %v3267_v3, %v2003_v37 }
0x158c   :  { %v3978_v4 = vadd.f32 %v3273_v5, %v2006_v2 }
0x158e   :  { %v2024_v53 = vpack.c.bf16 %v3978_v4, %v3975_v48 }
0x158f   :  { %v2010_v54 = vpop.f32.mrb[48].mxu1 }
0x1590   :  { %v2011_v62 = vadd.f32 %v3902_v12, %v2010_v54  ;;  %v2943_v60 = vpop.f32.mrb[49].mxu1  ;;  %2177 = vmatmul.mubr.bf16.gmra.mrb[52].mxu0 %v2024_v53 }
0x1591   :  { %v2013_v61 = vpop.f32.mrb[50].mxu1  ;;  %2186 = vmatprep.mubr.bf16.mxu0 %v3189_v50 }
0x1592   :  { %v2014_v6 = vadd.f32 %v3902_v12, %v2013_v61  ;;  %v2944_v11 = vpop.f32.mrb[51].mxu1  ;;  %v3986_v3 = vadd.f32 %v3312_v27, %v2011_v62 }
0x1594   :  { %v3989_v5 = vadd.f32 %v3317_v29, %v2014_v6 }
0x1596   :  { %v2025_v13 = vpack.c.bf16 %v3989_v5, %v3986_v3 }
0x1598   :  { %2187 = vmatmul.mubr.bf16.gmra.mrb[56].mxu0 %v2025_v13 }
0x161e   :  { %v2743_v7 = vpop.f32.mrb[52].mxu1 }
0x161f   :  { %v2744_v50 = vpop.f32.mrb[53].mxu1 }
0x1620   :  { %v2745_v1 = vadd.f32 %v2744_v50, %v2743_v7  ;;  %v2746_v12 = vpop.f32.mrb[54].mxu1 }
0x1621   :  { %v2747_v56 = vpop.f32.mrb[55].mxu1 }
0x1622   :  { %v2433_v27 = vadd.f32 %v2745_v1, %v3996_v14  ;;  %v2748_v49 = vadd.f32 %v2747_v56, %v2746_v12 }
0x1624   :  { %v2436_v29 = vadd.f32 %v2748_v49, %v3996_v14  ;;  %v2455_v17 = vadd.f32 %v2433_v27, %v3907_v39 }
0x1626   :  { %v2456_v21 = vadd.f32 %v2436_v29, %v3910_v40 }
0x1628   :  { %v2625_v22 = vpack.c.bf16 %v2456_v21, %v2455_v17 }
0x162a   :  { %2626 = vst [vmem:[%s4039_s12] sm:$0xff] %v2625_v22  }
0x1663   :  { %v2178_v19 = vpop.f32.mrb[52].mxu0 }
0x1664   :  { %v2179_v23 = vadd.f32 %v2178_v19, %v3962_v25  ;;  %v2180_v28 = vpop.f32.mrb[53].mxu0 }
0x1665   :  { %v2181_v63 = vadd.f32 %v2180_v28, %v3966_v26  ;;  %v2182_v58 = vpop.f32.mrb[54].mxu0 }
0x1666   :  { %v2213_v15 = vmul.f32 0.70710677, %v2179_v23  ;;  %v2183_v20 = vadd.f32 %v2182_v58, %v3962_v25  ;;  %v2184_v0 = vpop.f32.mrb[55].mxu0  ;;  %v2201_v31 = vmul.f32 0.5, %v2179_v23 }
0x1667   :  { %v2214_v8 = vmul.f32 0.70710677, %v2181_v63  ;;  %v2185_v39 = vadd.f32 %v2184_v0, %v3966_v26 }
0x1668   :  { %3171 = verf.f32 %v2213_v15  ;;  %v2215_v40 = vmul.f32 0.70710677, %v2183_v20  ;;  %v2203_v24 = vmul.f32 0.5, %v2183_v20 }
0x1669   :  { %3173 = verf.f32 %v2214_v8  ;;  %v2216_v36 = vmul.f32 0.70710677, %v2185_v39  ;;  %v2204_v37 = vmul.f32 0.5, %v2185_v39 }
0x166a   :  { %3175 = verf.f32 %v2215_v40 }
0x166b   :  { %3177 = verf.f32 %v2216_v36  ;;  %v2188_v52 = vpop.f32.mrb[56].mxu0 }
0x166c   :  { %v2189_v51 = vadd.f32 %v2188_v52, %v3962_v25  ;;  %v2190_v55 = vpop.f32.mrb[57].mxu0 }
0x166d   :  { %v2191_v59 = vadd.f32 %v2190_v55, %v3966_v26  ;;  %v2192_v32 = vpop.f32.mrb[58].mxu0 }
0x166e   :  { %v2217_v33 = vmul.f32 0.70710677, %v2189_v51  ;;  %v2193_v35 = vadd.f32 %v2192_v32, %v3962_v25  ;;  %v2194_v44 = vpop.f32.mrb[59].mxu0  ;;  %v2202_v25 = vmul.f32 0.5, %v2181_v63  ;;  %v2205_v7 = vmul.f32 0.5, %v2189_v51 }
0x166f   :  { %v2218_v46 = vmul.f32 0.70710677, %v2191_v59  ;;  %v2195_v47 = vadd.f32 %v2194_v44, %v3966_v26  ;;  %v2206_v12 = vmul.f32 0.5, %v2191_v59 }
0x1670   :  { %3179 = verf.f32 %v2217_v33  ;;  %v2219_v57 = vmul.f32 0.70710677, %v2193_v35  ;;  %v2207_v50 = vmul.f32 0.5, %v2193_v35 }
0x1671   :  { %3181 = verf.f32 %v2218_v46  ;;  %v2220_v9 = vmul.f32 0.70710677, %v2195_v47  ;;  %v2208_v56 = vmul.f32 0.5, %v2195_v47 }
0x1672   :  { %v3172_v10 = vpop.eup %3171  ;;  %3183 = verf.f32 %v2219_v57 }
0x1673   :  { %v3174_v43 = vpop.eup %3173  ;;  %v2237_v34 = vadd.f32 1.0, %v3172_v10  ;;  %3185 = verf.f32 %v2220_v9 }
0x1674   :  { %v3176_v16 = vpop.eup %3175  ;;  %v2238_v38 = vadd.f32 1.0, %v3174_v43 }
0x1675   :  { %v3178_v30 = vpop.eup %3177  ;;  %v2239_v41 = vadd.f32 1.0, %v3176_v16  ;;  %v2249_v42 = vmul.f32 %v2237_v34, %v2201_v31 }
0x1676   :  { %v2240_v18 = vadd.f32 1.0, %v3178_v30  ;;  %v2250_v2 = vmul.f32 %v2238_v38, %v2202_v25 }
0x1677   :  { %v2251_v26 = vmul.f32 %v2239_v41, %v2203_v24 }
0x1678   :  { %v2252_v45 = vmul.f32 %v2240_v18, %v2204_v37 }
0x1679   :  { %v2259_v53 = vpack.c.bf16 %v2251_v26, %v2249_v42 }
0x167a   :  { %v3180_v54 = vpop.eup %3179  ;;  %v2260_v62 = vpack.c.bf16 %v2252_v45, %v2250_v2 }
0x167b   :  { %v3182_v60 = vpop.eup %3181  ;;  %v2241_v61 = vadd.f32 1.0, %v3180_v54 }
0x167c   :  { %v3184_v6 = vpop.eup %3183  ;;  %v2242_v11 = vadd.f32 1.0, %v3182_v60  ;;  %2438 = vmatprep.mubr.bf16.mxu1 %v2260_v62 }
0x167d   :  { %v3186_v13 = vpop.eup %3185  ;;  %v2243_v1 = vadd.f32 1.0, %v3184_v6  ;;  %2439 = vmatmul.mubr.bf16.gmra.mrb[56].mxu1 %v2259_v53  ;;  %v2253_v49 = vmul.f32 %v2241_v61, %v2205_v7 }
0x167e   :  { %v2244_v27 = vadd.f32 1.0, %v3186_v13  ;;  %v2254_v17 = vmul.f32 %v2242_v11, %v2206_v12 }
0x167f   :  { %v2255_v29 = vmul.f32 %v2243_v1, %v2207_v50 }
0x1680   :  { %v2256_v21 = vmul.f32 %v2244_v27, %v2208_v56 }
0x1681   :  { %v2261_v22 = vpack.c.bf16 %v2255_v29, %v2253_v49 }
0x1682   :  { %v2262_v19 = vpack.c.bf16 %v2256_v21, %v2254_v17 }
0x1684   :  { %2446 = vmatprep.mubr.bf16.mxu1 %v2262_v19 }
0x1685   :  { %2447 = vmatmul.mubr.bf16.gmra.mrb[60].mxu1 %v2261_v22 }
0x1750   :  { %v2749_v23 = vpop.f32.mrb[56].mxu1 }
0x1751   :  { %v2750_v28 = vpop.f32.mrb[57].mxu1 }
0x1752   :  { %v2751_v63 = vadd.f32 %v2750_v28, %v2749_v23  ;;  %v2752_v58 = vpop.f32.mrb[58].mxu1 }
0x1753   :  { %v2753_v15 = vpop.f32.mrb[59].mxu1 }
0x1754   :  { %v2441_v20 = vadd.f32 %v2751_v63, %v3996_v14  ;;  %v2754_v0 = vadd.f32 %v2753_v15, %v2752_v58 }
0x1756   :  { %v2444_v8 = vadd.f32 %v2754_v0, %v3996_v14  ;;  %v2457_v39 = vadd.f32 %v2441_v20, %v3975_v48 }
0x1758   :  { %v2458_v40 = vadd.f32 %v2444_v8, %v3978_v4  ;;  %v2755_v36 = vpop.f32.mrb[60].mxu1 }
0x1759   :  { %v2756_v52 = vpop.f32.mrb[61].mxu1 }
0x175a   :  { %v2630_v51 = vpack.c.bf16 %v2458_v40, %v2457_v39  ;;  %v2757_v55 = vadd.f32 %v2756_v52, %v2755_v36  ;;  %v2758_v59 = vpop.f32.mrb[62].mxu1 }
0x175b   :  { %v2759_v32 = vpop.f32.mrb[63].mxu1 }
0x175c   :  { %2639 = vst [vmem:[%s4039_s12 + $0x8] sm:$0xff] %v2630_v51   ;;  %v2449_v33 = vadd.f32 %v2757_v55, %v3996_v14  ;;  %v2760_v35 = vadd.f32 %v2759_v32, %v2758_v59 }
0x175e   :  { %v2452_v44 = vadd.f32 %v2760_v35, %v3996_v14  ;;  %v2459_v46 = vadd.f32 %v2449_v33, %v3986_v3 }
0x1760   :  { %v2460_v48 = vadd.f32 %v2452_v44, %v3989_v5 }
0x1762   :  { %v2635_v4 = vpack.c.bf16 %v2460_v48, %v2459_v46 }
0x1764   :  { %2640 = vst [vmem:[%s4039_s12 + $0x10] sm:$0xff] %v2635_v4  }

</bundles_post_ra>
